<compile_context>
chip_gen: v7x
topology: tpu7x:2x2x1
jax: 0.10.0
libtpu: 0.0.40
codegen_flags: <defaults>
</compile_context>

<pallas_src>
import jax
import jax.numpy as jnp
from jax.experimental import pallas as pl
from jax.experimental.pallas import tpu as pltpu

INPUT_DIM = 784
HIDDEN_DIM = 400
LATENT_DIM = 20

# Lane-padded dims.
IN_PAD = 896                 # 7 * 128
HID_PAD = 512                # 4 * 128
LAT_PAD = 64                 # per-head padded latent width
STATS_PAD = 2 * LAT_PAD      # 128: lanes [0,20)=mu, [64,84)=logvar, rest exactly 0
B_BLK = 128                  # batch rows per grid step


def vae_forward_kernel(x_ref, eps_ref,
                       w1_ref, b1_ref,
                       wst_ref, bst_ref,
                       wd1_ref, bd1_ref,
                       wd2_ref, bd2_ref,
                       xrec_ref, stats_ref):
    f32 = jnp.float32
    x = x_ref[...]                                                   # (B_BLK, IN_PAD) f32

    # ---- Encoder fc1 + ReLU ----
    h = jnp.dot(x, w1_ref[...].astype(f32), preferred_element_type=f32) + b1_ref[...]
    h = jnp.maximum(h, 0.0)                                          # (B_BLK, HID_PAD)

    # ---- Fused mu|logvar head: one lane-dense (B, 128) matmul + dense store ----
    stats = jnp.dot(h, wst_ref[...].astype(f32), preferred_element_type=f32) + bst_ref[...]
    stats_ref[...] = stats                                           # (B_BLK, 128)

    mu_p = stats[:, :LAT_PAD]       # (B_BLK, 64); lanes >= 20 are exactly 0
    lv_p = stats[:, LAT_PAD:]       # (B_BLK, 64); lanes >= 20 are exactly 0

    # ---- Reparameterization: z = mu + eps * exp(0.5 * logvar) ----
    # Padded lanes: 0 + 0 * exp(0) = 0, so they add nothing in the decoder.
    z = mu_p + eps_ref[...] * jnp.exp(0.5 * lv_p)                    # (B_BLK, 64)

    # ---- Decoder fc1 + ReLU ----
    hd = jnp.dot(z, wd1_ref[...].astype(f32), preferred_element_type=f32) + bd1_ref[...]
    hd = jnp.maximum(hd, 0.0)                                        # (B_BLK, HID_PAD)

    # ---- Decoder fc2 + sigmoid ----
    logits = jnp.dot(hd, wd2_ref[...].astype(f32), preferred_element_type=f32) + bd2_ref[...]
    xrec_ref[...] = jax.nn.sigmoid(logits)   # padded cols -> 0.5, sliced off in the wrapper


def _pad2(a, rows, cols):
    r, c = a.shape
    return jnp.pad(a, ((0, rows - r), (0, cols - c)))


def prepare_params(params):
    """Pad to lane multiples, fuse mu/logvar heads, quantize weights to bf16."""
    (enc_w1, enc_b1, enc_wmu, enc_bmu, enc_wlv, enc_blv,
     dec_w1, dec_b1, dec_w2, dec_b2) = params

    w1 = _pad2(enc_w1, IN_PAD, HID_PAD).astype(jnp.bfloat16)
    b1 = _pad2(enc_b1, 1, HID_PAD).astype(jnp.float32)

    wst = jnp.zeros((HID_PAD, STATS_PAD), jnp.float32)
    wst = wst.at[:HIDDEN_DIM, :LATENT_DIM].set(enc_wmu)
    wst = wst.at[:HIDDEN_DIM, LAT_PAD:LAT_PAD + LATENT_DIM].set(enc_wlv)
    wst = wst.astype(jnp.bfloat16)
    bst = jnp.zeros((1, STATS_PAD), jnp.float32)
    bst = bst.at[:, :LATENT_DIM].set(enc_bmu)
    bst = bst.at[:, LAT_PAD:LAT_PAD + LATENT_DIM].set(enc_blv)

    wd1 = _pad2(dec_w1, LAT_PAD, HID_PAD).astype(jnp.bfloat16)
    bd1 = _pad2(dec_b1, 1, HID_PAD).astype(jnp.float32)
    wd2 = _pad2(dec_w2, HID_PAD, IN_PAD).astype(jnp.bfloat16)
    bd2 = _pad2(dec_b2, 1, IN_PAD).astype(jnp.float32)

    return (w1, b1, wst, bst, wd1, bd1, wd2, bd2)


@jax.jit
def vae_forward(x, eps, prepped):
    B = x.shape[0]
    n_blocks = pl.cdiv(B, B_BLK)
    Bp = n_blocks * B_BLK

    # Zero-pad batch and feature dims (zeros are benign everywhere; outputs sliced back).
    x_p = jnp.zeros((Bp, IN_PAD), jnp.float32).at[:B, :INPUT_DIM].set(x)
    eps_p = jnp.zeros((Bp, LAT_PAD), jnp.float32).at[:B, :LATENT_DIM].set(eps)

    def batch_spec(cols):
        return pl.BlockSpec((B_BLK, cols), lambda i: (i, 0))

    def resident_spec(shape):
        # Constant block index -> DMA'd once, stays resident in VMEM across grid steps.
        return pl.BlockSpec(shape, lambda i: (0, 0))

    w1, b1, wst, bst, wd1, bd1, wd2, bd2 = prepped

    xrec_p, stats_p = pl.pallas_call(
        vae_forward_kernel,
        out_shape=(
            jax.ShapeDtypeStruct((Bp, IN_PAD), jnp.float32),     # padded x_recon
            jax.ShapeDtypeStruct((Bp, STATS_PAD), jnp.float32),  # fused [mu | logvar]
        ),
        grid=(n_blocks,),
        in_specs=[
            batch_spec(IN_PAD),                      # x
            batch_spec(LAT_PAD),                     # eps
            resident_spec((IN_PAD, HID_PAD)),        # enc fc1 W (bf16)
            resident_spec((1, HID_PAD)),             # enc fc1 b
            resident_spec((HID_PAD, STATS_PAD)),     # fused mu|logvar W (bf16)
            resident_spec((1, STATS_PAD)),           # fused mu|logvar b
            resident_spec((LAT_PAD, HID_PAD)),       # dec fc1 W (bf16)
            resident_spec((1, HID_PAD)),             # dec fc1 b
            resident_spec((HID_PAD, IN_PAD)),        # dec fc2 W (bf16)
            resident_spec((1, IN_PAD)),              # dec fc2 b
        ],
        out_specs=(batch_spec(IN_PAD), batch_spec(STATS_PAD)),
        compiler_params=pltpu.CompilerParams(
            dimension_semantics=("parallel",),       # batch blocks independent (v7x: 2 TCs)
        ),
    )(x_p, eps_p, w1, b1, wst, bst, wd1, bd1, wd2, bd2)

    x_recon = xrec_p[:B, :INPUT_DIM]
    mu = stats_p[:B, :LATENT_DIM]
    logvar = stats_p[:B, LAT_PAD:LAT_PAD + LATENT_DIM]
    return x_recon, mu, logvar


def init_params(key):
    """Deterministic PyTorch-style init; weights stored as (in, out), float32."""
    ks = jax.random.split(key, 10)

    def linear(kw, kb, fan_in, fan_out):
        bound = 1.0 / jnp.sqrt(jnp.float32(fan_in))
        w = jax.random.uniform(kw, (fan_in, fan_out), jnp.float32, -bound, bound)
        b = jax.random.uniform(kb, (1, fan_out), jnp.float32, -bound, bound)
        return w, b

    enc_w1, enc_b1 = linear(ks[0], ks[1], INPUT_DIM, HIDDEN_DIM)
    enc_wmu, enc_bmu = linear(ks[2], ks[3], HIDDEN_DIM, LATENT_DIM)
    enc_wlv, enc_blv = linear(ks[4], ks[5], HIDDEN_DIM, LATENT_DIM)
    dec_w1, dec_b1 = linear(ks[6], ks[7], LATENT_DIM, HIDDEN_DIM)
    dec_w2, dec_b2 = linear(ks[8], ks[9], HIDDEN_DIM, INPUT_DIM)
    return (enc_w1, enc_b1, enc_wmu, enc_bmu, enc_wlv, enc_blv,
            dec_w1, dec_b1, dec_w2, dec_b2)


def reference_forward(x, eps, prepped):
    """Pure-JAX reference on the same padded / bf16-quantized params."""
    w1, b1, wst, bst, wd1, bd1, wd2, bd2 = [jnp.asarray(a, jnp.float32) for a in prepped]
    B = x.shape[0]
    x_p = jnp.zeros((B, IN_PAD), jnp.float32).at[:, :INPUT_DIM].set(x)
    eps_p = jnp.zeros((B, LAT_PAD), jnp.float32).at[:, :LATENT_DIM].set(eps)
    h = jnp.maximum(x_p @ w1 + b1, 0.0)
    stats = h @ wst + bst
    mu_p, lv_p = stats[:, :LAT_PAD], stats[:, LAT_PAD:]
    z = mu_p + eps_p * jnp.exp(0.5 * lv_p)
    hd = jnp.maximum(z @ wd1 + bd1, 0.0)
    xrec = jax.nn.sigmoid(hd @ wd2 + bd2)
    return (xrec[:, :INPUT_DIM],
            stats[:, :LATENT_DIM],
            stats[:, LAT_PAD:LAT_PAD + LATENT_DIM])


if __name__ == "__main__":
    key = jax.random.PRNGKey(0)
    k_param, k_x, k_eps = jax.random.split(key, 3)

    B = 256  # 2 grid steps of 128 rows each; weights stay resident across steps
    raw_params = init_params(k_param)
    prepped = prepare_params(raw_params)

    x = jax.random.uniform(k_x, (B, INPUT_DIM), jnp.float32)      # MNIST-like pixels in [0,1)
    eps = jax.random.normal(k_eps, (B, LATENT_DIM), jnp.float32)  # reparameterization noise

    x_recon, mu, logvar = jax.block_until_ready(vae_forward(x, eps, prepped))

    # Correctness check vs. a pure-JAX reference using the identical (bf16-quantized,
    # padded) parameters; tolerance allows for minor matmul accumulation differences.
    xr_ref, mu_ref, lv_ref = reference_forward(x, eps, prepped)
    assert x_recon.shape == (B, INPUT_DIM) and mu.shape == (B, LATENT_DIM)
    assert jnp.allclose(x_recon, xr_ref, atol=1e-3, rtol=1e-3)
    assert jnp.allclose(mu, mu_ref, atol=1e-3, rtol=1e-3)
    assert jnp.allclose(logvar, lv_ref, atol=1e-3, rtol=1e-3)
    assert bool(jnp.all((x_recon >= 0.0) & (x_recon <= 1.0)))

    print("KERNEL_OK")
</pallas_src>

<mosaic_0001>
module attributes {stable_mosaic.version = 11 : i64} {
  func.func @vae_forward_kernel(%arg0: i32, %arg1: memref<128x896xf32, #tpu.memory_space<vmem>>, %arg2: memref<128x64xf32, #tpu.memory_space<vmem>>, %arg3: memref<896x512xbf16, #tpu.memory_space<vmem>>, %arg4: memref<1x512xf32, #tpu.memory_space<vmem>>, %arg5: memref<512x128xbf16, #tpu.memory_space<vmem>>, %arg6: memref<1x128xf32, #tpu.memory_space<vmem>>, %arg7: memref<64x512xbf16, #tpu.memory_space<vmem>>, %arg8: memref<1x512xf32, #tpu.memory_space<vmem>>, %arg9: memref<512x896xbf16, #tpu.memory_space<vmem>>, %arg10: memref<1x896xf32, #tpu.memory_space<vmem>>, %arg11: memref<128x896xf32, #tpu.memory_space<vmem>>, %arg12: memref<128x128xf32, #tpu.memory_space<vmem>>) attributes {dimension_semantics = [#tpu.dimension_semantics<parallel>], iteration_bounds = array<i64: 2>, scalar_prefetch = 0 : i64, scratch_operands = 0 : i64, tpu.core_type = #tpu.core_type<tc>, window_params = [{transform_indices = @transform_0, window_bounds = array<i64: 128, 896>}, {transform_indices = @transform_1, window_bounds = array<i64: 128, 64>}, {pipeline_mode = #tpu.pipeline_mode<synchronous>, transform_indices = @transform_2, window_bounds = array<i64: 896, 512>}, {pipeline_mode = #tpu.pipeline_mode<synchronous>, transform_indices = @transform_3, window_bounds = array<i64: 1, 512>}, {pipeline_mode = #tpu.pipeline_mode<synchronous>, transform_indices = @transform_4, window_bounds = array<i64: 512, 128>}, {pipeline_mode = #tpu.pipeline_mode<synchronous>, transform_indices = @transform_5, window_bounds = array<i64: 1, 128>}, {pipeline_mode = #tpu.pipeline_mode<synchronous>, transform_indices = @transform_6, window_bounds = array<i64: 64, 512>}, {pipeline_mode = #tpu.pipeline_mode<synchronous>, transform_indices = @transform_7, window_bounds = array<i64: 1, 512>}, {pipeline_mode = #tpu.pipeline_mode<synchronous>, transform_indices = @transform_8, window_bounds = array<i64: 512, 896>}, {pipeline_mode = #tpu.pipeline_mode<synchronous>, transform_indices = @transform_9, window_bounds = array<i64: 1, 896>}, {transform_indices = @transform_10, window_bounds = array<i64: 128, 896>}, {transform_indices = @transform_11, window_bounds = array<i64: 128, 128>}]} {
    %c0 = arith.constant 0 : index
    %c0_0 = arith.constant 0 : index
    %0 = vector.load %arg1[%c0, %c0_0] : memref<128x896xf32, #tpu.memory_space<vmem>>, vector<128x896xf32>
    %c0_1 = arith.constant 0 : index
    %c0_2 = arith.constant 0 : index
    %1 = vector.load %arg3[%c0_1, %c0_2] : memref<896x512xbf16, #tpu.memory_space<vmem>>, vector<896x512xbf16>
    %2 = arith.extf %1 : vector<896x512xbf16> to vector<896x512xf32>
    %cst = arith.constant dense<0.000000e+00> : vector<128x512xf32>
    %3 = tpu.matmul %0, %2, %cst {dimension_numbers = #tpu.dot_dimension_numbers<[1], [0], [0], [1], [0, 0, 1, 1], [], []>} : vector<128x896xf32>, vector<896x512xf32>, vector<128x512xf32> -> vector<128x512xf32>
    %c0_3 = arith.constant 0 : index
    %c0_4 = arith.constant 0 : index
    %4 = vector.load %arg4[%c0_3, %c0_4] : memref<1x512xf32, #tpu.memory_space<vmem>>, vector<1x512xf32>
    %5 = vector.broadcast %4 : vector<1x512xf32> to vector<128x512xf32>
    %6 = arith.addf %3, %5 : vector<128x512xf32>
    %cst_5 = arith.constant 0.000000e+00 : f32
    %7 = vector.broadcast %cst_5 : f32 to vector<128x512xf32>
    %8 = arith.maximumf %6, %7 : vector<128x512xf32>
    %c0_6 = arith.constant 0 : index
    %c0_7 = arith.constant 0 : index
    %9 = vector.load %arg5[%c0_6, %c0_7] : memref<512x128xbf16, #tpu.memory_space<vmem>>, vector<512x128xbf16>
    %10 = arith.extf %9 : vector<512x128xbf16> to vector<512x128xf32>
    %cst_8 = arith.constant dense<0.000000e+00> : vector<128x128xf32>
    %11 = tpu.matmul %8, %10, %cst_8 {dimension_numbers = #tpu.dot_dimension_numbers<[1], [0], [0], [1], [0, 0, 1, 1], [], []>} : vector<128x512xf32>, vector<512x128xf32>, vector<128x128xf32> -> vector<128x128xf32>
    %c0_9 = arith.constant 0 : index
    %c0_10 = arith.constant 0 : index
    %12 = vector.load %arg6[%c0_9, %c0_10] : memref<1x128xf32, #tpu.memory_space<vmem>>, vector<1x128xf32>
    %13 = vector.broadcast %12 : vector<1x128xf32> to vector<128x128xf32>
    %14 = arith.addf %11, %13 : vector<128x128xf32>
    %c0_11 = arith.constant 0 : index
    %c0_12 = arith.constant 0 : index
    %15 = vector.load %arg12[%c0_11, %c0_12] : memref<128x128xf32, #tpu.memory_space<vmem>>, vector<128x128xf32>
    tpu.vector_store %arg12[%c0_11, %c0_12], %14 {strides = array<i32>} : memref<128x128xf32, #tpu.memory_space<vmem>>, vector<128x128xf32>,
    %16 = vector.extract_strided_slice %14 {offsets = [0, 0], sizes = [128, 64], strides = [1, 1]} : vector<128x128xf32> to vector<128x64xf32>
    %17 = vector.extract_strided_slice %14 {offsets = [0, 64], sizes = [128, 64], strides = [1, 1]} : vector<128x128xf32> to vector<128x64xf32>
    %c0_13 = arith.constant 0 : index
    %c0_14 = arith.constant 0 : index
    %18 = vector.load %arg2[%c0_13, %c0_14] : memref<128x64xf32, #tpu.memory_space<vmem>>, vector<128x64xf32>
    %cst_15 = arith.constant 5.000000e-01 : f32
    %19 = vector.broadcast %cst_15 : f32 to vector<128x64xf32>
    %20 = arith.mulf %19, %17 : vector<128x64xf32>
    %21 = math.exp %20 : vector<128x64xf32>
    %22 = arith.mulf %18, %21 : vector<128x64xf32>
    %23 = arith.addf %16, %22 : vector<128x64xf32>
    %c0_16 = arith.constant 0 : index
    %c0_17 = arith.constant 0 : index
    %24 = vector.load %arg7[%c0_16, %c0_17] : memref<64x512xbf16, #tpu.memory_space<vmem>>, vector<64x512xbf16>
    %25 = arith.extf %24 : vector<64x512xbf16> to vector<64x512xf32>
    %cst_18 = arith.constant dense<0.000000e+00> : vector<128x512xf32>
    %26 = tpu.matmul %23, %25, %cst_18 {dimension_numbers = #tpu.dot_dimension_numbers<[1], [0], [0], [1], [0, 0, 1, 1], [], []>} : vector<128x64xf32>, vector<64x512xf32>, vector<128x512xf32> -> vector<128x512xf32>
    %c0_19 = arith.constant 0 : index
    %c0_20 = arith.constant 0 : index
    %27 = vector.load %arg8[%c0_19, %c0_20] : memref<1x512xf32, #tpu.memory_space<vmem>>, vector<1x512xf32>
    %28 = vector.broadcast %27 : vector<1x512xf32> to vector<128x512xf32>
    %29 = arith.addf %26, %28 : vector<128x512xf32>
    %cst_21 = arith.constant 0.000000e+00 : f32
    %30 = vector.broadcast %cst_21 : f32 to vector<128x512xf32>
    %31 = arith.maximumf %29, %30 : vector<128x512xf32>
    %c0_22 = arith.constant 0 : index
    %c0_23 = arith.constant 0 : index
    %32 = vector.load %arg9[%c0_22, %c0_23] : memref<512x896xbf16, #tpu.memory_space<vmem>>, vector<512x896xbf16>
    %33 = arith.extf %32 : vector<512x896xbf16> to vector<512x896xf32>
    %cst_24 = arith.constant dense<0.000000e+00> : vector<128x896xf32>
    %34 = tpu.matmul %31, %33, %cst_24 {dimension_numbers = #tpu.dot_dimension_numbers<[1], [0], [0], [1], [0, 0, 1, 1], [], []>} : vector<128x512xf32>, vector<512x896xf32>, vector<128x896xf32> -> vector<128x896xf32>
    %c0_25 = arith.constant 0 : index
    %c0_26 = arith.constant 0 : index
    %35 = vector.load %arg10[%c0_25, %c0_26] : memref<1x896xf32, #tpu.memory_space<vmem>>, vector<1x896xf32>
    %36 = vector.broadcast %35 : vector<1x896xf32> to vector<128x896xf32>
    %37 = arith.addf %34, %36 : vector<128x896xf32>
    %38 = arith.negf %37 : vector<128x896xf32>
    %39 = math.exp %38 : vector<128x896xf32>
    %cst_27 = arith.constant 1.000000e+00 : f32
    %40 = vector.broadcast %cst_27 : f32 to vector<128x896xf32>
    %41 = arith.addf %40, %39 : vector<128x896xf32>
    %42 = arith.divf %40, %41 : vector<128x896xf32>
    %c0_28 = arith.constant 0 : index
    %c0_29 = arith.constant 0 : index
    %43 = vector.load %arg11[%c0_28, %c0_29] : memref<128x896xf32, #tpu.memory_space<vmem>>, vector<128x896xf32>
    tpu.vector_store %arg11[%c0_28, %c0_29], %42 {strides = array<i32>} : memref<128x896xf32, #tpu.memory_space<vmem>>, vector<128x896xf32>,
    return
  }
  func.func @transform_0(%arg0: i32) -> (i32, i32) {
    %c0_i32 = arith.constant 0 : i32
    %c0_i32_0 = arith.constant 0 : i32
    return %arg0, %c0_i32 : i32, i32
  }
  func.func @transform_1(%arg0: i32) -> (i32, i32) {
    %c0_i32 = arith.constant 0 : i32
    %c0_i32_0 = arith.constant 0 : i32
    return %arg0, %c0_i32 : i32, i32
  }
  func.func @transform_2(%arg0: i32) -> (i32, i32) {
    %c0_i32 = arith.constant 0 : i32
    %c0_i32_0 = arith.constant 0 : i32
    %c0_i32_1 = arith.constant 0 : i32
    return %c0_i32, %c0_i32_0 : i32, i32
  }
  func.func @transform_3(%arg0: i32) -> (i32, i32) {
    %c0_i32 = arith.constant 0 : i32
    %c0_i32_0 = arith.constant 0 : i32
    %c0_i32_1 = arith.constant 0 : i32
    return %c0_i32, %c0_i32_0 : i32, i32
  }
  func.func @transform_4(%arg0: i32) -> (i32, i32) {
    %c0_i32 = arith.constant 0 : i32
    %c0_i32_0 = arith.constant 0 : i32
    %c0_i32_1 = arith.constant 0 : i32
    return %c0_i32, %c0_i32_0 : i32, i32
  }
  func.func @transform_5(%arg0: i32) -> (i32, i32) {
    %c0_i32 = arith.constant 0 : i32
    %c0_i32_0 = arith.constant 0 : i32
    %c0_i32_1 = arith.constant 0 : i32
    return %c0_i32, %c0_i32_0 : i32, i32
  }
  func.func @transform_6(%arg0: i32) -> (i32, i32) {
    %c0_i32 = arith.constant 0 : i32
    %c0_i32_0 = arith.constant 0 : i32
    %c0_i32_1 = arith.constant 0 : i32
    return %c0_i32, %c0_i32_0 : i32, i32
  }
  func.func @transform_7(%arg0: i32) -> (i32, i32) {
    %c0_i32 = arith.constant 0 : i32
    %c0_i32_0 = arith.constant 0 : i32
    %c0_i32_1 = arith.constant 0 : i32
    return %c0_i32, %c0_i32_0 : i32, i32
  }
  func.func @transform_8(%arg0: i32) -> (i32, i32) {
    %c0_i32 = arith.constant 0 : i32
    %c0_i32_0 = arith.constant 0 : i32
    %c0_i32_1 = arith.constant 0 : i32
    return %c0_i32, %c0_i32_0 : i32, i32
  }
  func.func @transform_9(%arg0: i32) -> (i32, i32) {
    %c0_i32 = arith.constant 0 : i32
    %c0_i32_0 = arith.constant 0 : i32
    %c0_i32_1 = arith.constant 0 : i32
    return %c0_i32, %c0_i32_0 : i32, i32
  }
  func.func @transform_10(%arg0: i32) -> (i32, i32) {
    %c0_i32 = arith.constant 0 : i32
    %c0_i32_0 = arith.constant 0 : i32
    return %arg0, %c0_i32 : i32, i32
  }
  func.func @transform_11(%arg0: i32) -> (i32, i32) {
    %c0_i32 = arith.constant 0 : i32
    %c0_i32_0 = arith.constant 0 : i32
    return %arg0, %c0_i32 : i32, i32
  }
}

</mosaic_0001>

<bundles_post_ra>
// kernel: vae_forward.1
= control target key start
LH: loop header
LB: loop body
LE: loop exit
PB: predicated region body
PF: predicated region fallthrough
CT: control target
= control target key end

     0   :  { %s10365_s17 = smov 0   ;;  %s13392_s0 = inlined_call_operand.vmem [shape: f32[256,896], index: 0, kind: input, shape index: {}]   ;;  %s13393_s1 = inlined_call_operand.vmem [shape: f32[256,64], index: 1, kind: input, shape index: {}]   ;;  %s13394_s2 = inlined_call_operand.vmem [shape: bf16[896,512], index: 2, kind: input, shape index: {}]   ;;  %s13395_s3 = inlined_call_operand.vmem [shape: f32[1,512], index: 3, kind: input, shape index: {}]   ;;  %s13396_s4 = inlined_call_operand.vmem [shape: bf16[512,128], index: 4, kind: input, shape index: {}]   ;;  %s13397_s5 = inlined_call_operand.vmem [shape: f32[1,128], index: 5, kind: input, shape index: {}]   ;;  %s13398_s6 = inlined_call_operand.vmem [shape: bf16[64,512], index: 6, kind: input, shape index: {}]   ;;  %s13399_s7 = inlined_call_operand.vmem [shape: f32[1,512], index: 7, kind: input, shape index: {}]   ;;  %s13400_s8 = inlined_call_operand.vmem [shape: bf16[512,896], index: 8, kind: input, shape index: {}]   ;;  %s13401_s9 = inlined_call_operand.vmem [shape: f32[1,896], index: 9, kind: input, shape index: {}]   ;;  %s13402_s10 = inlined_call_operand.vmem [shape: f32[256,896], index: 10, kind: output, shape index: {0}]   ;;  %s13403_s11 = inlined_call_operand.vmem [shape: f32[256,128], index: 11, kind: output, shape index: {1}]  }
   0x1 LB: > { %s6580_s18 = sadd.s32 4294967295, %s10301_s17   ;;  %p6584_p0 = scmp.ge.s32.totalorder %s10301_s17, 1  ;;  %s10301_s17 = sphi %s10365_s17, %s22_s17  }
   0x2   : > { %p353_p1 = scmp.lt.s32.totalorder %s10301_s17, 3 }
   0x4   : > { %p354_p2 = pnand %p6584_p0, %p353_p1 }
   0x6   : > { %357 = sbr.rel (%p354_p2) target bundleno = 1584 (0x630), region = 60 }
   0xd   : > { %v9134_v0 = vld [vmem:[%s13394_s2 + $0x4] ss:$16 sps:$4 sm:$0xff]   ;;  %v9136_v1 = vld [vmem:[%s13394_s2 + $0xc] ss:$16 sps:$4 sm:$0xff]   ;;  %v9138_v2 = vld [vmem:[%s13394_s2] ss:$16 sps:$4 sm:$0xff]  }
   0xe   : > { %7220 = vmatprep.subr.bf16.mxu0 %v9134_v0  ;;  %v9139_v3 = vld [vmem:[%s13394_s2 + $0x8] ss:$16 sps:$4 sm:$0xff]   ;;  %7444 = vmatprep.subr.bf16.mxu1 %v9136_v1  ;;  %v9140_v4 = vld [vmem:[%s13394_s2 + $0x24] ss:$16 sps:$4 sm:$0xff]   ;;  %v9142_v5 = vld [vmem:[%s13394_s2 + $0x2c] ss:$16 sps:$4 sm:$0xff]  }
   0xf   : > { %7222 = vmatpush1.bf16.msra.mxu0 %v9138_v2  ;;  %7446 = vmatpush1.bf16.msra.mxu1 %v9139_v3  ;;  %v9144_v6 = vld [vmem:[%s13394_s2 + $0x20] ss:$16 sps:$4 sm:$0xff]   ;;  %v9145_v7 = vld [vmem:[%s13394_s2 + $0x28] ss:$16 sps:$4 sm:$0xff]   ;;  %v9146_v8 = vld [vmem:[%s13394_s2 + $0x44] ss:$16 sps:$4 sm:$0xff]  }
  0x10   : > { %7224 = vmatprep.subr.bf16.mxu0 %v9140_v4  ;;  %7448 = vmatprep.subr.bf16.mxu1 %v9142_v5  ;;  %v9148_v9 = vld [vmem:[%s13394_s2 + $0x4c] ss:$16 sps:$4 sm:$0xff]   ;;  %v9150_v10 = vld [vmem:[%s13394_s2 + $0x40] ss:$16 sps:$4 sm:$0xff]   ;;  %v9151_v11 = vld [vmem:[%s13394_s2 + $0x48] ss:$16 sps:$4 sm:$0xff]  }
  0x11   : > { %v9152_v12 = vld [vmem:[%s13394_s2 + $0x64] ss:$16 sps:$4 sm:$0xff]   ;;  %v9154_v13 = vld [vmem:[%s13394_s2 + $0x6c] ss:$16 sps:$4 sm:$0xff]   ;;  %v9156_v14 = vld [vmem:[%s13394_s2 + $0x60] ss:$16 sps:$4 sm:$0xff]  }
  0x12   : > { %v9157_v15 = vld [vmem:[%s13394_s2 + $0x68] ss:$16 sps:$4 sm:$0xff]   ;;  %v9158_v16 = vld [vmem:[%s13394_s2 + $0x84] ss:$16 sps:$4 sm:$0xff]   ;;  %v9160_v17 = vld [vmem:[%s13394_s2 + $0x8c] ss:$16 sps:$4 sm:$0xff]  }
  0x13   : > { %7226 = vmatpush1.bf16.msra.mxu0 %v9144_v6  ;;  %7450 = vmatpush1.bf16.msra.mxu1 %v9145_v7  ;;  %v9162_v18 = vld [vmem:[%s13394_s2 + $0x80] ss:$16 sps:$4 sm:$0xff]   ;;  %v9163_v19 = vld [vmem:[%s13394_s2 + $0x88] ss:$16 sps:$4 sm:$0xff]   ;;  %v9164_v20 = vld [vmem:[%s13394_s2 + $0xa4] ss:$16 sps:$4 sm:$0xff]  }
  0x14   : > { %7228 = vmatprep.subr.bf16.mxu0 %v9146_v8  ;;  %7452 = vmatprep.subr.bf16.mxu1 %v9148_v9  ;;  %v9166_v21 = vld [vmem:[%s13394_s2 + $0xac] ss:$16 sps:$4 sm:$0xff]   ;;  %v9168_v22 = vld [vmem:[%s13394_s2 + $0xa0] ss:$16 sps:$4 sm:$0xff]   ;;  %v9169_v23 = vld [vmem:[%s13394_s2 + $0xa8] ss:$16 sps:$4 sm:$0xff]  }
  0x15   : > { %v9170_v24 = vld [vmem:[%s13394_s2 + $0xc4] ss:$16 sps:$4 sm:$0xff]   ;;  %v9172_v25 = vld [vmem:[%s13394_s2 + $0xcc] ss:$16 sps:$4 sm:$0xff]   ;;  %v9174_v26 = vld [vmem:[%s13394_s2 + $0xc0] ss:$16 sps:$4 sm:$0xff]  }
  0x16   : > { %v9175_v27 = vld [vmem:[%s13394_s2 + $0xc8] ss:$16 sps:$4 sm:$0xff]   ;;  %v9176_v28 = vld [vmem:[%s13394_s2 + $0xe4] ss:$16 sps:$4 sm:$0xff]   ;;  %s6585_s26 = sshll.u32 %s6580_s18, 4  ;;  %s10304_s21 = smov 64  }
  0x17   : > { %7230 = vmatpush1.bf16.msra.mxu0 %v9150_v10  ;;  %7454 = vmatpush1.bf16.msra.mxu1 %v9151_v11  ;;  %v9178_v29 = vld [vmem:[%s13394_s2 + $0xec] ss:$16 sps:$4 sm:$0xff]   ;;  %v9180_v30 = vld [vmem:[%s13394_s2 + $0xe0] ss:$16 sps:$4 sm:$0xff]   ;;  %p406_p3 = scmp.lt.s32.totalorder %s6585_s26, 31  ;;  %vm3260_vm0 = vcmask 523264  }
  0x18   : > { %7232 = vmatprep.subr.bf16.mxu0 %v9152_v12  ;;  %7456 = vmatprep.subr.bf16.mxu1 %v9154_v13  ;;  %v9181_v31 = vld [vmem:[%s13394_s2 + $0xe8] ss:$16 sps:$4 sm:$0xff]   ;;  %v9182_v32 = vld [vmem:[%s13394_s2 + $0x104] ss:$16 sps:$4 sm:$0xff]   ;;  %v9184_v33 = vld [vmem:[%s13394_s2 + $0x10c] ss:$16 sps:$4 sm:$0xff]  }
  0x19   : > { %v9186_v34 = vld [vmem:[%s13394_s2 + $0x100] ss:$16 sps:$4 sm:$0xff]   ;;  %v9187_v35 = vld [vmem:[%s13394_s2 + $0x108] ss:$16 sps:$4 sm:$0xff]   ;;  %s13482_s26 = smov (!%p406_p3, %s6585_s26), 31 }
  0x1a   : > { %v9188_v36 = vld [vmem:[%s13394_s2 + $0x124] ss:$16 sps:$4 sm:$0xff]   ;;  %v9190_v37 = vld [vmem:[%s13394_s2 + $0x12c] ss:$16 sps:$4 sm:$0xff]   ;;  %v9192_v38 = vld [vmem:[%s13394_s2 + $0x120] ss:$16 sps:$4 sm:$0xff]  }
  0x1b   : > { %7234 = vmatpush1.bf16.msra.mxu0 %v9156_v14  ;;  %7458 = vmatpush1.bf16.msra.mxu1 %v9157_v15  ;;  %s9123_s30 = smul.u32 56, %s13482_s26  ;;  %v9193_v39 = vld [vmem:[%s13394_s2 + $0x128] ss:$16 sps:$4 sm:$0xff]   ;;  %v9194_v40 = vld [vmem:[%s13394_s2 + $0x144] ss:$16 sps:$4 sm:$0xff]  }
  0x1c   : > { %7236 = vmatprep.subr.bf16.mxu0 %v9158_v16  ;;  %7460 = vmatprep.subr.bf16.mxu1 %v9160_v17  ;;  %v9196_v41 = vld [vmem:[%s13394_s2 + $0x14c] ss:$16 sps:$4 sm:$0xff]   ;;  %v9198_v42 = vld [vmem:[%s13394_s2 + $0x140] ss:$16 sps:$4 sm:$0xff]   ;;  %v9199_v43 = vld [vmem:[%s13394_s2 + $0x148] ss:$16 sps:$4 sm:$0xff]  }
  0x1d   : > { %s10515_s25 = scalar_lea.vmem %s13392_s0, %s9123_s30  ;;  %v9200_v44 = vld [vmem:[%s13394_s2 + $0x164] ss:$16 sps:$4 sm:$0xff]   ;;  %v9202_v45 = vld [vmem:[%s13394_s2 + $0x16c] ss:$16 sps:$4 sm:$0xff]   ;;  %v9204_v47 = vld [vmem:[%s13394_s2 + $0x160] ss:$16 sps:$4 sm:$0xff]   ;;  %s12941_s22 = scalar_lea.vmem %s13402_s10, %s9123_s30 }
  0x1e   : > { %v432_v46 = vld [vmem:[%s10515_s25 + $0x8] sm:$0xff]  ;;  %v9206_v49 = vld [vmem:[%s13394_s2 + $0x184] ss:$16 sps:$4 sm:$0xff]   ;;  %v9210_v51 = vld [vmem:[%s13394_s2 + $0x180] ss:$16 sps:$4 sm:$0xff]  }
  0x1f   : > { %7238 = vmatpush1.bf16.msra.mxu0 %v9162_v18  ;;  %7462 = vmatpush1.bf16.msra.mxu1 %v9163_v19  ;;  %v9205_v48 = vld [vmem:[%s13394_s2 + $0x168] ss:$16 sps:$4 sm:$0xff]   ;;  %v9208_v50 = vld [vmem:[%s13394_s2 + $0x18c] ss:$16 sps:$4 sm:$0xff]   ;;  %v9212_v53 = vld [vmem:[%s13394_s2 + $0x1a4] ss:$16 sps:$4 sm:$0xff]  }
  0x20   : > { %7240 = vmatprep.subr.bf16.mxu0 %v9164_v20  ;;  %7464 = vmatprep.subr.bf16.mxu1 %v9166_v21  ;;  %v9211_v52 = vld [vmem:[%s13394_s2 + $0x188] ss:$16 sps:$4 sm:$0xff]   ;;  %v9214_v54 = vld [vmem:[%s13394_s2 + $0x1ac] ss:$16 sps:$4 sm:$0xff]   ;;  %v9216_v55 = vld [vmem:[%s13394_s2 + $0x1a0] ss:$16 sps:$4 sm:$0xff]  }
  0x21   : > { %1301 = vmatprep.mubr.f32.mxu0 %v432_v46  ;;  %1945 = vmatprep.mubr.f32.mxu1 %v432_v46  ;;  %v9217_v56 = vld [vmem:[%s13394_s2 + $0x1a8] ss:$16 sps:$4 sm:$0xff]   ;;  %v9218_v57 = vld [vmem:[%s13394_s2 + $0x1c4] ss:$16 sps:$4 sm:$0xff]   ;;  %v9220_v58 = vld [vmem:[%s13394_s2 + $0x1cc] ss:$16 sps:$4 sm:$0xff]  }
  0x22   : > { %v9222_v59 = vld [vmem:[%s13394_s2 + $0x1c0] ss:$16 sps:$4 sm:$0xff]   ;;  %v9223_v60 = vld [vmem:[%s13394_s2 + $0x1c8] ss:$16 sps:$4 sm:$0xff]   ;;  %v9224_v61 = vld [vmem:[%s13394_s2 + $0x1e4] ss:$16 sps:$4 sm:$0xff]  }
  0x23   : > { %7242 = vmatpush1.bf16.msra.mxu0 %v9168_v22  ;;  %7466 = vmatpush1.bf16.msra.mxu1 %v9169_v23  ;;  %v9226_v62 = vld [vmem:[%s13394_s2 + $0x1ec] ss:$16 sps:$4 sm:$0xff]   ;;  %v9228_v63 = vld [vmem:[%s13394_s2 + $0x1e0] ss:$16 sps:$4 sm:$0xff]   ;;  %v9229_v0 = vld [vmem:[%s13394_s2 + $0x1e8] ss:$16 sps:$4 sm:$0xff]  }
  0x24   : > { %7244 = vmatprep.subr.bf16.mxu0 %v9170_v24  ;;  %7468 = vmatprep.subr.bf16.mxu1 %v9172_v25  ;;  %v9230_v1 = vld [vmem:[%s13394_s2 + $0x204] ss:$16 sps:$4 sm:$0xff]   ;;  %v9233_v2 = vld [vmem:[%s13394_s2 + $0x20c] ss:$16 sps:$4 sm:$0xff]   ;;  %v9232_v4 = vld [vmem:[%s13394_s2 + $0x200] ss:$16 sps:$4 sm:$0xff]  }
  0x25   : > { %v431_v3 = vld [vmem:[%s10515_s25] sm:$0xff]  ;;  %v9235_v5 = vld [vmem:[%s13394_s2 + $0x208] ss:$16 sps:$4 sm:$0xff]   ;;  %v9239_v8 = vld [vmem:[%s13394_s2 + $0x22c] ss:$16 sps:$4 sm:$0xff]  }
  0x26   : > { %v439_v6 = vld [vmem:[%s10515_s25 + $0x40] sm:$0xff]  ;;  %v438_v9 = vld [vmem:[%s10515_s25 + $0x38] sm:$0xff]  ;;  %v445_v15 = vld [vmem:[%s10515_s25 + $0x70] sm:$0xff] }
  0x27   : > { %7246 = vmatpush1.bf16.msra.mxu0 %v9174_v26  ;;  %7470 = vmatpush1.bf16.msra.mxu1 %v9175_v27  ;;  %v9236_v7 = vld [vmem:[%s13394_s2 + $0x224] ss:$16 sps:$4 sm:$0xff]   ;;  %v9238_v10 = vld [vmem:[%s13394_s2 + $0x220] ss:$16 sps:$4 sm:$0xff]   ;;  %v9241_v11 = vld [vmem:[%s13394_s2 + $0x228] ss:$16 sps:$4 sm:$0xff]  }
  0x28   : > { %7248 = vmatprep.subr.bf16.mxu0 %v9176_v28  ;;  %7472 = vmatprep.subr.bf16.mxu1 %v9178_v29  ;;  %v446_v12 = vld [vmem:[%s10515_s25 + $0x78] sm:$0xff]  ;;  %v9242_v13 = vld [vmem:[%s13394_s2 + $0x244] ss:$16 sps:$4 sm:$0xff]   ;;  %v9244_v16 = vld [vmem:[%s13394_s2 + $0x240] ss:$16 sps:$4 sm:$0xff]  }
  0x29   : > { %v9245_v14 = vld [vmem:[%s13394_s2 + $0x24c] ss:$16 sps:$4 sm:$0xff]   ;;  %v9247_v17 = vld [vmem:[%s13394_s2 + $0x248] ss:$16 sps:$4 sm:$0xff]   ;;  %v453_v18 = vld [vmem:[%s10515_s25 + $0xb0] sm:$0xff] }
  0x2a   : > { %v9248_v19 = vld [vmem:[%s13394_s2 + $0x264] ss:$16 sps:$4 sm:$0xff]   ;;  %v9251_v20 = vld [vmem:[%s13394_s2 + $0x26c] ss:$16 sps:$4 sm:$0xff]   ;;  %v9250_v22 = vld [vmem:[%s13394_s2 + $0x260] ss:$16 sps:$4 sm:$0xff]  }
  0x2b   : > { %7250 = vmatpush1.bf16.msra.mxu0 %v9180_v30  ;;  %7474 = vmatpush1.bf16.msra.mxu1 %v9181_v31  ;;  %v452_v21 = vld [vmem:[%s10515_s25 + $0xa8] sm:$0xff]  ;;  %v9254_v25 = vld [vmem:[%s13394_s2 + $0x284] ss:$16 sps:$4 sm:$0xff]   ;;  %v9256_v28 = vld [vmem:[%s13394_s2 + $0x280] ss:$16 sps:$4 sm:$0xff]  }
  0x2c   : > { %7252 = vmatprep.subr.bf16.mxu0 %v9182_v32  ;;  %7476 = vmatprep.subr.bf16.mxu1 %v9184_v33  ;;  %v9253_v23 = vld [vmem:[%s13394_s2 + $0x268] ss:$16 sps:$4 sm:$0xff]   ;;  %v9257_v26 = vld [vmem:[%s13394_s2 + $0x28c] ss:$16 sps:$4 sm:$0xff]   ;;  %v459_v27 = vld [vmem:[%s10515_s25 + $0xe0] sm:$0xff] }
  0x2d   : > { %v460_v24 = vld [vmem:[%s10515_s25 + $0xe8] sm:$0xff]  ;;  %v467_v30 = vld [vmem:[%s10515_s25 + $0x120] sm:$0xff]  ;;  %v466_v33 = vld [vmem:[%s10515_s25 + $0x118] sm:$0xff] }
  0x2e   : > { %v9259_v29 = vld [vmem:[%s13394_s2 + $0x288] ss:$16 sps:$4 sm:$0xff]   ;;  %v9260_v31 = vld [vmem:[%s13394_s2 + $0x2a4] ss:$16 sps:$4 sm:$0xff]   ;;  %v9263_v32 = vld [vmem:[%s13394_s2 + $0x2ac] ss:$16 sps:$4 sm:$0xff]  }
  0x2f   : > { %7254 = vmatpush1.bf16.msra.mxu0 %v9186_v34  ;;  %7478 = vmatpush1.bf16.msra.mxu1 %v9187_v35  ;;  %v9262_v34 = vld [vmem:[%s13394_s2 + $0x2a0] ss:$16 sps:$4 sm:$0xff]   ;;  %v9265_v35 = vld [vmem:[%s13394_s2 + $0x2a8] ss:$16 sps:$4 sm:$0xff]  }
  0x30   : > { %7256 = vmatprep.subr.bf16.mxu0 %v9188_v36  ;;  %7480 = vmatprep.subr.bf16.mxu1 %v9190_v37  ;;  %v474_v36 = vld [vmem:[%s10515_s25 + $0x158] sm:$0xff]  ;;  %v9266_v37 = vld [vmem:[%s13394_s2 + $0x2c4] ss:$16 sps:$4 sm:$0xff]   ;;  %v9274_v46 = vld [vmem:[%s13394_s2 + $0x2e0] ss:$16 sps:$4 sm:$0xff]  }
  0x33   : > { %7258 = vmatpush1.bf16.msra.mxu0 %v9192_v38  ;;  %7482 = vmatpush1.bf16.msra.mxu1 %v9193_v39  ;;  %v9269_v38 = vld [vmem:[%s13394_s2 + $0x2cc] ss:$16 sps:$4 sm:$0xff]   ;;  %v473_v39 = vld [vmem:[%s10515_s25 + $0x150] sm:$0xff] }
  0x34   : > { %7260 = vmatprep.subr.bf16.mxu0 %v9194_v40  ;;  %7484 = vmatprep.subr.bf16.mxu1 %v9196_v41  ;;  %v9268_v40 = vld [vmem:[%s13394_s2 + $0x2c0] ss:$16 sps:$4 sm:$0xff]   ;;  %v9271_v41 = vld [vmem:[%s13394_s2 + $0x2c8] ss:$16 sps:$4 sm:$0xff]  }
  0x37   : > { %7262 = vmatpush1.bf16.msra.mxu0 %v9198_v42  ;;  %7486 = vmatpush1.bf16.msra.mxu1 %v9199_v43  ;;  %v481_v42 = vld [vmem:[%s10515_s25 + $0x190] sm:$0xff] }
  0x38   : > { %7264 = vmatprep.subr.bf16.mxu0 %v9200_v44  ;;  %7488 = vmatprep.subr.bf16.mxu1 %v9202_v45  ;;  %v9272_v43 = vld [vmem:[%s13394_s2 + $0x2e4] ss:$16 sps:$4 sm:$0xff]   ;;  %v9275_v44 = vld [vmem:[%s13394_s2 + $0x2ec] ss:$16 sps:$4 sm:$0xff]  }
  0x39   : > { %v480_v45 = vld [vmem:[%s10515_s25 + $0x188] sm:$0xff] }
  0x3b   : > { %7266 = vmatpush1.bf16.msra.mxu0 %v9204_v47  ;;  %7490 = vmatpush1.bf16.msra.mxu1 %v9205_v48  ;;  %v9277_v47 = vld [vmem:[%s13394_s2 + $0x2e8] ss:$16 sps:$4 sm:$0xff]  }
  0x3c   : > { %7268 = vmatprep.subr.bf16.mxu0 %v9206_v49  ;;  %7492 = vmatprep.subr.bf16.mxu1 %v9208_v50  ;;  %v488_v48 = vld [vmem:[%s10515_s25 + $0x1c8] sm:$0xff]  ;;  %v9278_v49 = vld [vmem:[%s13394_s2 + $0x304] ss:$16 sps:$4 sm:$0xff]  }
  0x3d   : > { %v9281_v50 = vld [vmem:[%s13394_s2 + $0x30c] ss:$16 sps:$4 sm:$0xff]  }
  0x3f   : > { %7270 = vmatpush1.bf16.msra.mxu0 %v9210_v51  ;;  %7494 = vmatpush1.bf16.msra.mxu1 %v9211_v52  ;;  %v487_v51 = vld [vmem:[%s10515_s25 + $0x1c0] sm:$0xff] }
  0x40   : > { %7272 = vmatprep.subr.bf16.mxu0 %v9212_v53  ;;  %7496 = vmatprep.subr.bf16.mxu1 %v9214_v54  ;;  %v9280_v52 = vld [vmem:[%s13394_s2 + $0x300] ss:$16 sps:$4 sm:$0xff]   ;;  %v9283_v53 = vld [vmem:[%s13394_s2 + $0x308] ss:$16 sps:$4 sm:$0xff]  }
  0x41   : > { %v495_v54 = vld [vmem:[%s10515_s25 + $0x200] sm:$0xff] }
  0x43   : > { %7274 = vmatpush1.bf16.msra.mxu0 %v9216_v55  ;;  %7498 = vmatpush1.bf16.msra.mxu1 %v9217_v56  ;;  %v9284_v55 = vld [vmem:[%s13394_s2 + $0x324] ss:$16 sps:$4 sm:$0xff]   ;;  %v9287_v56 = vld [vmem:[%s13394_s2 + $0x32c] ss:$16 sps:$4 sm:$0xff]  }
  0x44   : > { %7276 = vmatprep.subr.bf16.mxu0 %v9218_v57  ;;  %7500 = vmatprep.subr.bf16.mxu1 %v9220_v58  ;;  %v494_v57 = vld [vmem:[%s10515_s25 + $0x1f8] sm:$0xff]  ;;  %v9286_v58 = vld [vmem:[%s13394_s2 + $0x320] ss:$16 sps:$4 sm:$0xff]  }
  0x47   : > { %7278 = vmatpush1.bf16.msra.mxu0 %v9222_v59  ;;  %7502 = vmatpush1.bf16.msra.mxu1 %v9223_v60  ;;  %v9289_v59 = vld [vmem:[%s13394_s2 + $0x328] ss:$16 sps:$4 sm:$0xff]  }
  0x48   : > { %7280 = vmatprep.subr.bf16.mxu0 %v9224_v61  ;;  %7504 = vmatprep.subr.bf16.mxu1 %v9226_v62  ;;  %v502_v60 = vld [vmem:[%s10515_s25 + $0x238] sm:$0xff]  ;;  %v9290_v61 = vld [vmem:[%s13394_s2 + $0x344] ss:$16 sps:$4 sm:$0xff]  }
  0x49   : > { %v9293_v62 = vld [vmem:[%s13394_s2 + $0x34c] ss:$16 sps:$4 sm:$0xff]  }
  0x4b   : > { %7282 = vmatpush1.bf16.msra.mxu0 %v9228_v63  ;;  %7506 = vmatpush1.bf16.msra.mxu1 %v9229_v0  ;;  %v501_v63 = vld [vmem:[%s10515_s25 + $0x230] sm:$0xff] }
  0x4c   : > { %7284 = vmatprep.subr.bf16.mxu0 %v9230_v1  ;;  %7508 = vmatprep.subr.bf16.mxu1 %v9233_v2  ;;  %v9292_v0 = vld [vmem:[%s13394_s2 + $0x340] ss:$16 sps:$4 sm:$0xff]   ;;  %v9295_v1 = vld [vmem:[%s13394_s2 + $0x348] ss:$16 sps:$4 sm:$0xff]  }
  0x4d   : > { %v509_v2 = vld [vmem:[%s10515_s25 + $0x270] sm:$0xff] }
  0x4e   : > { %1302 = vmatmul.mubr.f32.vlgmr.msra.gmra.mrb[0].mxu0 %v431_v3  ;;  %1946 = vmatmul.mubr.f32.vlgmr.msra.gmra.mrb[0].mxu1 %v431_v3  ;;  %v9296_v3 = vld [vmem:[%s13394_s2 + $0x364] ss:$16 sps:$4 sm:$0xff]  }
  0x4f   : > { %7286 = vmatpush1.bf16.msra.mxu0 %v9232_v4  ;;  %7510 = vmatpush1.bf16.msra.mxu1 %v9235_v5  ;;  %v9299_v4 = vld [vmem:[%s13394_s2 + $0x36c] ss:$16 sps:$4 sm:$0xff]  }
  0x50   : > { %1307 = vmatprep.mubr.f32.mxu0 %v439_v6  ;;  %1951 = vmatprep.mubr.f32.mxu1 %v439_v6  ;;  %v508_v5 = vld [vmem:[%s10515_s25 + $0x268] sm:$0xff]  ;;  %v9298_v6 = vld [vmem:[%s13394_s2 + $0x360] ss:$16 sps:$4 sm:$0xff]  }
  0x51   : > { %7288 = vmatprep.subr.bf16.mxu0 %v9236_v7  ;;  %7512 = vmatprep.subr.bf16.mxu1 %v9239_v8  ;;  %v9301_v7 = vld [vmem:[%s13394_s2 + $0x368] ss:$16 sps:$4 sm:$0xff]  }
  0x52   : > { %1308 = vmatmul.mubr.f32.gmra.mrb[2].mxu0 %v438_v9  ;;  %1952 = vmatmul.mubr.f32.gmra.mrb[2].mxu1 %v438_v9  ;;  %v516_v8 = vld [vmem:[%s10515_s25 + $0x2a8] sm:$0xff]  ;;  %v9302_v9 = vld [vmem:[%s13394_s2 + $0x384] ss:$16 sps:$4 sm:$0xff]  }
  0x53   : > { %7290 = vmatpush1.bf16.msra.mxu0 %v9238_v10  ;;  %7514 = vmatpush1.bf16.msra.mxu1 %v9241_v11  ;;  %v9305_v10 = vld [vmem:[%s13394_s2 + $0x38c] ss:$16 sps:$4 sm:$0xff]   ;;  %v515_v11 = vld [vmem:[%s10515_s25 + $0x2a0] sm:$0xff] }
  0x54   : > { %1313 = vmatprep.mubr.f32.mxu0 %v446_v12  ;;  %1957 = vmatprep.mubr.f32.mxu1 %v446_v12  ;;  %v9304_v12 = vld [vmem:[%s13394_s2 + $0x380] ss:$16 sps:$4 sm:$0xff]  }
  0x55   : > { %7292 = vmatprep.subr.bf16.mxu0 %v9242_v13  ;;  %7516 = vmatprep.subr.bf16.mxu1 %v9245_v14  ;;  %v9307_v13 = vld [vmem:[%s13394_s2 + $0x388] ss:$16 sps:$4 sm:$0xff]   ;;  %v523_v14 = vld [vmem:[%s10515_s25 + $0x2e0] sm:$0xff] }
  0x56   : > { %1314 = vmatmul.mubr.f32.gmra.mrb[4].mxu0 %v445_v15  ;;  %1958 = vmatmul.mubr.f32.gmra.mrb[4].mxu1 %v445_v15  ;;  %v9308_v15 = vld [vmem:[%s13394_s2 + $0x3a4] ss:$16 sps:$4 sm:$0xff]  }
  0x57   : > { %7294 = vmatpush1.bf16.msra.mxu0 %v9244_v16  ;;  %7518 = vmatpush1.bf16.msra.mxu1 %v9247_v17  ;;  %v9311_v16 = vld [vmem:[%s13394_s2 + $0x3ac] ss:$16 sps:$4 sm:$0xff]  }
  0x58   : > { %1319 = vmatprep.mubr.f32.mxu0 %v453_v18  ;;  %1963 = vmatprep.mubr.f32.mxu1 %v453_v18  ;;  %v522_v17 = vld [vmem:[%s10515_s25 + $0x2d8] sm:$0xff]  ;;  %v9310_v18 = vld [vmem:[%s13394_s2 + $0x3a0] ss:$16 sps:$4 sm:$0xff]  }
  0x59   : > { %7296 = vmatprep.subr.bf16.mxu0 %v9248_v19  ;;  %7520 = vmatprep.subr.bf16.mxu1 %v9251_v20  ;;  %v9313_v19 = vld [vmem:[%s13394_s2 + $0x3a8] ss:$16 sps:$4 sm:$0xff]  }
  0x5a   : > { %1320 = vmatmul.mubr.f32.gmra.mrb[6].mxu0 %v452_v21  ;;  %1964 = vmatmul.mubr.f32.gmra.mrb[6].mxu1 %v452_v21  ;;  %v530_v20 = vld [vmem:[%s10515_s25 + $0x318] sm:$0xff]  ;;  %v9314_v21 = vld [vmem:[%s13394_s2 + $0x3c4] ss:$16 sps:$4 sm:$0xff]  }
  0x5b   : > { %7298 = vmatpush1.bf16.msra.mxu0 %v9250_v22  ;;  %7522 = vmatpush1.bf16.msra.mxu1 %v9253_v23  ;;  %v9317_v22 = vld [vmem:[%s13394_s2 + $0x3cc] ss:$16 sps:$4 sm:$0xff]   ;;  %v529_v23 = vld [vmem:[%s10515_s25 + $0x310] sm:$0xff] }
  0x5c   : > { %1325 = vmatprep.mubr.f32.mxu0 %v460_v24  ;;  %1969 = vmatprep.mubr.f32.mxu1 %v460_v24  ;;  %v9316_v24 = vld [vmem:[%s13394_s2 + $0x3c0] ss:$16 sps:$4 sm:$0xff]  }
  0x5d   : > { %7300 = vmatprep.subr.bf16.mxu0 %v9254_v25  ;;  %7524 = vmatprep.subr.bf16.mxu1 %v9257_v26  ;;  %v9319_v25 = vld [vmem:[%s13394_s2 + $0x3c8] ss:$16 sps:$4 sm:$0xff]   ;;  %v537_v26 = vld [vmem:[%s10515_s25 + $0x350] sm:$0xff] }
  0x5e   : > { %1326 = vmatmul.mubr.f32.gmra.mrb[8].mxu0 %v459_v27  ;;  %1970 = vmatmul.mubr.f32.gmra.mrb[8].mxu1 %v459_v27  ;;  %v9320_v27 = vld [vmem:[%s13394_s2 + $0x3e4] ss:$16 sps:$4 sm:$0xff]  }
  0x5f   : > { %7302 = vmatpush1.bf16.msra.mxu0 %v9256_v28  ;;  %7526 = vmatpush1.bf16.msra.mxu1 %v9259_v29  ;;  %v9323_v28 = vld [vmem:[%s13394_s2 + $0x3ec] ss:$16 sps:$4 sm:$0xff]  }
  0x60   : > { %1331 = vmatprep.mubr.f32.mxu0 %v467_v30  ;;  %1975 = vmatprep.mubr.f32.mxu1 %v467_v30  ;;  %v536_v29 = vld [vmem:[%s10515_s25 + $0x348] sm:$0xff]  ;;  %v9322_v30 = vld [vmem:[%s13394_s2 + $0x3e0] ss:$16 sps:$4 sm:$0xff]  }
  0x61   : > { %7304 = vmatprep.subr.bf16.mxu0 %v9260_v31  ;;  %7528 = vmatprep.subr.bf16.mxu1 %v9263_v32  ;;  %v9325_v31 = vld [vmem:[%s13394_s2 + $0x3e8] ss:$16 sps:$4 sm:$0xff]  }
  0x62   : > { %1332 = vmatmul.mubr.f32.gmra.mrb[10].mxu0 %v466_v33  ;;  %1976 = vmatmul.mubr.f32.gmra.mrb[10].mxu1 %v466_v33  ;;  %v434_v32 = vld [vmem:[%s10515_s25 + $0x18] sm:$0xff]  ;;  %v9326_v33 = vld [vmem:[%s13394_s2 + $0x404] ss:$16 sps:$4 sm:$0xff]  }
  0x63   : > { %7306 = vmatpush1.bf16.msra.mxu0 %v9262_v34  ;;  %7530 = vmatpush1.bf16.msra.mxu1 %v9265_v35  ;;  %v9329_v34 = vld [vmem:[%s13394_s2 + $0x40c] ss:$16 sps:$4 sm:$0xff]   ;;  %v433_v35 = vld [vmem:[%s10515_s25 + $0x10] sm:$0xff] }
  0x64   : > { %1337 = vmatprep.mubr.f32.mxu0 %v474_v36  ;;  %1981 = vmatprep.mubr.f32.mxu1 %v474_v36  ;;  %v9328_v36 = vld [vmem:[%s13394_s2 + $0x400] ss:$16 sps:$4 sm:$0xff]  }
  0x65   : > { %7308 = vmatprep.subr.bf16.mxu0 %v9266_v37  ;;  %7532 = vmatprep.subr.bf16.mxu1 %v9269_v38  ;;  %v9331_v37 = vld [vmem:[%s13394_s2 + $0x408] ss:$16 sps:$4 sm:$0xff]   ;;  %v441_v38 = vld [vmem:[%s10515_s25 + $0x50] sm:$0xff] }
  0x66   : > { %1338 = vmatmul.mubr.f32.gmra.mrb[12].mxu0 %v473_v39  ;;  %1982 = vmatmul.mubr.f32.gmra.mrb[12].mxu1 %v473_v39  ;;  %v9332_v39 = vld [vmem:[%s13394_s2 + $0x424] ss:$16 sps:$4 sm:$0xff]  }
  0x67   : > { %7310 = vmatpush1.bf16.msra.mxu0 %v9268_v40  ;;  %7534 = vmatpush1.bf16.msra.mxu1 %v9271_v41  ;;  %v9335_v40 = vld [vmem:[%s13394_s2 + $0x42c] ss:$16 sps:$4 sm:$0xff]  }
  0x68   : > { %1343 = vmatprep.mubr.f32.mxu0 %v481_v42  ;;  %1987 = vmatprep.mubr.f32.mxu1 %v481_v42  ;;  %v440_v41 = vld [vmem:[%s10515_s25 + $0x48] sm:$0xff]  ;;  %v9334_v42 = vld [vmem:[%s13394_s2 + $0x420] ss:$16 sps:$4 sm:$0xff]  }
  0x69   : > { %7312 = vmatprep.subr.bf16.mxu0 %v9272_v43  ;;  %7536 = vmatprep.subr.bf16.mxu1 %v9275_v44  ;;  %v9337_v43 = vld [vmem:[%s13394_s2 + $0x428] ss:$16 sps:$4 sm:$0xff]  }
  0x6a   : > { %1344 = vmatmul.mubr.f32.gmra.mrb[14].mxu0 %v480_v45  ;;  %1988 = vmatmul.mubr.f32.gmra.mrb[14].mxu1 %v480_v45  ;;  %v448_v44 = vld [vmem:[%s10515_s25 + $0x88] sm:$0xff]  ;;  %v9338_v45 = vld [vmem:[%s13394_s2 + $0x444] ss:$16 sps:$4 sm:$0xff]  }
  0x6b   : > { %7314 = vmatpush1.bf16.msra.mxu0 %v9274_v46  ;;  %7538 = vmatpush1.bf16.msra.mxu1 %v9277_v47  ;;  %v9341_v46 = vld [vmem:[%s13394_s2 + $0x44c] ss:$16 sps:$4 sm:$0xff]   ;;  %v447_v47 = vld [vmem:[%s10515_s25 + $0x80] sm:$0xff] }
  0x6c   : > { %1349 = vmatprep.mubr.f32.mxu0 %v488_v48  ;;  %1993 = vmatprep.mubr.f32.mxu1 %v488_v48  ;;  %v9340_v48 = vld [vmem:[%s13394_s2 + $0x440] ss:$16 sps:$4 sm:$0xff]  }
  0x6d   : > { %7316 = vmatprep.subr.bf16.mxu0 %v9278_v49  ;;  %7540 = vmatprep.subr.bf16.mxu1 %v9281_v50  ;;  %v9343_v49 = vld [vmem:[%s13394_s2 + $0x448] ss:$16 sps:$4 sm:$0xff]   ;;  %v455_v50 = vld [vmem:[%s10515_s25 + $0xc0] sm:$0xff] }
  0x6e   : > { %1350 = vmatmul.mubr.f32.gmra.mrb[16].mxu0 %v487_v51  ;;  %1994 = vmatmul.mubr.f32.gmra.mrb[16].mxu1 %v487_v51  ;;  %v9344_v51 = vld [vmem:[%s13394_s2 + $0x464] ss:$16 sps:$4 sm:$0xff]  }
  0x6f   : > { %7318 = vmatpush1.bf16.msra.mxu0 %v9280_v52  ;;  %7542 = vmatpush1.bf16.msra.mxu1 %v9283_v53  ;;  %v9347_v52 = vld [vmem:[%s13394_s2 + $0x46c] ss:$16 sps:$4 sm:$0xff]  }
  0x70   : > { %1355 = vmatprep.mubr.f32.mxu0 %v495_v54  ;;  %1999 = vmatprep.mubr.f32.mxu1 %v495_v54  ;;  %v454_v53 = vld [vmem:[%s10515_s25 + $0xb8] sm:$0xff]  ;;  %v9346_v54 = vld [vmem:[%s13394_s2 + $0x460] ss:$16 sps:$4 sm:$0xff]  }
  0x71   : > { %7320 = vmatprep.subr.bf16.mxu0 %v9284_v55  ;;  %7544 = vmatprep.subr.bf16.mxu1 %v9287_v56  ;;  %v9349_v55 = vld [vmem:[%s13394_s2 + $0x468] ss:$16 sps:$4 sm:$0xff]  }
  0x72   : > { %1356 = vmatmul.mubr.f32.gmra.mrb[18].mxu0 %v494_v57  ;;  %2000 = vmatmul.mubr.f32.gmra.mrb[18].mxu1 %v494_v57  ;;  %v462_v56 = vld [vmem:[%s10515_s25 + $0xf8] sm:$0xff]  ;;  %v9350_v57 = vld [vmem:[%s13394_s2 + $0x484] ss:$16 sps:$4 sm:$0xff]  }
  0x73   : > { %7322 = vmatpush1.bf16.msra.mxu0 %v9286_v58  ;;  %7546 = vmatpush1.bf16.msra.mxu1 %v9289_v59  ;;  %v9353_v58 = vld [vmem:[%s13394_s2 + $0x48c] ss:$16 sps:$4 sm:$0xff]   ;;  %v461_v59 = vld [vmem:[%s10515_s25 + $0xf0] sm:$0xff] }
  0x74   : > { %1361 = vmatprep.mubr.f32.mxu0 %v502_v60  ;;  %2005 = vmatprep.mubr.f32.mxu1 %v502_v60  ;;  %v9352_v60 = vld [vmem:[%s13394_s2 + $0x480] ss:$16 sps:$4 sm:$0xff]  }
  0x75   : > { %7324 = vmatprep.subr.bf16.mxu0 %v9290_v61  ;;  %7548 = vmatprep.subr.bf16.mxu1 %v9293_v62  ;;  %v9355_v61 = vld [vmem:[%s13394_s2 + $0x488] ss:$16 sps:$4 sm:$0xff]   ;;  %v469_v62 = vld [vmem:[%s10515_s25 + $0x130] sm:$0xff] }
  0x76   : > { %1362 = vmatmul.mubr.f32.gmra.mrb[20].mxu0 %v501_v63  ;;  %2006 = vmatmul.mubr.f32.gmra.mrb[20].mxu1 %v501_v63  ;;  %v9356_v63 = vld [vmem:[%s13394_s2 + $0x4a4] ss:$16 sps:$4 sm:$0xff]  }
  0x77   : > { %7326 = vmatpush1.bf16.msra.mxu0 %v9292_v0  ;;  %7550 = vmatpush1.bf16.msra.mxu1 %v9295_v1  ;;  %v9359_v0 = vld [vmem:[%s13394_s2 + $0x4ac] ss:$16 sps:$4 sm:$0xff]  }
  0x78   : > { %1367 = vmatprep.mubr.f32.mxu0 %v509_v2  ;;  %2011 = vmatprep.mubr.f32.mxu1 %v509_v2  ;;  %v468_v1 = vld [vmem:[%s10515_s25 + $0x128] sm:$0xff]  ;;  %v9358_v2 = vld [vmem:[%s13394_s2 + $0x4a0] ss:$16 sps:$4 sm:$0xff]  }
  0x79   : > { %7328 = vmatprep.subr.bf16.mxu0 %v9296_v3  ;;  %7552 = vmatprep.subr.bf16.mxu1 %v9299_v4  ;;  %v9361_v3 = vld [vmem:[%s13394_s2 + $0x4a8] ss:$16 sps:$4 sm:$0xff]  }
  0x7a   : > { %1368 = vmatmul.mubr.f32.gmra.mrb[22].mxu0 %v508_v5  ;;  %2012 = vmatmul.mubr.f32.gmra.mrb[22].mxu1 %v508_v5  ;;  %v476_v4 = vld [vmem:[%s10515_s25 + $0x168] sm:$0xff]  ;;  %v9362_v5 = vld [vmem:[%s13394_s2 + $0x4c4] ss:$16 sps:$4 sm:$0xff]  }
  0x7b   : > { %7330 = vmatpush1.bf16.msra.mxu0 %v9298_v6  ;;  %7554 = vmatpush1.bf16.msra.mxu1 %v9301_v7  ;;  %v9365_v6 = vld [vmem:[%s13394_s2 + $0x4cc] ss:$16 sps:$4 sm:$0xff]   ;;  %v475_v7 = vld [vmem:[%s10515_s25 + $0x160] sm:$0xff] }
  0x7c   : > { %1373 = vmatprep.mubr.f32.mxu0 %v516_v8  ;;  %2017 = vmatprep.mubr.f32.mxu1 %v516_v8  ;;  %v9364_v8 = vld [vmem:[%s13394_s2 + $0x4c0] ss:$16 sps:$4 sm:$0xff]  }
  0x7d   : > { %7332 = vmatprep.subr.bf16.mxu0 %v9302_v9  ;;  %7556 = vmatprep.subr.bf16.mxu1 %v9305_v10  ;;  %v9367_v9 = vld [vmem:[%s13394_s2 + $0x4c8] ss:$16 sps:$4 sm:$0xff]   ;;  %v483_v10 = vld [vmem:[%s10515_s25 + $0x1a0] sm:$0xff] }
  0x7e   : > { %1374 = vmatmul.mubr.f32.gmra.mrb[24].mxu0 %v515_v11  ;;  %2018 = vmatmul.mubr.f32.gmra.mrb[24].mxu1 %v515_v11  ;;  %v9368_v11 = vld [vmem:[%s13394_s2 + $0x4e4] ss:$16 sps:$4 sm:$0xff]  }
  0x7f   : > { %7334 = vmatpush1.bf16.msra.mxu0 %v9304_v12  ;;  %7558 = vmatpush1.bf16.msra.mxu1 %v9307_v13  ;;  %v9371_v12 = vld [vmem:[%s13394_s2 + $0x4ec] ss:$16 sps:$4 sm:$0xff]  }
  0x80   : > { %1379 = vmatprep.mubr.f32.mxu0 %v523_v14  ;;  %2023 = vmatprep.mubr.f32.mxu1 %v523_v14  ;;  %v482_v13 = vld [vmem:[%s10515_s25 + $0x198] sm:$0xff]  ;;  %v9370_v14 = vld [vmem:[%s13394_s2 + $0x4e0] ss:$16 sps:$4 sm:$0xff]  }
  0x81   : > { %7336 = vmatprep.subr.bf16.mxu0 %v9308_v15  ;;  %7560 = vmatprep.subr.bf16.mxu1 %v9311_v16  ;;  %v9373_v15 = vld [vmem:[%s13394_s2 + $0x4e8] ss:$16 sps:$4 sm:$0xff]  }
  0x82   : > { %1380 = vmatmul.mubr.f32.gmra.mrb[26].mxu0 %v522_v17  ;;  %2024 = vmatmul.mubr.f32.gmra.mrb[26].mxu1 %v522_v17  ;;  %v490_v16 = vld [vmem:[%s10515_s25 + $0x1d8] sm:$0xff]  ;;  %v9374_v17 = vld [vmem:[%s13394_s2 + $0x504] ss:$16 sps:$4 sm:$0xff]  }
  0x83   : > { %7338 = vmatpush1.bf16.msra.mxu0 %v9310_v18  ;;  %7562 = vmatpush1.bf16.msra.mxu1 %v9313_v19  ;;  %v9377_v18 = vld [vmem:[%s13394_s2 + $0x50c] ss:$16 sps:$4 sm:$0xff]   ;;  %v489_v19 = vld [vmem:[%s10515_s25 + $0x1d0] sm:$0xff] }
  0x84   : > { %1385 = vmatprep.mubr.f32.mxu0 %v530_v20  ;;  %2029 = vmatprep.mubr.f32.mxu1 %v530_v20  ;;  %v9376_v20 = vld [vmem:[%s13394_s2 + $0x500] ss:$16 sps:$4 sm:$0xff]  }
  0x85   : > { %7340 = vmatprep.subr.bf16.mxu0 %v9314_v21  ;;  %7564 = vmatprep.subr.bf16.mxu1 %v9317_v22  ;;  %v9379_v21 = vld [vmem:[%s13394_s2 + $0x508] ss:$16 sps:$4 sm:$0xff]   ;;  %v497_v22 = vld [vmem:[%s10515_s25 + $0x210] sm:$0xff] }
  0x86   : > { %1386 = vmatmul.mubr.f32.gmra.mrb[28].mxu0 %v529_v23  ;;  %2030 = vmatmul.mubr.f32.gmra.mrb[28].mxu1 %v529_v23  ;;  %v9380_v23 = vld [vmem:[%s13394_s2 + $0x524] ss:$16 sps:$4 sm:$0xff]  }
  0x87   : > { %7342 = vmatpush1.bf16.msra.mxu0 %v9316_v24  ;;  %7566 = vmatpush1.bf16.msra.mxu1 %v9319_v25  ;;  %v9383_v24 = vld [vmem:[%s13394_s2 + $0x52c] ss:$16 sps:$4 sm:$0xff]  }
  0x88   : > { %1391 = vmatprep.mubr.f32.mxu0 %v537_v26  ;;  %2035 = vmatprep.mubr.f32.mxu1 %v537_v26  ;;  %v496_v25 = vld [vmem:[%s10515_s25 + $0x208] sm:$0xff]  ;;  %v9382_v26 = vld [vmem:[%s13394_s2 + $0x520] ss:$16 sps:$4 sm:$0xff]  }
  0x89   : > { %7344 = vmatprep.subr.bf16.mxu0 %v9320_v27  ;;  %7568 = vmatprep.subr.bf16.mxu1 %v9323_v28  ;;  %v9385_v27 = vld [vmem:[%s13394_s2 + $0x528] ss:$16 sps:$4 sm:$0xff]  }
  0x8a   : > { %1392 = vmatmul.mubr.f32.gmra.mrb[30].mxu0 %v536_v29  ;;  %2036 = vmatmul.mubr.f32.gmra.mrb[30].mxu1 %v536_v29  ;;  %v504_v28 = vld [vmem:[%s10515_s25 + $0x248] sm:$0xff]  ;;  %v9386_v29 = vld [vmem:[%s13394_s2 + $0x544] ss:$16 sps:$4 sm:$0xff]  }
  0x8b   : > { %7346 = vmatpush1.bf16.msra.mxu0 %v9322_v30  ;;  %7570 = vmatpush1.bf16.msra.mxu1 %v9325_v31  ;;  %v9389_v30 = vld [vmem:[%s13394_s2 + $0x54c] ss:$16 sps:$4 sm:$0xff]   ;;  %v503_v31 = vld [vmem:[%s10515_s25 + $0x240] sm:$0xff] }
  0x8c   : > { %1462 = vmatprep.mubr.f32.mxu0 %v434_v32  ;;  %2106 = vmatprep.mubr.f32.mxu1 %v434_v32  ;;  %v9388_v32 = vld [vmem:[%s13394_s2 + $0x540] ss:$16 sps:$4 sm:$0xff]  }
  0x8d   : > { %7348 = vmatprep.subr.bf16.mxu0 %v9326_v33  ;;  %7572 = vmatprep.subr.bf16.mxu1 %v9329_v34  ;;  %v9391_v33 = vld [vmem:[%s13394_s2 + $0x548] ss:$16 sps:$4 sm:$0xff]   ;;  %v511_v34 = vld [vmem:[%s10515_s25 + $0x280] sm:$0xff] }
  0x8e   : > { %1463 = vmatmul.mubr.f32.vlgmr.msra.gmra.mrb[0].mxu0 %v433_v35  ;;  %2107 = vmatmul.mubr.f32.vlgmr.msra.gmra.mrb[0].mxu1 %v433_v35  ;;  %v9392_v35 = vld [vmem:[%s13394_s2 + $0x564] ss:$16 sps:$4 sm:$0xff]  }
  0x8f   : > { %7350 = vmatpush1.bf16.msra.mxu0 %v9328_v36  ;;  %7574 = vmatpush1.bf16.msra.mxu1 %v9331_v37  ;;  %v9395_v36 = vld [vmem:[%s13394_s2 + $0x56c] ss:$16 sps:$4 sm:$0xff]  }
  0x90   : > { %1468 = vmatprep.mubr.f32.mxu0 %v441_v38  ;;  %2112 = vmatprep.mubr.f32.mxu1 %v441_v38  ;;  %v510_v37 = vld [vmem:[%s10515_s25 + $0x278] sm:$0xff]  ;;  %v9394_v38 = vld [vmem:[%s13394_s2 + $0x560] ss:$16 sps:$4 sm:$0xff]  }
  0x91   : > { %7352 = vmatprep.subr.bf16.mxu0 %v9332_v39  ;;  %7576 = vmatprep.subr.bf16.mxu1 %v9335_v40  ;;  %v9397_v39 = vld [vmem:[%s13394_s2 + $0x568] ss:$16 sps:$4 sm:$0xff]  }
  0x92   : > { %1469 = vmatmul.mubr.f32.gmra.mrb[2].mxu0 %v440_v41  ;;  %2113 = vmatmul.mubr.f32.gmra.mrb[2].mxu1 %v440_v41  ;;  %v518_v40 = vld [vmem:[%s10515_s25 + $0x2b8] sm:$0xff]  ;;  %v9398_v41 = vld [vmem:[%s13394_s2 + $0x584] ss:$16 sps:$4 sm:$0xff]  }
  0x93   : > { %7354 = vmatpush1.bf16.msra.mxu0 %v9334_v42  ;;  %7578 = vmatpush1.bf16.msra.mxu1 %v9337_v43  ;;  %v9401_v42 = vld [vmem:[%s13394_s2 + $0x58c] ss:$16 sps:$4 sm:$0xff]   ;;  %v517_v43 = vld [vmem:[%s10515_s25 + $0x2b0] sm:$0xff] }
  0x94   : > { %1474 = vmatprep.mubr.f32.mxu0 %v448_v44  ;;  %2118 = vmatprep.mubr.f32.mxu1 %v448_v44  ;;  %v9400_v44 = vld [vmem:[%s13394_s2 + $0x580] ss:$16 sps:$4 sm:$0xff]  }
  0x95   : > { %7356 = vmatprep.subr.bf16.mxu0 %v9338_v45  ;;  %7580 = vmatprep.subr.bf16.mxu1 %v9341_v46  ;;  %v9403_v45 = vld [vmem:[%s13394_s2 + $0x588] ss:$16 sps:$4 sm:$0xff]   ;;  %v525_v46 = vld [vmem:[%s10515_s25 + $0x2f0] sm:$0xff] }
  0x96   : > { %1475 = vmatmul.mubr.f32.gmra.mrb[4].mxu0 %v447_v47  ;;  %2119 = vmatmul.mubr.f32.gmra.mrb[4].mxu1 %v447_v47  ;;  %v9404_v47 = vld [vmem:[%s13394_s2 + $0x5a4] ss:$16 sps:$4 sm:$0xff]  }
  0x97   : > { %7358 = vmatpush1.bf16.msra.mxu0 %v9340_v48  ;;  %7582 = vmatpush1.bf16.msra.mxu1 %v9343_v49  ;;  %v9407_v48 = vld [vmem:[%s13394_s2 + $0x5ac] ss:$16 sps:$4 sm:$0xff]  }
  0x98   : > { %1480 = vmatprep.mubr.f32.mxu0 %v455_v50  ;;  %2124 = vmatprep.mubr.f32.mxu1 %v455_v50  ;;  %v524_v49 = vld [vmem:[%s10515_s25 + $0x2e8] sm:$0xff]  ;;  %v9406_v50 = vld [vmem:[%s13394_s2 + $0x5a0] ss:$16 sps:$4 sm:$0xff]  }
  0x99   : > { %7360 = vmatprep.subr.bf16.mxu0 %v9344_v51  ;;  %7584 = vmatprep.subr.bf16.mxu1 %v9347_v52  ;;  %v9409_v51 = vld [vmem:[%s13394_s2 + $0x5a8] ss:$16 sps:$4 sm:$0xff]  }
  0x9a   : > { %1481 = vmatmul.mubr.f32.gmra.mrb[6].mxu0 %v454_v53  ;;  %2125 = vmatmul.mubr.f32.gmra.mrb[6].mxu1 %v454_v53  ;;  %v532_v52 = vld [vmem:[%s10515_s25 + $0x328] sm:$0xff]  ;;  %v9410_v53 = vld [vmem:[%s13394_s2 + $0x5c4] ss:$16 sps:$4 sm:$0xff]  }
  0x9b   : > { %7362 = vmatpush1.bf16.msra.mxu0 %v9346_v54  ;;  %7586 = vmatpush1.bf16.msra.mxu1 %v9349_v55  ;;  %v9413_v54 = vld [vmem:[%s13394_s2 + $0x5cc] ss:$16 sps:$4 sm:$0xff]   ;;  %v531_v55 = vld [vmem:[%s10515_s25 + $0x320] sm:$0xff] }
  0x9c   : > { %1486 = vmatprep.mubr.f32.mxu0 %v462_v56  ;;  %2130 = vmatprep.mubr.f32.mxu1 %v462_v56  ;;  %v9412_v56 = vld [vmem:[%s13394_s2 + $0x5c0] ss:$16 sps:$4 sm:$0xff]  }
  0x9d   : > { %7364 = vmatprep.subr.bf16.mxu0 %v9350_v57  ;;  %7588 = vmatprep.subr.bf16.mxu1 %v9353_v58  ;;  %v9415_v57 = vld [vmem:[%s13394_s2 + $0x5c8] ss:$16 sps:$4 sm:$0xff]   ;;  %v539_v58 = vld [vmem:[%s10515_s25 + $0x360] sm:$0xff] }
  0x9e   : > { %1487 = vmatmul.mubr.f32.gmra.mrb[8].mxu0 %v461_v59  ;;  %2131 = vmatmul.mubr.f32.gmra.mrb[8].mxu1 %v461_v59  ;;  %v9416_v59 = vld [vmem:[%s13394_s2 + $0x5e4] ss:$16 sps:$4 sm:$0xff]  }
  0x9f   : > { %7366 = vmatpush1.bf16.msra.mxu0 %v9352_v60  ;;  %7590 = vmatpush1.bf16.msra.mxu1 %v9355_v61  ;;  %v9419_v60 = vld [vmem:[%s13394_s2 + $0x5ec] ss:$16 sps:$4 sm:$0xff]  }
  0xa0   : > { %1492 = vmatprep.mubr.f32.mxu0 %v469_v62  ;;  %2136 = vmatprep.mubr.f32.mxu1 %v469_v62  ;;  %v538_v61 = vld [vmem:[%s10515_s25 + $0x358] sm:$0xff]  ;;  %v9418_v62 = vld [vmem:[%s13394_s2 + $0x5e0] ss:$16 sps:$4 sm:$0xff]  }
  0xa1   : > { %7368 = vmatprep.subr.bf16.mxu0 %v9356_v63  ;;  %7592 = vmatprep.subr.bf16.mxu1 %v9359_v0  ;;  %v9421_v63 = vld [vmem:[%s13394_s2 + $0x5e8] ss:$16 sps:$4 sm:$0xff]  }
  0xa2   : > { %1493 = vmatmul.mubr.f32.gmra.mrb[10].mxu0 %v468_v1  ;;  %2137 = vmatmul.mubr.f32.gmra.mrb[10].mxu1 %v468_v1  ;;  %v436_v0 = vld [vmem:[%s10515_s25 + $0x28] sm:$0xff]  ;;  %v9422_v1 = vld [vmem:[%s13394_s2 + $0x604] ss:$16 sps:$4 sm:$0xff]  }
  0xa3   : > { %7370 = vmatpush1.bf16.msra.mxu0 %v9358_v2  ;;  %7594 = vmatpush1.bf16.msra.mxu1 %v9361_v3  ;;  %v9425_v2 = vld [vmem:[%s13394_s2 + $0x60c] ss:$16 sps:$4 sm:$0xff]   ;;  %v435_v3 = vld [vmem:[%s10515_s25 + $0x20] sm:$0xff] }
  0xa4   : > { %1498 = vmatprep.mubr.f32.mxu0 %v476_v4  ;;  %2142 = vmatprep.mubr.f32.mxu1 %v476_v4  ;;  %v9424_v4 = vld [vmem:[%s13394_s2 + $0x600] ss:$16 sps:$4 sm:$0xff]  }
  0xa5   : > { %7372 = vmatprep.subr.bf16.mxu0 %v9362_v5  ;;  %7596 = vmatprep.subr.bf16.mxu1 %v9365_v6  ;;  %v9427_v5 = vld [vmem:[%s13394_s2 + $0x608] ss:$16 sps:$4 sm:$0xff]   ;;  %v443_v6 = vld [vmem:[%s10515_s25 + $0x60] sm:$0xff] }
  0xa6   : > { %1499 = vmatmul.mubr.f32.gmra.mrb[12].mxu0 %v475_v7  ;;  %2143 = vmatmul.mubr.f32.gmra.mrb[12].mxu1 %v475_v7  ;;  %v9428_v7 = vld [vmem:[%s13394_s2 + $0x624] ss:$16 sps:$4 sm:$0xff]  }
  0xa7   : > { %7374 = vmatpush1.bf16.msra.mxu0 %v9364_v8  ;;  %7598 = vmatpush1.bf16.msra.mxu1 %v9367_v9  ;;  %v9431_v8 = vld [vmem:[%s13394_s2 + $0x62c] ss:$16 sps:$4 sm:$0xff]  }
  0xa8   : > { %1504 = vmatprep.mubr.f32.mxu0 %v483_v10  ;;  %2148 = vmatprep.mubr.f32.mxu1 %v483_v10  ;;  %v442_v9 = vld [vmem:[%s10515_s25 + $0x58] sm:$0xff] }
  0xa9   : > { %7376 = vmatprep.subr.bf16.mxu0 %v9368_v11  ;;  %7600 = vmatprep.subr.bf16.mxu1 %v9371_v12  ;;  %v450_v10 = vld [vmem:[%s10515_s25 + $0x98] sm:$0xff]  ;;  %v9430_v11 = vld [vmem:[%s13394_s2 + $0x620] ss:$16 sps:$4 sm:$0xff]  }
  0xaa   : > { %1505 = vmatmul.mubr.f32.gmra.mrb[14].mxu0 %v482_v13  ;;  %2149 = vmatmul.mubr.f32.gmra.mrb[14].mxu1 %v482_v13  ;;  %v9433_v12 = vld [vmem:[%s13394_s2 + $0x628] ss:$16 sps:$4 sm:$0xff]   ;;  %v9434_v13 = vld [vmem:[%s13394_s2 + $0x644] ss:$16 sps:$4 sm:$0xff]  }
  0xab   : > { %7378 = vmatpush1.bf16.msra.mxu0 %v9370_v14  ;;  %7602 = vmatpush1.bf16.msra.mxu1 %v9373_v15  ;;  %v9437_v14 = vld [vmem:[%s13394_s2 + $0x64c] ss:$16 sps:$4 sm:$0xff]   ;;  %v449_v15 = vld [vmem:[%s10515_s25 + $0x90] sm:$0xff] }
  0xac   : > { %1510 = vmatprep.mubr.f32.mxu0 %v490_v16  ;;  %2154 = vmatprep.mubr.f32.mxu1 %v490_v16  ;;  %v457_v16 = vld [vmem:[%s10515_s25 + $0xd0] sm:$0xff] }
  0xad   : > { %7380 = vmatprep.subr.bf16.mxu0 %v9374_v17  ;;  %7604 = vmatprep.subr.bf16.mxu1 %v9377_v18  ;;  %v9436_v17 = vld [vmem:[%s13394_s2 + $0x640] ss:$16 sps:$4 sm:$0xff]   ;;  %v9439_v18 = vld [vmem:[%s13394_s2 + $0x648] ss:$16 sps:$4 sm:$0xff]  }
  0xae   : > { %1511 = vmatmul.mubr.f32.gmra.mrb[16].mxu0 %v489_v19  ;;  %2155 = vmatmul.mubr.f32.gmra.mrb[16].mxu1 %v489_v19  ;;  %v9440_v19 = vld [vmem:[%s13394_s2 + $0x664] ss:$16 sps:$4 sm:$0xff]  }
  0xaf   : > { %7382 = vmatpush1.bf16.msra.mxu0 %v9376_v20  ;;  %7606 = vmatpush1.bf16.msra.mxu1 %v9379_v21  ;;  %v9443_v20 = vld [vmem:[%s13394_s2 + $0x66c] ss:$16 sps:$4 sm:$0xff]  }
  0xb0   : > { %1516 = vmatprep.mubr.f32.mxu0 %v497_v22  ;;  %2160 = vmatprep.mubr.f32.mxu1 %v497_v22  ;;  %v456_v21 = vld [vmem:[%s10515_s25 + $0xc8] sm:$0xff] }
  0xb1   : > { %7384 = vmatprep.subr.bf16.mxu0 %v9380_v23  ;;  %7608 = vmatprep.subr.bf16.mxu1 %v9383_v24  ;;  %v464_v22 = vld [vmem:[%s10515_s25 + $0x108] sm:$0xff]  ;;  %v9442_v23 = vld [vmem:[%s13394_s2 + $0x660] ss:$16 sps:$4 sm:$0xff]  }
  0xb2   : > { %1517 = vmatmul.mubr.f32.gmra.mrb[18].mxu0 %v496_v25  ;;  %2161 = vmatmul.mubr.f32.gmra.mrb[18].mxu1 %v496_v25  ;;  %v9445_v24 = vld [vmem:[%s13394_s2 + $0x668] ss:$16 sps:$4 sm:$0xff]   ;;  %v9446_v25 = vld [vmem:[%s13394_s2 + $0x684] ss:$16 sps:$4 sm:$0xff]  }
  0xb3   : > { %7386 = vmatpush1.bf16.msra.mxu0 %v9382_v26  ;;  %7610 = vmatpush1.bf16.msra.mxu1 %v9385_v27  ;;  %v9449_v26 = vld [vmem:[%s13394_s2 + $0x68c] ss:$16 sps:$4 sm:$0xff]   ;;  %v463_v27 = vld [vmem:[%s10515_s25 + $0x100] sm:$0xff] }
  0xb4   : > { %1522 = vmatprep.mubr.f32.mxu0 %v504_v28  ;;  %2166 = vmatprep.mubr.f32.mxu1 %v504_v28  ;;  %v471_v28 = vld [vmem:[%s10515_s25 + $0x140] sm:$0xff] }
  0xb5   : > { %7388 = vmatprep.subr.bf16.mxu0 %v9386_v29  ;;  %7612 = vmatprep.subr.bf16.mxu1 %v9389_v30  ;;  %v9448_v29 = vld [vmem:[%s13394_s2 + $0x680] ss:$16 sps:$4 sm:$0xff]   ;;  %v9451_v30 = vld [vmem:[%s13394_s2 + $0x688] ss:$16 sps:$4 sm:$0xff]  }
  0xb6   : > { %1523 = vmatmul.mubr.f32.gmra.mrb[20].mxu0 %v503_v31  ;;  %2167 = vmatmul.mubr.f32.gmra.mrb[20].mxu1 %v503_v31  ;;  %v9452_v31 = vld [vmem:[%s13394_s2 + $0x6a4] ss:$16 sps:$4 sm:$0xff]  }
  0xb7   : > { %7390 = vmatpush1.bf16.msra.mxu0 %v9388_v32  ;;  %7614 = vmatpush1.bf16.msra.mxu1 %v9391_v33  ;;  %v9455_v32 = vld [vmem:[%s13394_s2 + $0x6ac] ss:$16 sps:$4 sm:$0xff]  }
  0xb8   : > { %1528 = vmatprep.mubr.f32.mxu0 %v511_v34  ;;  %2172 = vmatprep.mubr.f32.mxu1 %v511_v34  ;;  %v470_v33 = vld [vmem:[%s10515_s25 + $0x138] sm:$0xff] }
  0xb9   : > { %7392 = vmatprep.subr.bf16.mxu0 %v9392_v35  ;;  %7616 = vmatprep.subr.bf16.mxu1 %v9395_v36  ;;  %v478_v34 = vld [vmem:[%s10515_s25 + $0x178] sm:$0xff]  ;;  %v9454_v35 = vld [vmem:[%s13394_s2 + $0x6a0] ss:$16 sps:$4 sm:$0xff]  }
  0xba   : > { %1529 = vmatmul.mubr.f32.gmra.mrb[22].mxu0 %v510_v37  ;;  %2173 = vmatmul.mubr.f32.gmra.mrb[22].mxu1 %v510_v37  ;;  %v9457_v36 = vld [vmem:[%s13394_s2 + $0x6a8] ss:$16 sps:$4 sm:$0xff]   ;;  %v9458_v37 = vld [vmem:[%s13394_s2 + $0x6c4] ss:$16 sps:$4 sm:$0xff]  }
  0xbb   : > { %7394 = vmatpush1.bf16.msra.mxu0 %v9394_v38  ;;  %7618 = vmatpush1.bf16.msra.mxu1 %v9397_v39  ;;  %v9461_v38 = vld [vmem:[%s13394_s2 + $0x6cc] ss:$16 sps:$4 sm:$0xff]   ;;  %v477_v39 = vld [vmem:[%s10515_s25 + $0x170] sm:$0xff] }
  0xbc   : > { %1534 = vmatprep.mubr.f32.mxu0 %v518_v40  ;;  %2178 = vmatprep.mubr.f32.mxu1 %v518_v40  ;;  %v485_v40 = vld [vmem:[%s10515_s25 + $0x1b0] sm:$0xff] }
  0xbd   : > { %7396 = vmatprep.subr.bf16.mxu0 %v9398_v41  ;;  %7620 = vmatprep.subr.bf16.mxu1 %v9401_v42  ;;  %v9460_v41 = vld [vmem:[%s13394_s2 + $0x6c0] ss:$16 sps:$4 sm:$0xff]   ;;  %v9463_v42 = vld [vmem:[%s13394_s2 + $0x6c8] ss:$16 sps:$4 sm:$0xff]  }
  0xbe   : > { %1535 = vmatmul.mubr.f32.gmra.mrb[24].mxu0 %v517_v43  ;;  %2179 = vmatmul.mubr.f32.gmra.mrb[24].mxu1 %v517_v43  ;;  %v9464_v43 = vld [vmem:[%s13394_s2 + $0x6e4] ss:$16 sps:$4 sm:$0xff]  }
  0xbf   : > { %7398 = vmatpush1.bf16.msra.mxu0 %v9400_v44  ;;  %7622 = vmatpush1.bf16.msra.mxu1 %v9403_v45  ;;  %v9467_v44 = vld [vmem:[%s13394_s2 + $0x6ec] ss:$16 sps:$4 sm:$0xff]  }
  0xc0   : > { %1540 = vmatprep.mubr.f32.mxu0 %v525_v46  ;;  %2184 = vmatprep.mubr.f32.mxu1 %v525_v46  ;;  %v484_v45 = vld [vmem:[%s10515_s25 + $0x1a8] sm:$0xff] }
  0xc1   : > { %7400 = vmatprep.subr.bf16.mxu0 %v9404_v47  ;;  %7624 = vmatprep.subr.bf16.mxu1 %v9407_v48  ;;  %v492_v46 = vld [vmem:[%s10515_s25 + $0x1e8] sm:$0xff]  ;;  %v9466_v47 = vld [vmem:[%s13394_s2 + $0x6e0] ss:$16 sps:$4 sm:$0xff]  }
  0xc2   : > { %1541 = vmatmul.mubr.f32.gmra.mrb[26].mxu0 %v524_v49  ;;  %2185 = vmatmul.mubr.f32.gmra.mrb[26].mxu1 %v524_v49  ;;  %v9469_v48 = vld [vmem:[%s13394_s2 + $0x6e8] ss:$16 sps:$4 sm:$0xff]   ;;  %v6875_v49 = vld [vmem:[%s13396_s4 + $0x40] sm:$0xff]  }
  0xc3   : > { %7402 = vmatpush1.bf16.msra.mxu0 %v9406_v50  ;;  %7626 = vmatpush1.bf16.msra.mxu1 %v9409_v51  ;;  %v6891_v50 = vld [vmem:[%s13396_s4 + $0xc0] sm:$0xff]  }
  0xc4   : > { %1546 = vmatprep.mubr.f32.mxu0 %v532_v52  ;;  %2190 = vmatprep.mubr.f32.mxu1 %v532_v52  ;;  %v491_v51 = vld [vmem:[%s10515_s25 + $0x1e0] sm:$0xff] }
  0xc5   : > { %7404 = vmatprep.subr.bf16.mxu0 %v9410_v53  ;;  %7628 = vmatprep.subr.bf16.mxu1 %v9413_v54  ;;  %v499_v52 = vld [vmem:[%s10515_s25 + $0x220] sm:$0xff]  ;;  %v498_v53 = vld [vmem:[%s10515_s25 + $0x218] sm:$0xff] }
  0xc6   : > { %1547 = vmatmul.mubr.f32.gmra.mrb[28].mxu0 %v531_v55  ;;  %2191 = vmatmul.mubr.f32.gmra.mrb[28].mxu1 %v531_v55  ;;  %v506_v54 = vld [vmem:[%s10515_s25 + $0x258] sm:$0xff]  ;;  %v505_v55 = vld [vmem:[%s10515_s25 + $0x250] sm:$0xff] }
  0xc7   : > { %7406 = vmatpush1.bf16.msra.mxu0 %v9412_v56  ;;  %7630 = vmatpush1.bf16.msra.mxu1 %v9415_v57  ;;  %v513_v56 = vld [vmem:[%s10515_s25 + $0x290] sm:$0xff]  ;;  %v512_v57 = vld [vmem:[%s10515_s25 + $0x288] sm:$0xff] }
  0xc8   : > { %1552 = vmatprep.mubr.f32.mxu0 %v539_v58  ;;  %2196 = vmatprep.mubr.f32.mxu1 %v539_v58  ;;  %v520_v58 = vld [vmem:[%s10515_s25 + $0x2c8] sm:$0xff] }
  0xc9   : > { %7408 = vmatprep.subr.bf16.mxu0 %v9416_v59  ;;  %7632 = vmatprep.subr.bf16.mxu1 %v9419_v60  ;;  %v519_v59 = vld [vmem:[%s10515_s25 + $0x2c0] sm:$0xff] }
  0xca   : > { %1553 = vmatmul.mubr.f32.gmra.mrb[30].mxu0 %v538_v61  ;;  %2197 = vmatmul.mubr.f32.gmra.mrb[30].mxu1 %v538_v61  ;;  %v527_v60 = vld [vmem:[%s10515_s25 + $0x300] sm:$0xff]  ;;  %v526_v61 = vld [vmem:[%s10515_s25 + $0x2f8] sm:$0xff] }
  0xcb   : > { %7410 = vmatpush1.bf16.msra.mxu0 %v9418_v62  ;;  %7634 = vmatpush1.bf16.msra.mxu1 %v9421_v63  ;;  %v534_v62 = vld [vmem:[%s10515_s25 + $0x338] sm:$0xff]  ;;  %v533_v63 = vld [vmem:[%s10515_s25 + $0x330] sm:$0xff] }
  0xcc   : > { %1623 = vmatprep.mubr.f32.mxu0 %v436_v0  ;;  %2267 = vmatprep.mubr.f32.mxu1 %v436_v0  ;;  %v541_v0 = vld [vmem:[%s10515_s25 + $0x370] sm:$0xff] }
  0xcd   : > { %7412 = vmatprep.subr.bf16.mxu0 %v9422_v1  ;;  %7636 = vmatprep.subr.bf16.mxu1 %v9425_v2  ;;  %v540_v1 = vld [vmem:[%s10515_s25 + $0x368] sm:$0xff]  ;;  %v437_v2 = vld [vmem:[%s10515_s25 + $0x30] sm:$0xff] }
  0xce   : > { %1624 = vmatmul.mubr.f32.vlgmr.msra.gmra.mrb[0].mxu0 %v435_v3  ;;  %2268 = vmatmul.mubr.f32.vlgmr.msra.gmra.mrb[0].mxu1 %v435_v3  ;;  %v10303_v3 = vmov 0.0  }
  0xcf   : > { %7414 = vmatpush1.bf16.msra.mxu0 %v9424_v4  ;;  %1629 = vmatprep.mubr.f32.mxu0 %v443_v6  ;;  %v6741_v4 = vld [vmem:[%s13396_s4] sm:$0xff]  }
  0xd0   : > { %2273 = vmatprep.mubr.f32.mxu1 %v443_v6  ;;  %7638 = vmatpush1.bf16.msra.mxu1 %v9427_v5  ;;  %v6883_v5 = vld [vmem:[%s13396_s4 + $0x80] sm:$0xff]   ;;  %v6876_v6 = vld [vmem:[%s13396_s4 + $0x48] sm:$0xff]  }
  0xd1   : > { %7416 = vmatprep.subr.bf16.mxu0 %v9428_v7  ;;  %7640 = vmatprep.subr.bf16.mxu1 %v9431_v8  ;;  %v6892_v7 = vld [vmem:[%s13396_s4 + $0xc8] sm:$0xff]  }
  0xd2   : > { %1630 = vmatmul.mubr.f32.gmra.mrb[2].mxu0 %v442_v9  ;;  %2274 = vmatmul.mubr.f32.gmra.mrb[2].mxu1 %v442_v9  ;;  %v444_v8 = vld [vmem:[%s10515_s25 + $0x68] sm:$0xff] }
  0xd3   : > { %1635 = vmatprep.mubr.f32.mxu0 %v450_v10  ;;  %2279 = vmatprep.mubr.f32.mxu1 %v450_v10  ;;  %v6868_v9 = vld [vmem:[%s13396_s4 + $0x8] sm:$0xff]  }
  0xd4   : > { %7418 = vmatpush1.bf16.msra.mxu0 %v9430_v11  ;;  %7642 = vmatpush1.bf16.msra.mxu1 %v9433_v12  ;;  %v6884_v10 = vld [vmem:[%s13396_s4 + $0x88] sm:$0xff]   ;;  %v6877_v11 = vld [vmem:[%s13396_s4 + $0x50] sm:$0xff]  }
  0xd5   : > { %7420 = vmatprep.subr.bf16.mxu0 %v9434_v13  ;;  %7644 = vmatprep.subr.bf16.mxu1 %v9437_v14  ;;  %v6893_v12 = vld [vmem:[%s13396_s4 + $0xd0] sm:$0xff]   ;;  %v451_v13 = vld [vmem:[%s10515_s25 + $0xa0] sm:$0xff] }
  0xd6   : > { %1636 = vmatmul.mubr.f32.gmra.mrb[4].mxu0 %v449_v15  ;;  %2280 = vmatmul.mubr.f32.gmra.mrb[4].mxu1 %v449_v15  ;;  %v6869_v14 = vld [vmem:[%s13396_s4 + $0x10] sm:$0xff]  }
  0xd7   : > { %1641 = vmatprep.mubr.f32.mxu0 %v457_v16  ;;  %2285 = vmatprep.mubr.f32.mxu1 %v457_v16  ;;  %v6885_v15 = vld [vmem:[%s13396_s4 + $0x90] sm:$0xff]   ;;  %v6878_v16 = vld [vmem:[%s13396_s4 + $0x58] sm:$0xff]  }
  0xd8   : > { %7422 = vmatpush1.bf16.msra.mxu0 %v9436_v17  ;;  %7646 = vmatpush1.bf16.msra.mxu1 %v9439_v18  ;;  %v6894_v17 = vld [vmem:[%s13396_s4 + $0xd8] sm:$0xff]  }
  0xd9   : > { %7424 = vmatprep.subr.bf16.mxu0 %v9440_v19  ;;  %7648 = vmatprep.subr.bf16.mxu1 %v9443_v20  ;;  %v458_v18 = vld [vmem:[%s10515_s25 + $0xd8] sm:$0xff] }
  0xda   : > { %1642 = vmatmul.mubr.f32.gmra.mrb[6].mxu0 %v456_v21  ;;  %2286 = vmatmul.mubr.f32.gmra.mrb[6].mxu1 %v456_v21  ;;  %v6870_v19 = vld [vmem:[%s13396_s4 + $0x18] sm:$0xff]   ;;  %v6879_v21 = vld [vmem:[%s13396_s4 + $0x60] sm:$0xff]  }
  0xdb   : > { %1647 = vmatprep.mubr.f32.mxu0 %v464_v22  ;;  %2291 = vmatprep.mubr.f32.mxu1 %v464_v22  ;;  %v6886_v20 = vld [vmem:[%s13396_s4 + $0x98] sm:$0xff]   ;;  %v6895_v22 = vld [vmem:[%s13396_s4 + $0xe0] sm:$0xff]  }
  0xdc   : > { %7426 = vmatpush1.bf16.msra.mxu0 %v9442_v23  ;;  %7650 = vmatpush1.bf16.msra.mxu1 %v9445_v24  ;;  %v465_v23 = vld [vmem:[%s10515_s25 + $0x110] sm:$0xff]  ;;  %v6871_v24 = vld [vmem:[%s13396_s4 + $0x20] sm:$0xff]  }
  0xdd   : > { %7428 = vmatprep.subr.bf16.mxu0 %v9446_v25  ;;  %7652 = vmatprep.subr.bf16.mxu1 %v9449_v26  ;;  %v6887_v25 = vld [vmem:[%s13396_s4 + $0xa0] sm:$0xff]   ;;  %v6880_v26 = vld [vmem:[%s13396_s4 + $0x68] sm:$0xff]  }
  0xde   : > { %1648 = vmatmul.mubr.f32.gmra.mrb[8].mxu0 %v463_v27  ;;  %2292 = vmatmul.mubr.f32.gmra.mrb[8].mxu1 %v463_v27  ;;  %v6896_v27 = vld [vmem:[%s13396_s4 + $0xe8] sm:$0xff]  }
  0xdf   : > { %1653 = vmatprep.mubr.f32.mxu0 %v471_v28  ;;  %2297 = vmatprep.mubr.f32.mxu1 %v471_v28  ;;  %v472_v28 = vld [vmem:[%s10515_s25 + $0x148] sm:$0xff] }
  0xe0   : > { %7430 = vmatpush1.bf16.msra.mxu0 %v9448_v29  ;;  %7654 = vmatpush1.bf16.msra.mxu1 %v9451_v30  ;;  %v6872_v29 = vld [vmem:[%s13396_s4 + $0x28] sm:$0xff]  }
  0xe1   : > { %7432 = vmatprep.subr.bf16.mxu0 %v9452_v31  ;;  %7656 = vmatprep.subr.bf16.mxu1 %v9455_v32  ;;  %v6888_v30 = vld [vmem:[%s13396_s4 + $0xa8] sm:$0xff]   ;;  %v6881_v31 = vld [vmem:[%s13396_s4 + $0x70] sm:$0xff]  }
  0xe2   : > { %1654 = vmatmul.mubr.f32.gmra.mrb[10].mxu0 %v470_v33  ;;  %2298 = vmatmul.mubr.f32.gmra.mrb[10].mxu1 %v470_v33  ;;  %v6897_v32 = vld [vmem:[%s13396_s4 + $0xf0] sm:$0xff]   ;;  %v479_v33 = vld [vmem:[%s10515_s25 + $0x180] sm:$0xff] }
  0xe3   : > { %1659 = vmatprep.mubr.f32.mxu0 %v478_v34  ;;  %2303 = vmatprep.mubr.f32.mxu1 %v478_v34  ;;  %v6873_v34 = vld [vmem:[%s13396_s4 + $0x30] sm:$0xff]  }
  0xe4   : > { %7434 = vmatpush1.bf16.msra.mxu0 %v9454_v35  ;;  %7658 = vmatpush1.bf16.msra.mxu1 %v9457_v36  ;;  %v6889_v35 = vld [vmem:[%s13396_s4 + $0xb0] sm:$0xff]   ;;  %v6882_v36 = vld [vmem:[%s13396_s4 + $0x78] sm:$0xff]  }
  0xe5   : > { %7436 = vmatprep.subr.bf16.mxu0 %v9458_v37  ;;  %7660 = vmatprep.subr.bf16.mxu1 %v9461_v38  ;;  %v486_v37 = vld [vmem:[%s10515_s25 + $0x1b8] sm:$0xff]  ;;  %v493_v38 = vld [vmem:[%s10515_s25 + $0x1f0] sm:$0xff] }
  0xe6   : > { %1660 = vmatmul.mubr.f32.gmra.mrb[12].mxu0 %v477_v39  ;;  %2304 = vmatmul.mubr.f32.gmra.mrb[12].mxu1 %v477_v39  ;;  %v500_v39 = vld [vmem:[%s10515_s25 + $0x228] sm:$0xff] }
  0xe7   : > { %1665 = vmatprep.mubr.f32.mxu0 %v485_v40  ;;  %2309 = vmatprep.mubr.f32.mxu1 %v485_v40  ;;  %v507_v40 = vld [vmem:[%s10515_s25 + $0x260] sm:$0xff] }
  0xe8   : > { %7438 = vmatpush1.bf16.msra.mxu0 %v9460_v41  ;;  %7662 = vmatpush1.bf16.msra.mxu1 %v9463_v42  ;;  %v514_v41 = vld [vmem:[%s10515_s25 + $0x298] sm:$0xff]  ;;  %v521_v42 = vld [vmem:[%s10515_s25 + $0x2d0] sm:$0xff] }
  0xe9   : > { %7440 = vmatprep.subr.bf16.mxu0 %v9464_v43  ;;  %7664 = vmatprep.subr.bf16.mxu1 %v9467_v44  ;;  %v528_v43 = vld [vmem:[%s10515_s25 + $0x308] sm:$0xff]  ;;  %v535_v44 = vld [vmem:[%s10515_s25 + $0x340] sm:$0xff] }
  0xea   : > { %1666 = vmatmul.mubr.f32.gmra.mrb[14].mxu0 %v484_v45  ;;  %2310 = vmatmul.mubr.f32.gmra.mrb[14].mxu1 %v484_v45  ;;  %v542_v45 = vld [vmem:[%s10515_s25 + $0x378] sm:$0xff]  ;;  %s6588_s25 = sshll.u32 %s13482_s26, 3 }
  0xeb   : > { %1671 = vmatprep.mubr.f32.mxu0 %v492_v46  ;;  %2315 = vmatprep.mubr.f32.mxu1 %v492_v46  ;;  %v6898_v46 = vld [vmem:[%s13396_s4 + $0xf8] sm:$0xff]   ;;  %s11446_s15 = scalar_lea.vmem %s13403_s11, %s6588_s25  ;;  %s11576_s12 = scalar_lea.vmem %s13393_s1, %s6588_s25 }
  0xec   : > { %7442 = vmatpush1.bf16.msra.mxu0 %v9466_v47  ;;  %7666 = vmatpush1.bf16.msra.mxu1 %v9469_v48  ;;  %v6874_v47 = vld [vmem:[%s13396_s4 + $0x38] sm:$0xff]  }
  0xed   : > { %7668 = vmatprep.subr.bf16.mxu0 %v6875_v49  ;;  %7700 = vmatprep.subr.bf16.mxu1 %v6891_v50  ;;  %v6890_v48 = vld [vmem:[%s13396_s4 + $0xb8] sm:$0xff]   ;;  %v1217_v49 = vlaneseq }
  0xee   : > { %1672 = vmatmul.mubr.f32.gmra.mrb[16].mxu0 %v491_v51  ;;  %2316 = vmatmul.mubr.f32.gmra.mrb[16].mxu1 %v491_v51 }
  0xef   : > { %1677 = vmatprep.mubr.f32.mxu0 %v499_v52  ;;  %2321 = vmatprep.mubr.f32.mxu1 %v499_v52  ;;  %v11297_v50 = vshrl.u32 %v1217_v49, 7 }
  0xf1   : > { %13441 = vst [vmem:[#allocation2_spill] sm:$0xff] %v11297_v50  ;;  %v11300_v51 = vsub.s32 0, %v11297_v50  ;;  %v11303_v52 = vsub.s32 2, %v11297_v50 }
  0xf2   : > { %1678 = vmatmul.mubr.f32.gmra.mrb[18].mxu0 %v498_v53  ;;  %2322 = vmatmul.mubr.f32.gmra.mrb[18].mxu1 %v498_v53  ;;  %v1215_v53 = vld [vmem:[%s13395_s3] sm:$0xf] }
  0xf3   : > { %1683 = vmatprep.mubr.f32.mxu0 %v506_v54  ;;  %2327 = vmatprep.mubr.f32.mxu1 %v506_v54  ;;  %13442 = vst [vmem:[#allocation3_spill] sm:$0xff] %v11300_v51  ;;  %v11309_v54 = vsub.s32 1, %v11297_v50 }
  0xf5   : > { %13443 = vst [vmem:[#allocation4_spill] sm:$0xff] %v11309_v54 }
  0xf6   : > { %1684 = vmatmul.mubr.f32.gmra.mrb[20].mxu0 %v505_v55  ;;  %2328 = vmatmul.mubr.f32.gmra.mrb[20].mxu1 %v505_v55  ;;  %v11312_v55 = vsub.s32 3, %v11297_v50 }
  0xf7   : > { %1689 = vmatprep.mubr.f32.mxu0 %v513_v56  ;;  %2333 = vmatprep.mubr.f32.mxu1 %v513_v56  ;;  %v11315_v56 = vrot.slane %v1215_v53, %v11300_v51 }
  0xf8   : > { %13444 = vst [vmem:[#allocation5_spill] sm:$0xff] %v11312_v55 }
  0xfa   : > { %1690 = vmatmul.mubr.f32.gmra.mrb[22].mxu0 %v512_v57  ;;  %2334 = vmatmul.mubr.f32.gmra.mrb[22].mxu1 %v512_v57  ;;  %v11318_v57 = vrot.slane %v1215_v53, %v11303_v52 }
  0xfb   : > { %1695 = vmatprep.mubr.f32.mxu0 %v520_v58  ;;  %2339 = vmatprep.mubr.f32.mxu1 %v520_v58  ;;  %v11321_v58 = vrot.slane %v1215_v53, %v11309_v54 }
  0xfe   : > { %1696 = vmatmul.mubr.f32.gmra.mrb[24].mxu0 %v519_v59  ;;  %2340 = vmatmul.mubr.f32.gmra.mrb[24].mxu1 %v519_v59  ;;  %v11324_v59 = vrot.slane %v1215_v53, %v11312_v55 }
  0xff   : > { %1701 = vmatprep.mubr.f32.mxu0 %v527_v60  ;;  %2345 = vmatprep.mubr.f32.mxu1 %v527_v60 }
 0x102   : > { %1702 = vmatmul.mubr.f32.gmra.mrb[26].mxu0 %v526_v61  ;;  %2346 = vmatmul.mubr.f32.gmra.mrb[26].mxu1 %v526_v61 }
 0x103   : > { %1707 = vmatprep.mubr.f32.mxu0 %v534_v62  ;;  %2351 = vmatprep.mubr.f32.mxu1 %v534_v62 }
 0x106   : > { %1708 = vmatmul.mubr.f32.gmra.mrb[28].mxu0 %v533_v63  ;;  %2352 = vmatmul.mubr.f32.gmra.mrb[28].mxu1 %v533_v63 }
 0x107   : > { %1713 = vmatprep.mubr.f32.mxu0 %v541_v0  ;;  %2357 = vmatprep.mubr.f32.mxu1 %v541_v0 }
 0x10a   : > { %1714 = vmatmul.mubr.f32.gmra.mrb[30].mxu0 %v540_v1  ;;  %2358 = vmatmul.mubr.f32.gmra.mrb[30].mxu1 %v540_v1 }
 0x10b   : > { %1784 = vmatprep.mubr.f32.mxu0 %v10303_v3  ;;  %2428 = vmatprep.mubr.f32.mxu1 %v10303_v3 }
 0x10e   : > { %1785 = vmatmul.mubr.f32.vlgmr.msra.gmra.mrb[0].mxu0 %v437_v2  ;;  %2429 = vmatmul.mubr.f32.vlgmr.msra.gmra.mrb[0].mxu1 %v437_v2 }
 0x10f   : > { %1790 = vmatprep.mubr.f32.mxu0 %v10303_v3  ;;  %2434 = vmatprep.mubr.f32.mxu1 %v10303_v3 }
 0x110   : > { %7670 = vmatpush3.bf16.msra.mxu0 %v6741_v4  ;;  %7702 = vmatpush3.bf16.msra.mxu1 %v6883_v5 }
 0x111   : > { %7672 = vmatprep.subr.bf16.mxu0 %v6876_v6  ;;  %7704 = vmatprep.subr.bf16.mxu1 %v6892_v7 }
 0x112   : > { %1791 = vmatmul.mubr.f32.gmra.mrb[2].mxu0 %v444_v8  ;;  %2435 = vmatmul.mubr.f32.gmra.mrb[2].mxu1 %v444_v8 }
 0x113   : > { %1796 = vmatprep.mubr.f32.mxu0 %v10303_v3  ;;  %2440 = vmatprep.mubr.f32.mxu1 %v10303_v3 }
 0x114   : > { %7674 = vmatpush3.bf16.msra.mxu0 %v6868_v9  ;;  %7706 = vmatpush3.bf16.msra.mxu1 %v6884_v10 }
 0x115   : > { %7676 = vmatprep.subr.bf16.mxu0 %v6877_v11  ;;  %7708 = vmatprep.subr.bf16.mxu1 %v6893_v12 }
 0x116   : > { %1797 = vmatmul.mubr.f32.gmra.mrb[4].mxu0 %v451_v13  ;;  %2441 = vmatmul.mubr.f32.gmra.mrb[4].mxu1 %v451_v13 }
 0x117   : > { %1802 = vmatprep.mubr.f32.mxu0 %v10303_v3  ;;  %2446 = vmatprep.mubr.f32.mxu1 %v10303_v3 }
 0x118   : > { %7678 = vmatpush3.bf16.msra.mxu0 %v6869_v14  ;;  %7710 = vmatpush3.bf16.msra.mxu1 %v6885_v15 }
 0x119   : > { %7680 = vmatprep.subr.bf16.mxu0 %v6878_v16  ;;  %7712 = vmatprep.subr.bf16.mxu1 %v6894_v17 }
 0x11a   : > { %1803 = vmatmul.mubr.f32.gmra.mrb[6].mxu0 %v458_v18  ;;  %2447 = vmatmul.mubr.f32.gmra.mrb[6].mxu1 %v458_v18 }
 0x11b   : > { %1808 = vmatprep.mubr.f32.mxu0 %v10303_v3  ;;  %2452 = vmatprep.mubr.f32.mxu1 %v10303_v3 }
 0x11c   : > { %7682 = vmatpush3.bf16.msra.mxu0 %v6870_v19  ;;  %7714 = vmatpush3.bf16.msra.mxu1 %v6886_v20 }
 0x11d   : > { %7684 = vmatprep.subr.bf16.mxu0 %v6879_v21  ;;  %7716 = vmatprep.subr.bf16.mxu1 %v6895_v22 }
 0x11e   : > { %1809 = vmatmul.mubr.f32.gmra.mrb[8].mxu0 %v465_v23  ;;  %2453 = vmatmul.mubr.f32.gmra.mrb[8].mxu1 %v465_v23 }
 0x11f   : > { %1814 = vmatprep.mubr.f32.mxu0 %v10303_v3  ;;  %2458 = vmatprep.mubr.f32.mxu1 %v10303_v3 }
 0x120   : > { %7686 = vmatpush3.bf16.msra.mxu0 %v6871_v24  ;;  %7718 = vmatpush3.bf16.msra.mxu1 %v6887_v25 }
 0x121   : > { %7688 = vmatprep.subr.bf16.mxu0 %v6880_v26  ;;  %7720 = vmatprep.subr.bf16.mxu1 %v6896_v27 }
 0x122   : > { %1815 = vmatmul.mubr.f32.gmra.mrb[10].mxu0 %v472_v28  ;;  %2459 = vmatmul.mubr.f32.gmra.mrb[10].mxu1 %v472_v28 }
 0x123   : > { %1820 = vmatprep.mubr.f32.mxu0 %v10303_v3  ;;  %2464 = vmatprep.mubr.f32.mxu1 %v10303_v3 }
 0x124   : > { %7690 = vmatpush3.bf16.msra.mxu0 %v6872_v29  ;;  %7722 = vmatpush3.bf16.msra.mxu1 %v6888_v30 }
 0x125   : > { %7692 = vmatprep.subr.bf16.mxu0 %v6881_v31  ;;  %7724 = vmatprep.subr.bf16.mxu1 %v6897_v32 }
 0x126   : > { %1821 = vmatmul.mubr.f32.gmra.mrb[12].mxu0 %v479_v33  ;;  %2465 = vmatmul.mubr.f32.gmra.mrb[12].mxu1 %v479_v33 }
 0x127   : > { %1826 = vmatprep.mubr.f32.mxu0 %v10303_v3  ;;  %2470 = vmatprep.mubr.f32.mxu1 %v10303_v3 }
 0x128   : > { %7694 = vmatpush3.bf16.msra.mxu0 %v6873_v34  ;;  %7726 = vmatpush3.bf16.msra.mxu1 %v6889_v35 }
 0x129   : > { %7696 = vmatprep.subr.bf16.mxu0 %v6882_v36  ;;  %7728 = vmatprep.subr.bf16.mxu1 %v6898_v46 }
 0x12a   : > { %1827 = vmatmul.mubr.f32.gmra.mrb[14].mxu0 %v486_v37  ;;  %2471 = vmatmul.mubr.f32.gmra.mrb[14].mxu1 %v486_v37 }
 0x12b   : > { %1832 = vmatprep.mubr.f32.mxu0 %v10303_v3  ;;  %2476 = vmatprep.mubr.f32.mxu1 %v10303_v3 }
 0x12c   : > { %7698 = vmatpush3.bf16.msra.mxu0 %v6874_v47  ;;  %7730 = vmatpush3.bf16.msra.mxu1 %v6890_v48 }
 0x12e   : > { %1833 = vmatmul.mubr.f32.gmra.mrb[16].mxu0 %v493_v38  ;;  %2477 = vmatmul.mubr.f32.gmra.mrb[16].mxu1 %v493_v38 }
 0x12f   : > { %1838 = vmatprep.mubr.f32.mxu0 %v10303_v3  ;;  %2482 = vmatprep.mubr.f32.mxu1 %v10303_v3 }
 0x132   : > { %1839 = vmatmul.mubr.f32.gmra.mrb[18].mxu0 %v500_v39  ;;  %2483 = vmatmul.mubr.f32.gmra.mrb[18].mxu1 %v500_v39 }
 0x133   : > { %1844 = vmatprep.mubr.f32.mxu0 %v10303_v3  ;;  %2488 = vmatprep.mubr.f32.mxu1 %v10303_v3 }
 0x136   : > { %1845 = vmatmul.mubr.f32.gmra.mrb[20].mxu0 %v507_v40  ;;  %2489 = vmatmul.mubr.f32.gmra.mrb[20].mxu1 %v507_v40 }
 0x137   : > { %1850 = vmatprep.mubr.f32.mxu0 %v10303_v3  ;;  %2494 = vmatprep.mubr.f32.mxu1 %v10303_v3 }
 0x13a   : > { %1851 = vmatmul.mubr.f32.gmra.mrb[22].mxu0 %v514_v41  ;;  %2495 = vmatmul.mubr.f32.gmra.mrb[22].mxu1 %v514_v41 }
 0x13b   : > { %1856 = vmatprep.mubr.f32.mxu0 %v10303_v3  ;;  %2500 = vmatprep.mubr.f32.mxu1 %v10303_v3 }
 0x13e   : > { %1857 = vmatmul.mubr.f32.gmra.mrb[24].mxu0 %v521_v42  ;;  %2501 = vmatmul.mubr.f32.gmra.mrb[24].mxu1 %v521_v42 }
 0x13f   : > { %1862 = vmatprep.mubr.f32.mxu0 %v10303_v3  ;;  %2506 = vmatprep.mubr.f32.mxu1 %v10303_v3 }
 0x142   : > { %1863 = vmatmul.mubr.f32.gmra.mrb[26].mxu0 %v528_v43  ;;  %2507 = vmatmul.mubr.f32.gmra.mrb[26].mxu1 %v528_v43 }
 0x143   : > { %1868 = vmatprep.mubr.f32.mxu0 %v10303_v3  ;;  %2512 = vmatprep.mubr.f32.mxu1 %v10303_v3 }
 0x146   : > { %1869 = vmatmul.mubr.f32.gmra.mrb[28].mxu0 %v535_v44  ;;  %2513 = vmatmul.mubr.f32.gmra.mrb[28].mxu1 %v535_v44 }
 0x147   : > { %1874 = vmatprep.mubr.f32.mxu0 %v10303_v3  ;;  %2518 = vmatprep.mubr.f32.mxu1 %v10303_v3 }
 0x14a   : > { %1875 = vmatmul.mubr.f32.gmra.mrb[30].mxu0 %v542_v45  ;;  %2519 = vmatmul.mubr.f32.gmra.mrb[30].mxu1 %v542_v45 }
 0x1e1   : > { %v1786_v60 = vpop.f32.mrb[0].mxu0  ;;  %v2430_v61 = vpop.f32.mrb[0].mxu1 }
 0x1e2   : > { %v8211_v62 = vadd.f32 %v1786_v60, %v11315_v56  ;;  %v8243_v63 = vadd.f32 %v2430_v61, %v11318_v57  ;;  %v1788_v0 = vpop.f32.mrb[1].mxu0  ;;  %v2432_v1 = vpop.f32.mrb[1].mxu1 }
 0x1e3   : > { %v8212_v2 = vadd.f32 %v1788_v0, %v11321_v58  ;;  %v8244_v4 = vadd.f32 %v2432_v1, %v11324_v59 }
 0x1e4   : > { %v2525_v9 = vmax.f32 %v8211_v62, 0.0  ;;  %v2527_v10 = vmax.f32 %v8243_v63, 0.0 }
 0x1e5   : > { %v2526_v5 = vmax.f32 %v8212_v2, 0.0  ;;  %v2528_v6 = vmax.f32 %v8244_v4, 0.0  ;;  %v1792_v7 = vpop.f32.mrb[2].mxu0  ;;  %v2436_v8 = vpop.f32.mrb[2].mxu1 }
 0x1e6   : > { %v8213_v11 = vadd.f32 %v1792_v7, %v11315_v56  ;;  %v8245_v12 = vadd.f32 %v2436_v8, %v11318_v57  ;;  %v1794_v13 = vpop.f32.mrb[3].mxu0  ;;  %v2438_v14 = vpop.f32.mrb[3].mxu1 }
 0x1e7   : > { %v8214_v15 = vadd.f32 %v1794_v13, %v11321_v58  ;;  %v8246_v16 = vadd.f32 %v2438_v14, %v11324_v59  ;;  %2788 = vmatprep.mubr.f32.mxu0 %v2526_v5  ;;  %2933 = vmatprep.mubr.f32.mxu1 %v2528_v6 }
 0x1e8   : > { %2789 = vmatmul.mubr.f32.vlgmr.msra.gmra.mrb[32].mxu0 %v2525_v9  ;;  %2934 = vmatmul.mubr.f32.vlgmr.msra.gmra.mrb[32].mxu1 %v2527_v10  ;;  %v2529_v21 = vmax.f32 %v8213_v11, 0.0  ;;  %v2531_v22 = vmax.f32 %v8245_v12, 0.0 }
 0x1e9   : > { %v2530_v17 = vmax.f32 %v8214_v15, 0.0  ;;  %v2532_v18 = vmax.f32 %v8246_v16, 0.0  ;;  %v1798_v19 = vpop.f32.mrb[4].mxu0  ;;  %v2442_v20 = vpop.f32.mrb[4].mxu1 }
 0x1ea   : > { %v8215_v23 = vadd.f32 %v1798_v19, %v11315_v56  ;;  %v8247_v24 = vadd.f32 %v2442_v20, %v11318_v57  ;;  %v1800_v25 = vpop.f32.mrb[5].mxu0  ;;  %v2444_v26 = vpop.f32.mrb[5].mxu1 }
 0x1eb   : > { %v8216_v27 = vadd.f32 %v1800_v25, %v11321_v58  ;;  %v8248_v28 = vadd.f32 %v2444_v26, %v11324_v59  ;;  %2793 = vmatprep.mubr.f32.mxu0 %v2530_v17  ;;  %2938 = vmatprep.mubr.f32.mxu1 %v2532_v18 }
 0x1ec   : > { %2794 = vmatmul.mubr.f32.gmra.mrb[34].mxu0 %v2529_v21  ;;  %2939 = vmatmul.mubr.f32.gmra.mrb[34].mxu1 %v2531_v22  ;;  %v2533_v33 = vmax.f32 %v8215_v23, 0.0  ;;  %v2535_v34 = vmax.f32 %v8247_v24, 0.0 }
 0x1ed   : > { %v2534_v29 = vmax.f32 %v8216_v27, 0.0  ;;  %v2536_v30 = vmax.f32 %v8248_v28, 0.0  ;;  %v1804_v31 = vpop.f32.mrb[6].mxu0  ;;  %v2448_v32 = vpop.f32.mrb[6].mxu1 }
 0x1ee   : > { %v8217_v35 = vadd.f32 %v1804_v31, %v11315_v56  ;;  %v8249_v36 = vadd.f32 %v2448_v32, %v11318_v57  ;;  %v1806_v37 = vpop.f32.mrb[7].mxu0  ;;  %v2450_v38 = vpop.f32.mrb[7].mxu1 }
 0x1ef   : > { %v8218_v39 = vadd.f32 %v1806_v37, %v11321_v58  ;;  %v8250_v40 = vadd.f32 %v2450_v38, %v11324_v59  ;;  %2798 = vmatprep.mubr.f32.mxu0 %v2534_v29  ;;  %2943 = vmatprep.mubr.f32.mxu1 %v2536_v30 }
 0x1f0   : > { %2799 = vmatmul.mubr.f32.gmra.mrb[36].mxu0 %v2533_v33  ;;  %2944 = vmatmul.mubr.f32.gmra.mrb[36].mxu1 %v2535_v34  ;;  %v2537_v45 = vmax.f32 %v8217_v35, 0.0  ;;  %v2539_v46 = vmax.f32 %v8249_v36, 0.0 }
 0x1f1   : > { %v2538_v41 = vmax.f32 %v8218_v39, 0.0  ;;  %v2540_v42 = vmax.f32 %v8250_v40, 0.0  ;;  %v1810_v43 = vpop.f32.mrb[8].mxu0  ;;  %v2454_v44 = vpop.f32.mrb[8].mxu1 }
 0x1f2   : > { %v8219_v47 = vadd.f32 %v1810_v43, %v11315_v56  ;;  %v8251_v48 = vadd.f32 %v2454_v44, %v11318_v57  ;;  %v1812_v49 = vpop.f32.mrb[9].mxu0  ;;  %v2456_v53 = vpop.f32.mrb[9].mxu1 }
 0x1f3   : > { %v8220_v60 = vadd.f32 %v1812_v49, %v11321_v58  ;;  %v8252_v61 = vadd.f32 %v2456_v53, %v11324_v59  ;;  %2803 = vmatprep.mubr.f32.mxu0 %v2538_v41  ;;  %2948 = vmatprep.mubr.f32.mxu1 %v2540_v42 }
 0x1f4   : > { %2804 = vmatmul.mubr.f32.gmra.mrb[38].mxu0 %v2537_v45  ;;  %2949 = vmatmul.mubr.f32.gmra.mrb[38].mxu1 %v2539_v46  ;;  %v2541_v2 = vmax.f32 %v8219_v47, 0.0  ;;  %v2543_v4 = vmax.f32 %v8251_v48, 0.0 }
 0x1f5   : > { %v2542_v62 = vmax.f32 %v8220_v60, 0.0  ;;  %v2544_v63 = vmax.f32 %v8252_v61, 0.0  ;;  %v1816_v0 = vpop.f32.mrb[10].mxu0  ;;  %v2460_v1 = vpop.f32.mrb[10].mxu1 }
 0x1f6   : > { %v8221_v5 = vadd.f32 %v1816_v0, %v11315_v56  ;;  %v8253_v6 = vadd.f32 %v2460_v1, %v11318_v57  ;;  %v1818_v7 = vpop.f32.mrb[11].mxu0  ;;  %v2462_v8 = vpop.f32.mrb[11].mxu1 }
 0x1f7   : > { %v8222_v9 = vadd.f32 %v1818_v7, %v11321_v58  ;;  %v8254_v10 = vadd.f32 %v2462_v8, %v11324_v59  ;;  %2808 = vmatprep.mubr.f32.mxu0 %v2542_v62  ;;  %2953 = vmatprep.mubr.f32.mxu1 %v2544_v63 }
 0x1f8   : > { %2809 = vmatmul.mubr.f32.gmra.mrb[40].mxu0 %v2541_v2  ;;  %2954 = vmatmul.mubr.f32.gmra.mrb[40].mxu1 %v2543_v4  ;;  %v2545_v15 = vmax.f32 %v8221_v5, 0.0  ;;  %v2547_v16 = vmax.f32 %v8253_v6, 0.0 }
 0x1f9   : > { %v2546_v11 = vmax.f32 %v8222_v9, 0.0  ;;  %v2548_v12 = vmax.f32 %v8254_v10, 0.0  ;;  %v1822_v13 = vpop.f32.mrb[12].mxu0  ;;  %v2466_v14 = vpop.f32.mrb[12].mxu1 }
 0x1fa   : > { %v8223_v17 = vadd.f32 %v1822_v13, %v11315_v56  ;;  %v8255_v18 = vadd.f32 %v2466_v14, %v11318_v57  ;;  %v1824_v19 = vpop.f32.mrb[13].mxu0  ;;  %v2468_v20 = vpop.f32.mrb[13].mxu1 }
 0x1fb   : > { %v8224_v21 = vadd.f32 %v1824_v19, %v11321_v58  ;;  %v8256_v22 = vadd.f32 %v2468_v20, %v11324_v59  ;;  %2813 = vmatprep.mubr.f32.mxu0 %v2546_v11  ;;  %2958 = vmatprep.mubr.f32.mxu1 %v2548_v12 }
 0x1fc   : > { %2814 = vmatmul.mubr.f32.gmra.mrb[42].mxu0 %v2545_v15  ;;  %2959 = vmatmul.mubr.f32.gmra.mrb[42].mxu1 %v2547_v16  ;;  %v2549_v27 = vmax.f32 %v8223_v17, 0.0  ;;  %v2551_v28 = vmax.f32 %v8255_v18, 0.0 }
 0x1fd   : > { %v2550_v23 = vmax.f32 %v8224_v21, 0.0  ;;  %v2552_v24 = vmax.f32 %v8256_v22, 0.0  ;;  %v1828_v25 = vpop.f32.mrb[14].mxu0  ;;  %v2472_v26 = vpop.f32.mrb[14].mxu1 }
 0x1fe   : > { %v8225_v29 = vadd.f32 %v1828_v25, %v11315_v56  ;;  %v8257_v30 = vadd.f32 %v2472_v26, %v11318_v57  ;;  %v1830_v31 = vpop.f32.mrb[15].mxu0  ;;  %v2474_v32 = vpop.f32.mrb[15].mxu1 }
 0x1ff   : > { %v8226_v33 = vadd.f32 %v1830_v31, %v11321_v58  ;;  %v8258_v34 = vadd.f32 %v2474_v32, %v11324_v59  ;;  %2818 = vmatprep.mubr.f32.mxu0 %v2550_v23  ;;  %2963 = vmatprep.mubr.f32.mxu1 %v2552_v24 }
 0x200   : > { %2819 = vmatmul.mubr.f32.gmra.mrb[44].mxu0 %v2549_v27  ;;  %2964 = vmatmul.mubr.f32.gmra.mrb[44].mxu1 %v2551_v28  ;;  %v2553_v39 = vmax.f32 %v8225_v29, 0.0  ;;  %v2555_v40 = vmax.f32 %v8257_v30, 0.0 }
 0x201   : > { %v2554_v35 = vmax.f32 %v8226_v33, 0.0  ;;  %v2556_v36 = vmax.f32 %v8258_v34, 0.0  ;;  %v1834_v37 = vpop.f32.mrb[16].mxu0  ;;  %v2478_v38 = vpop.f32.mrb[16].mxu1 }
 0x202   : > { %v8227_v41 = vadd.f32 %v1834_v37, %v11315_v56  ;;  %v8259_v42 = vadd.f32 %v2478_v38, %v11318_v57  ;;  %v1836_v43 = vpop.f32.mrb[17].mxu0  ;;  %v2480_v44 = vpop.f32.mrb[17].mxu1 }
 0x203   : > { %v8228_v45 = vadd.f32 %v1836_v43, %v11321_v58  ;;  %v8260_v46 = vadd.f32 %v2480_v44, %v11324_v59  ;;  %2823 = vmatprep.mubr.f32.mxu0 %v2554_v35  ;;  %2968 = vmatprep.mubr.f32.mxu1 %v2556_v36 }
 0x204   : > { %2824 = vmatmul.mubr.f32.gmra.mrb[46].mxu0 %v2553_v39  ;;  %2969 = vmatmul.mubr.f32.gmra.mrb[46].mxu1 %v2555_v40  ;;  %v2557_v60 = vmax.f32 %v8227_v41, 0.0  ;;  %v2559_v61 = vmax.f32 %v8259_v42, 0.0 }
 0x205   : > { %v2558_v47 = vmax.f32 %v8228_v45, 0.0  ;;  %v2560_v48 = vmax.f32 %v8260_v46, 0.0  ;;  %v1840_v49 = vpop.f32.mrb[18].mxu0  ;;  %v2484_v53 = vpop.f32.mrb[18].mxu1 }
 0x206   : > { %v8229_v62 = vadd.f32 %v1840_v49, %v11315_v56  ;;  %v8261_v63 = vadd.f32 %v2484_v53, %v11318_v57  ;;  %v1842_v0 = vpop.f32.mrb[19].mxu0  ;;  %v2486_v1 = vpop.f32.mrb[19].mxu1 }
 0x207   : > { %v8230_v2 = vadd.f32 %v1842_v0, %v11321_v58  ;;  %v8262_v4 = vadd.f32 %v2486_v1, %v11324_v59  ;;  %2828 = vmatprep.mubr.f32.mxu0 %v2558_v47  ;;  %2973 = vmatprep.mubr.f32.mxu1 %v2560_v48 }
 0x208   : > { %2829 = vmatmul.mubr.f32.gmra.mrb[48].mxu0 %v2557_v60  ;;  %2974 = vmatmul.mubr.f32.gmra.mrb[48].mxu1 %v2559_v61  ;;  %v2561_v9 = vmax.f32 %v8229_v62, 0.0  ;;  %v2563_v10 = vmax.f32 %v8261_v63, 0.0 }
 0x209   : > { %v2562_v5 = vmax.f32 %v8230_v2, 0.0  ;;  %v2564_v6 = vmax.f32 %v8262_v4, 0.0  ;;  %v1846_v7 = vpop.f32.mrb[20].mxu0  ;;  %v2490_v8 = vpop.f32.mrb[20].mxu1 }
 0x20a   : > { %v8231_v11 = vadd.f32 %v1846_v7, %v11315_v56  ;;  %v8263_v12 = vadd.f32 %v2490_v8, %v11318_v57  ;;  %v1848_v13 = vpop.f32.mrb[21].mxu0  ;;  %v2492_v14 = vpop.f32.mrb[21].mxu1 }
 0x20b   : > { %v8232_v15 = vadd.f32 %v1848_v13, %v11321_v58  ;;  %v8264_v16 = vadd.f32 %v2492_v14, %v11324_v59  ;;  %2833 = vmatprep.mubr.f32.mxu0 %v2562_v5  ;;  %2978 = vmatprep.mubr.f32.mxu1 %v2564_v6 }
 0x20c   : > { %2834 = vmatmul.mubr.f32.gmra.mrb[50].mxu0 %v2561_v9  ;;  %2979 = vmatmul.mubr.f32.gmra.mrb[50].mxu1 %v2563_v10  ;;  %v2565_v21 = vmax.f32 %v8231_v11, 0.0  ;;  %v2567_v22 = vmax.f32 %v8263_v12, 0.0 }
 0x20d   : > { %v2566_v17 = vmax.f32 %v8232_v15, 0.0  ;;  %v2568_v18 = vmax.f32 %v8264_v16, 0.0  ;;  %v1852_v19 = vpop.f32.mrb[22].mxu0  ;;  %v2496_v20 = vpop.f32.mrb[22].mxu1 }
 0x20e   : > { %v8233_v23 = vadd.f32 %v1852_v19, %v11315_v56  ;;  %v8265_v24 = vadd.f32 %v2496_v20, %v11318_v57  ;;  %v1854_v25 = vpop.f32.mrb[23].mxu0  ;;  %v2498_v26 = vpop.f32.mrb[23].mxu1 }
 0x20f   : > { %v8234_v27 = vadd.f32 %v1854_v25, %v11321_v58  ;;  %v8266_v28 = vadd.f32 %v2498_v26, %v11324_v59  ;;  %2838 = vmatprep.mubr.f32.mxu0 %v2566_v17  ;;  %2983 = vmatprep.mubr.f32.mxu1 %v2568_v18 }
 0x210   : > { %2839 = vmatmul.mubr.f32.gmra.mrb[52].mxu0 %v2565_v21  ;;  %2984 = vmatmul.mubr.f32.gmra.mrb[52].mxu1 %v2567_v22  ;;  %v2569_v33 = vmax.f32 %v8233_v23, 0.0  ;;  %v2571_v34 = vmax.f32 %v8265_v24, 0.0 }
 0x211   : > { %v2570_v29 = vmax.f32 %v8234_v27, 0.0  ;;  %v2572_v30 = vmax.f32 %v8266_v28, 0.0  ;;  %v1858_v31 = vpop.f32.mrb[24].mxu0  ;;  %v2502_v32 = vpop.f32.mrb[24].mxu1  ;;  %v9476_v27 = vld [vmem:[%s13398_s6 + $0x44] ss:$16 sps:$4 sm:$0xff]  }
 0x212   : > { %v8235_v35 = vadd.f32 %v1858_v31, %v11315_v56  ;;  %v8267_v36 = vadd.f32 %v2502_v32, %v11318_v57  ;;  %v1860_v37 = vpop.f32.mrb[25].mxu0  ;;  %v2504_v38 = vpop.f32.mrb[25].mxu1  ;;  %v9482_v28 = vld [vmem:[%s13398_s6 + $0xc] ss:$16 sps:$4 sm:$0xff]   ;;  %v9478_v31 = vld [vmem:[%s13398_s6 + $0x40] ss:$16 sps:$4 sm:$0xff]  }
 0x213   : > { %v8236_v39 = vadd.f32 %v1860_v37, %v11321_v58  ;;  %v8268_v40 = vadd.f32 %v2504_v38, %v11324_v59  ;;  %2843 = vmatprep.mubr.f32.mxu0 %v2570_v29  ;;  %2988 = vmatprep.mubr.f32.mxu1 %v2572_v30  ;;  %v9484_v29 = vld [vmem:[%s13398_s6 + $0x8] ss:$16 sps:$4 sm:$0xff]   ;;  %v9485_v30 = vld [vmem:[%s13398_s6 + $0x2c] ss:$16 sps:$4 sm:$0xff]   ;;  %v9479_v32 = vld [vmem:[%s13398_s6 + $0x64] ss:$16 sps:$4 sm:$0xff]  }
 0x214   : > { %2844 = vmatmul.mubr.f32.gmra.mrb[54].mxu0 %v2569_v33  ;;  %2989 = vmatmul.mubr.f32.gmra.mrb[54].mxu1 %v2571_v34  ;;  %v2573_v45 = vmax.f32 %v8235_v35, 0.0  ;;  %v2575_v46 = vmax.f32 %v8267_v36, 0.0  ;;  %v9487_v33 = vld [vmem:[%s13398_s6 + $0x28] ss:$16 sps:$4 sm:$0xff]   ;;  %v9488_v34 = vld [vmem:[%s13398_s6 + $0x4c] ss:$16 sps:$4 sm:$0xff]  }
 0x215   : > { %v2574_v41 = vmax.f32 %v8236_v39, 0.0  ;;  %v2576_v42 = vmax.f32 %v8268_v40, 0.0  ;;  %v1864_v43 = vpop.f32.mrb[26].mxu0  ;;  %v2508_v44 = vpop.f32.mrb[26].mxu1  ;;  %7748 = vmatprep.subr.bf16.mxu1 %v9482_v28  ;;  %v9481_v35 = vld [vmem:[%s13398_s6 + $0x60] ss:$16 sps:$4 sm:$0xff]  }
 0x216   : > { %v8237_v47 = vadd.f32 %v1864_v43, %v11315_v56  ;;  %v8269_v48 = vadd.f32 %v2508_v44, %v11318_v57  ;;  %v1866_v49 = vpop.f32.mrb[27].mxu0  ;;  %v2510_v53 = vpop.f32.mrb[27].mxu1  ;;  %7750 = vmatpush1.bf16.msra.mxu1 %v9484_v29  ;;  %v9490_v36 = vld [vmem:[%s13398_s6 + $0x48] ss:$16 sps:$4 sm:$0xff]   ;;  %v11437_v39 = vld [vmem:[%s13397_s5] ss:$0 sm:$0xff] }
 0x217   : > { %v8238_v60 = vadd.f32 %v1866_v49, %v11321_v58  ;;  %v8270_v61 = vadd.f32 %v2510_v53, %v11324_v59  ;;  %2848 = vmatprep.mubr.f32.mxu0 %v2574_v41  ;;  %2993 = vmatprep.mubr.f32.mxu1 %v2576_v42 }
 0x218   : > { %2849 = vmatmul.mubr.f32.gmra.mrb[56].mxu0 %v2573_v45  ;;  %2994 = vmatmul.mubr.f32.gmra.mrb[56].mxu1 %v2575_v46  ;;  %v2577_v2 = vmax.f32 %v8237_v47, 0.0  ;;  %v2579_v4 = vmax.f32 %v8269_v48, 0.0 }
 0x219   : > { %v2578_v62 = vmax.f32 %v8238_v60, 0.0  ;;  %v2580_v63 = vmax.f32 %v8270_v61, 0.0  ;;  %v1870_v0 = vpop.f32.mrb[28].mxu0  ;;  %v2514_v1 = vpop.f32.mrb[28].mxu1  ;;  %7752 = vmatprep.subr.bf16.mxu1 %v9485_v30 }
 0x21a   : > { %v8239_v5 = vadd.f32 %v1870_v0, %v11315_v56  ;;  %v8271_v6 = vadd.f32 %v2514_v1, %v11318_v57  ;;  %v1872_v7 = vpop.f32.mrb[29].mxu0  ;;  %v2516_v8 = vpop.f32.mrb[29].mxu1  ;;  %7754 = vmatpush1.bf16.msra.mxu1 %v9487_v33  ;;  %v9491_v1 = vld [vmem:[%s13398_s6 + $0x6c] ss:$16 sps:$4 sm:$0xff]  }
 0x21b   : > { %v8240_v9 = vadd.f32 %v1872_v7, %v11321_v58  ;;  %v8272_v10 = vadd.f32 %v2516_v8, %v11324_v59  ;;  %2853 = vmatprep.mubr.f32.mxu0 %v2578_v62  ;;  %2998 = vmatprep.mubr.f32.mxu1 %v2580_v63 }
 0x21c   : > { %2854 = vmatmul.mubr.f32.gmra.mrb[58].mxu0 %v2577_v2  ;;  %2999 = vmatmul.mubr.f32.gmra.mrb[58].mxu1 %v2579_v4  ;;  %v2581_v15 = vmax.f32 %v8239_v5, 0.0  ;;  %v2583_v16 = vmax.f32 %v8271_v6, 0.0  ;;  %v9493_v5 = vld [vmem:[%s13398_s6 + $0x68] ss:$16 sps:$4 sm:$0xff]  }
 0x21d   : > { %v2582_v11 = vmax.f32 %v8240_v9, 0.0  ;;  %v2584_v12 = vmax.f32 %v8272_v10, 0.0  ;;  %v1876_v13 = vpop.f32.mrb[30].mxu0  ;;  %v2520_v14 = vpop.f32.mrb[30].mxu1  ;;  %7756 = vmatprep.subr.bf16.mxu1 %v9488_v34 }
 0x21e   : > { %v8241_v17 = vadd.f32 %v1876_v13, %v11315_v56  ;;  %v8273_v18 = vadd.f32 %v2520_v14, %v11318_v57  ;;  %v1878_v19 = vpop.f32.mrb[31].mxu0  ;;  %v2522_v20 = vpop.f32.mrb[31].mxu1  ;;  %v9470_v56 = vld [vmem:[%s13398_s6 + $0x4] ss:$16 sps:$4 sm:$0xff]   ;;  %v9472_v57 = vld [vmem:[%s13398_s6] ss:$16 sps:$4 sm:$0xff]   ;;  %7758 = vmatpush1.bf16.msra.mxu1 %v9490_v36 }
 0x21f   : > { %v8242_v21 = vadd.f32 %v1878_v19, %v11321_v58  ;;  %v8274_v22 = vadd.f32 %v2522_v20, %v11324_v59  ;;  %2858 = vmatprep.mubr.f32.mxu0 %v2582_v11  ;;  %3003 = vmatprep.mubr.f32.mxu1 %v2584_v12  ;;  %v9473_v58 = vld [vmem:[%s13398_s6 + $0x24] ss:$16 sps:$4 sm:$0xff]   ;;  %v9475_v59 = vld [vmem:[%s13398_s6 + $0x20] ss:$16 sps:$4 sm:$0xff]  }
 0x220   : > { %2859 = vmatmul.mubr.f32.gmra.mrb[60].mxu0 %v2581_v15  ;;  %3004 = vmatmul.mubr.f32.gmra.mrb[60].mxu1 %v2583_v16  ;;  %v2585_v25 = vmax.f32 %v8241_v17, 0.0  ;;  %v2587_v26 = vmax.f32 %v8273_v18, 0.0 }
 0x221   : > { %v2586_v23 = vmax.f32 %v8242_v21, 0.0  ;;  %v2588_v24 = vmax.f32 %v8274_v22, 0.0  ;;  %7732 = vmatprep.subr.bf16.mxu0 %v9470_v56  ;;  %7760 = vmatprep.subr.bf16.mxu1 %v9491_v1 }
 0x222   : > { %7734 = vmatpush1.bf16.msra.mxu0 %v9472_v57  ;;  %7762 = vmatpush1.bf16.msra.mxu1 %v9493_v5 }
 0x223   : > { %2863 = vmatprep.mubr.f32.mxu0 %v2586_v23  ;;  %3008 = vmatprep.mubr.f32.mxu1 %v2588_v24 }
 0x224   : > { %2864 = vmatmul.mubr.f32.gmra.mrb[62].mxu0 %v2585_v25  ;;  %3009 = vmatmul.mubr.f32.gmra.mrb[62].mxu1 %v2587_v26 }
 0x225   : > { %3373 = vmatprep.mubr.f32.mxu0 %v10303_v3  ;;  %3534 = vmatprep.mubr.f32.mxu1 %v10303_v3 }
 0x226   : > { %7736 = vmatprep.subr.bf16.mxu0 %v9473_v58 }
 0x227   : > { %7738 = vmatpush1.bf16.msra.mxu0 %v9475_v59 }
 0x228   : > { %7740 = vmatprep.subr.bf16.mxu0 %v9476_v27 }
 0x22b   : > { %7742 = vmatpush1.bf16.msra.mxu0 %v9478_v31 }
 0x22c   : > { %7744 = vmatprep.subr.bf16.mxu0 %v9479_v32 }
 0x22f   : > { %7746 = vmatpush1.bf16.msra.mxu0 %v9481_v35 }
 0x2bb   : > { %v6931_v37 = vpop.f32.mrb[32].mxu0  ;;  %v7011_v38 = vpop.f32.mrb[32].mxu1 }
 0x2bc   : > { %v6932_v40 = vpop.f32.mrb[33].mxu0  ;;  %v7012_v41 = vpop.f32.mrb[33].mxu1 }
 0x2bd   : > { %v6933_v42 = vadd.f32 %v6932_v40, %v6931_v37  ;;  %v7013_v43 = vadd.f32 %v7012_v41, %v7011_v38 }
 0x2bf   : > { %v2791_v44 = vadd.f32 %v6933_v42, %v11437_v39  ;;  %v6934_v45 = vpop.f32.mrb[34].mxu0  ;;  %v7014_v46 = vpop.f32.mrb[34].mxu1 }
 0x2c0   : > { %v6935_v47 = vpop.f32.mrb[35].mxu0  ;;  %v7015_v48 = vpop.f32.mrb[35].mxu1 }
 0x2c1   : > { %v11448_v49 = vadd.f32 %v7013_v43, %v2791_v44  ;;  %v6936_v53 = vadd.f32 %v6935_v47, %v6934_v45  ;;  %v7016_v60 = vadd.f32 %v7015_v48, %v7014_v46 }
 0x2c3   : > { %3014 = vst [vmem:[%s11446_s15] sm:$0xff] %v11448_v49  ;;  %v3046_v61 = vmul.f32 0.5, %v11448_v49  ;;  %v2796_v62 = vadd.f32 %v6936_v53, %v11437_v39  ;;  %v6937_v63 = vpop.f32.mrb[36].mxu0  ;;  %v7017_v0 = vpop.f32.mrb[36].mxu1 }
 0x2c4   : > { %v6938_v2 = vpop.f32.mrb[37].mxu0  ;;  %v7018_v4 = vpop.f32.mrb[37].mxu1 }
 0x2c5   : > { %v3062_v6 = vmul.f32 1.442695, %v3046_v61  ;;  %v11460_v7 = vadd.f32 %v7016_v60, %v2796_v62  ;;  %v6939_v8 = vadd.f32 %v6938_v2, %v6937_v63  ;;  %v7019_v9 = vadd.f32 %v7018_v4, %v7017_v0 }
 0x2c7   : > { %9814 = vpow2.f32 %v3062_v6  ;;  %3015 = vst [vmem:[%s11446_s15 + $0x8] sm:$0xff] %v11460_v7  ;;  %v3047_v10 = vmul.f32 0.5, %v11460_v7  ;;  %v2801_v11 = vadd.f32 %v6939_v8, %v11437_v39  ;;  %v6940_v12 = vpop.f32.mrb[38].mxu0  ;;  %v7020_v13 = vpop.f32.mrb[38].mxu1 }
 0x2c8   : > { %v6941_v14 = vpop.f32.mrb[39].mxu0  ;;  %v7021_v15 = vpop.f32.mrb[39].mxu1 }
 0x2c9   : > { %v3064_v16 = vmul.f32 1.442695, %v3047_v10  ;;  %v11466_v17 = vadd.f32 %v7019_v9, %v2801_v11  ;;  %v6942_v18 = vadd.f32 %v6941_v14, %v6940_v12  ;;  %v7022_v19 = vadd.f32 %v7021_v15, %v7020_v13 }
 0x2cb   : > { %9816 = vpow2.f32 %v3064_v16  ;;  %3016 = vst [vmem:[%s11446_s15 + $0x10] sm:$0xff] %v11466_v17  ;;  %v3048_v20 = vmul.f32 0.5, %v11466_v17  ;;  %v2806_v21 = vadd.f32 %v6942_v18, %v11437_v39  ;;  %v6943_v22 = vpop.f32.mrb[40].mxu0  ;;  %v7023_v23 = vpop.f32.mrb[40].mxu1 }
 0x2cc   : > { %v6944_v24 = vpop.f32.mrb[41].mxu0  ;;  %v7024_v25 = vpop.f32.mrb[41].mxu1 }
 0x2cd   : > { %v3066_v26 = vmul.f32 1.442695, %v3048_v20  ;;  %v11472_v56 = vadd.f32 %v7022_v19, %v2806_v21  ;;  %v6945_v57 = vadd.f32 %v6944_v24, %v6943_v22  ;;  %v7025_v58 = vadd.f32 %v7024_v25, %v7023_v23 }
 0x2cf   : > { %9818 = vpow2.f32 %v3066_v26  ;;  %3017 = vst [vmem:[%s11446_s15 + $0x18] sm:$0xff] %v11472_v56  ;;  %v3049_v59 = vmul.f32 0.5, %v11472_v56  ;;  %v2811_v27 = vadd.f32 %v6945_v57, %v11437_v39  ;;  %v6946_v28 = vpop.f32.mrb[42].mxu0  ;;  %v7026_v29 = vpop.f32.mrb[42].mxu1 }
 0x2d0   : > { %v6947_v30 = vpop.f32.mrb[43].mxu0  ;;  %v7027_v31 = vpop.f32.mrb[43].mxu1 }
 0x2d1   : > { %v9815_v32 = vpop.eup %9814  ;;  %v3068_v33 = vmul.f32 1.442695, %v3049_v59  ;;  %v11478_v34 = vadd.f32 %v7025_v58, %v2811_v27  ;;  %v6948_v35 = vadd.f32 %v6947_v30, %v6946_v28  ;;  %v7028_v36 = vadd.f32 %v7027_v31, %v7026_v29 }
 0x2d2   : > { %3110 = vrot.lane.b32.xlu0 %v9815_v32, %s10304_s21 }
 0x2d3   : > { %9820 = vpow2.f32 %v3068_v33  ;;  %3018 = vst [vmem:[%s11446_s15 + $0x20] sm:$0xff] %v11478_v34  ;;  %v3050_v37 = vmul.f32 0.5, %v11478_v34  ;;  %v2816_v38 = vadd.f32 %v6948_v35, %v11437_v39  ;;  %v6949_v40 = vpop.f32.mrb[44].mxu0  ;;  %v7029_v41 = vpop.f32.mrb[44].mxu1 }
 0x2d4   : > { %v6950_v42 = vpop.f32.mrb[45].mxu0  ;;  %v7030_v43 = vpop.f32.mrb[45].mxu1 }
 0x2d5   : > { %v9817_v44 = vpop.eup %9816  ;;  %v3070_v45 = vmul.f32 1.442695, %v3050_v37  ;;  %v11485_v46 = vadd.f32 %v7028_v36, %v2816_v38  ;;  %v6951_v47 = vadd.f32 %v6950_v42, %v6949_v40  ;;  %v7031_v48 = vadd.f32 %v7030_v43, %v7029_v41 }
 0x2d6   : > { %3112 = vrot.lane.b32.xlu0 %v9817_v44, %s10304_s21 }
 0x2d7   : > { %9822 = vpow2.f32 %v3070_v45  ;;  %3019 = vst [vmem:[%s11446_s15 + $0x28] sm:$0xff] %v11485_v46  ;;  %v3051_v53 = vmul.f32 0.5, %v11485_v46  ;;  %v2821_v60 = vadd.f32 %v6951_v47, %v11437_v39  ;;  %v6952_v61 = vpop.f32.mrb[46].mxu0  ;;  %v7032_v62 = vpop.f32.mrb[46].mxu1 }
 0x2d8   : > { %v6953_v63 = vpop.f32.mrb[47].mxu0  ;;  %v7033_v0 = vpop.f32.mrb[47].mxu1 }
 0x2d9   : > { %v9819_v1 = vpop.eup %9818  ;;  %v3072_v2 = vmul.f32 1.442695, %v3051_v53  ;;  %v11492_v4 = vadd.f32 %v7031_v48, %v2821_v60  ;;  %v6954_v5 = vadd.f32 %v6953_v63, %v6952_v61  ;;  %v7034_v6 = vadd.f32 %v7033_v0, %v7032_v62 }
 0x2da   : > { %3114 = vrot.lane.b32.xlu1 %v9819_v1, %s10304_s21 }
 0x2db   : > { %9824 = vpow2.f32 %v3072_v2  ;;  %3020 = vst [vmem:[%s11446_s15 + $0x30] sm:$0xff] %v11492_v4  ;;  %v3052_v8 = vmul.f32 0.5, %v11492_v4  ;;  %v2826_v9 = vadd.f32 %v6954_v5, %v11437_v39  ;;  %v6955_v10 = vpop.f32.mrb[48].mxu0  ;;  %v7035_v11 = vpop.f32.mrb[48].mxu1 }
 0x2dc   : > { %v6956_v12 = vpop.f32.mrb[49].mxu0  ;;  %v7036_v13 = vpop.f32.mrb[49].mxu1 }
 0x2dd   : > { %v9821_v14 = vpop.eup %9820  ;;  %v3074_v15 = vmul.f32 1.442695, %v3052_v8  ;;  %v11499_v16 = vadd.f32 %v7034_v6, %v2826_v9  ;;  %v6957_v18 = vadd.f32 %v6956_v12, %v6955_v10  ;;  %v7037_v19 = vadd.f32 %v7036_v13, %v7035_v11 }
 0x2de   : > { %3116 = vrot.lane.b32.xlu1 %v9821_v14, %s10304_s21 }
 0x2df   : > { %9826 = vpow2.f32 %v3074_v15  ;;  %3021 = vst [vmem:[%s11446_s15 + $0x38] sm:$0xff] %v11499_v16  ;;  %v3053_v20 = vmul.f32 0.5, %v11499_v16  ;;  %v2831_v21 = vadd.f32 %v6957_v18, %v11437_v39  ;;  %v6958_v22 = vpop.f32.mrb[50].mxu0  ;;  %v7038_v23 = vpop.f32.mrb[50].mxu1 }
 0x2e0   : > { %v6959_v24 = vpop.f32.mrb[51].mxu0  ;;  %v7039_v25 = vpop.f32.mrb[51].mxu1 }
 0x2e1   : > { %v9823_v26 = vpop.eup %9822  ;;  %v3076_v57 = vmul.f32 1.442695, %v3053_v20  ;;  %v11506_v58 = vadd.f32 %v7037_v19, %v2831_v21  ;;  %v6960_v59 = vadd.f32 %v6959_v24, %v6958_v22  ;;  %v7040_v27 = vadd.f32 %v7039_v25, %v7038_v23 }
 0x2e2   : > { %3118 = vrot.lane.b32.xlu0 %v9823_v26, %s10304_s21 }
 0x2e3   : > { %9828 = vpow2.f32 %v3076_v57  ;;  %3022 = vst [vmem:[%s11446_s15 + $0x40] sm:$0xff] %v11506_v58  ;;  %v3054_v28 = vmul.f32 0.5, %v11506_v58  ;;  %v2836_v29 = vadd.f32 %v6960_v59, %v11437_v39  ;;  %v6961_v30 = vpop.f32.mrb[52].mxu0  ;;  %v7041_v31 = vpop.f32.mrb[52].mxu1 }
 0x2e4   : > { %v6962_v32 = vpop.f32.mrb[53].mxu0  ;;  %v7042_v33 = vpop.f32.mrb[53].mxu1 }
 0x2e5   : > { %v9825_v35 = vpop.eup %9824  ;;  %v3078_v36 = vmul.f32 1.442695, %v3054_v28  ;;  %v11513_v37 = vadd.f32 %v7040_v27, %v2836_v29  ;;  %v6963_v38 = vadd.f32 %v6962_v32, %v6961_v30  ;;  %v7043_v40 = vadd.f32 %v7042_v33, %v7041_v31 }
 0x2e6   : > { %3120 = vrot.lane.b32.xlu1 %v9825_v35, %s10304_s21 }
 0x2e7   : > { %9830 = vpow2.f32 %v3078_v36  ;;  %3023 = vst [vmem:[%s11446_s15 + $0x48] sm:$0xff] %v11513_v37  ;;  %v3055_v41 = vmul.f32 0.5, %v11513_v37  ;;  %v2841_v42 = vadd.f32 %v6963_v38, %v11437_v39  ;;  %v6964_v43 = vpop.f32.mrb[54].mxu0  ;;  %v7044_v44 = vpop.f32.mrb[54].mxu1 }
 0x2e8   : > { %v6965_v45 = vpop.f32.mrb[55].mxu0  ;;  %v7045_v47 = vpop.f32.mrb[55].mxu1 }
 0x2e9   : > { %v9827_v48 = vpop.eup %9826  ;;  %v3080_v53 = vmul.f32 1.442695, %v3055_v41  ;;  %v11520_v60 = vadd.f32 %v7043_v40, %v2841_v42  ;;  %v6966_v61 = vadd.f32 %v6965_v45, %v6964_v43  ;;  %v7046_v62 = vadd.f32 %v7045_v47, %v7044_v44 }
 0x2ea   : > { %3122 = vrot.lane.b32.xlu0 %v9827_v48, %s10304_s21 }
 0x2eb   : > { %9832 = vpow2.f32 %v3080_v53  ;;  %3024 = vst [vmem:[%s11446_s15 + $0x50] sm:$0xff] %v11520_v60  ;;  %v3056_v63 = vmul.f32 0.5, %v11520_v60  ;;  %v2846_v0 = vadd.f32 %v6966_v61, %v11437_v39  ;;  %v6967_v1 = vpop.f32.mrb[56].mxu0  ;;  %v7047_v2 = vpop.f32.mrb[56].mxu1 }
 0x2ec   : > { %v6968_v5 = vpop.f32.mrb[57].mxu0  ;;  %v7048_v6 = vpop.f32.mrb[57].mxu1 }
 0x2ed   : > { %v9829_v8 = vpop.eup %9828  ;;  %v3082_v9 = vmul.f32 1.442695, %v3056_v63  ;;  %v11527_v10 = vadd.f32 %v7046_v62, %v2846_v0  ;;  %v6969_v11 = vadd.f32 %v6968_v5, %v6967_v1  ;;  %v7049_v12 = vadd.f32 %v7048_v6, %v7047_v2 }
 0x2ee   : > { %3124 = vrot.lane.b32.xlu1 %v9829_v8, %s10304_s21 }
 0x2ef   : > { %9834 = vpow2.f32 %v3082_v9  ;;  %3025 = vst [vmem:[%s11446_s15 + $0x58] sm:$0xff] %v11527_v10  ;;  %v3057_v13 = vmul.f32 0.5, %v11527_v10  ;;  %v2851_v14 = vadd.f32 %v6969_v11, %v11437_v39  ;;  %v6970_v15 = vpop.f32.mrb[58].mxu0  ;;  %v7050_v18 = vpop.f32.mrb[58].mxu1  ;;  %v9497_v9 = vld [vmem:[%s13400_s8 + $0xc] ss:$28 sps:$4 sm:$0xff]  }
 0x2f0   : > { %v6971_v19 = vpop.f32.mrb[59].mxu0  ;;  %v7051_v20 = vpop.f32.mrb[59].mxu1  ;;  %7892 = vmatprep.subr.bf16.mxu1 %v9497_v9 }
 0x2f1   : > { %v9831_v21 = vpop.eup %9830  ;;  %v3084_v22 = vmul.f32 1.442695, %v3057_v13  ;;  %v11534_v23 = vadd.f32 %v7049_v12, %v2851_v14  ;;  %v6972_v24 = vadd.f32 %v6971_v19, %v6970_v15  ;;  %v7052_v25 = vadd.f32 %v7051_v20, %v7050_v18  ;;  %v3030_v13 = vld [vmem:[%s11576_s12] sm:$0xff]  ;;  %v3031_v18 = vld [vmem:[%s11576_s12 + $0x8] sm:$0xff] }
 0x2f2   : > { %3126 = vrot.lane.b32.xlu0 %v9831_v21, %s10304_s21  ;;  %v9496_v20 = vld [vmem:[%s13400_s8] ss:$28 sps:$4 sm:$0xff]   ;;  %v9499_v21 = vld [vmem:[%s13400_s8 + $0x8] ss:$28 sps:$4 sm:$0xff]  }
 0x2f3   : > { %9836 = vpow2.f32 %v3084_v22  ;;  %3026 = vst [vmem:[%s11446_s15 + $0x60] sm:$0xff] %v11534_v23  ;;  %v3058_v26 = vmul.f32 0.5, %v11534_v23  ;;  %v2856_v57 = vadd.f32 %v6972_v24, %v11437_v39  ;;  %v6973_v59 = vpop.f32.mrb[60].mxu0  ;;  %v7053_v27 = vpop.f32.mrb[60].mxu1  ;;  %v9500_v24 = vld [vmem:[%s13400_s8 + $0x3c] ss:$28 sps:$4 sm:$0xff]  }
 0x2f4   : > { %v6974_v28 = vpop.f32.mrb[61].mxu0  ;;  %v7054_v29 = vpop.f32.mrb[61].mxu1 }
 0x2f5   : > { %v9833_v30 = vpop.eup %9832  ;;  %v3086_v31 = vmul.f32 1.442695, %v3058_v26  ;;  %v11541_v32 = vadd.f32 %v7052_v25, %v2856_v57  ;;  %v6975_v33 = vadd.f32 %v6974_v28, %v6973_v59  ;;  %v7055_v35 = vadd.f32 %v7054_v29, %v7053_v27  ;;  %v9503_v25 = vld [vmem:[%s13400_s8 + $0x44] ss:$28 sps:$4 sm:$0xff]   ;;  %v9502_v59 = vld [vmem:[%s13400_s8 + $0x38] ss:$28 sps:$4 sm:$0xff]  }
 0x2f6   : > { %3128 = vrot.lane.b32.xlu1 %v9833_v30, %s10304_s21  ;;  %v9505_v27 = vld [vmem:[%s13400_s8 + $0x40] ss:$28 sps:$4 sm:$0xff]   ;;  %v9506_v29 = vld [vmem:[%s13400_s8 + $0x74] ss:$28 sps:$4 sm:$0xff]  }
 0x2f7   : > { %9838 = vpow2.f32 %v3086_v31  ;;  %3027 = vst [vmem:[%s11446_s15 + $0x68] sm:$0xff] %v11541_v32  ;;  %v3059_v36 = vmul.f32 0.5, %v11541_v32  ;;  %v2861_v38 = vadd.f32 %v6975_v33, %v11437_v39  ;;  %v6976_v40 = vpop.f32.mrb[62].mxu0  ;;  %v7056_v41 = vpop.f32.mrb[62].mxu1  ;;  %v3033_v31 = vld [vmem:[%s11576_s12 + $0x18] sm:$0xff] }
 0x2f8   : > { %v6977_v42 = vpop.f32.mrb[63].mxu0  ;;  %v7057_v43 = vpop.f32.mrb[63].mxu1 }
 0x2f9   : > { %v9835_v44 = vpop.eup %9834  ;;  %v3088_v45 = vmul.f32 1.442695, %v3059_v36  ;;  %v11548_v47 = vadd.f32 %v7055_v35, %v2861_v38  ;;  %v6978_v48 = vadd.f32 %v6977_v42, %v6976_v40  ;;  %v7058_v53 = vadd.f32 %v7057_v43, %v7056_v41  ;;  %v9508_v35 = vld [vmem:[%s13400_s8 + $0x70] ss:$28 sps:$4 sm:$0xff]   ;;  %v9511_v36 = vld [vmem:[%s13400_s8 + $0x78] ss:$28 sps:$4 sm:$0xff]  }
 0x2fa   : > { %3130 = vrot.lane.b32.xlu0 %v9835_v44, %s10304_s21  ;;  %v9512_v40 = vld [vmem:[%s13400_s8 + $0xac] ss:$28 sps:$4 sm:$0xff]   ;;  %v3034_v42 = vld [vmem:[%s11576_s12 + $0x20] sm:$0xff] }
 0x2fb   : > { %9840 = vpow2.f32 %v3088_v45  ;;  %3028 = vst [vmem:[%s11446_s15 + $0x70] sm:$0xff] %v11548_v47  ;;  %v3060_v61 = vmul.f32 0.5, %v11548_v47  ;;  %v2866_v62 = vadd.f32 %v6978_v48, %v11437_v39  ;;  %v9494_v39 = vld [vmem:[%s13400_s8 + $0x4] ss:$28 sps:$4 sm:$0xff]   ;;  %v9517_v45 = vld [vmem:[%s13400_s8 + $0xb0] ss:$28 sps:$4 sm:$0xff]  }
 0x2fc   : > { %7764 = vmatprep.subr.bf16.mxu0 %v9494_v39  ;;  %v9514_v44 = vld [vmem:[%s13400_s8 + $0xa8] ss:$28 sps:$4 sm:$0xff]   ;;  %v3036_v39 = vld [vmem:[%s11576_s12 + $0x30] sm:$0xff] }
 0x2fd   : > { %v9837_v63 = vpop.eup %9836  ;;  %v3090_v0 = vmul.f32 1.442695, %v3060_v61  ;;  %v11555_v1 = vadd.f32 %v7058_v53, %v2866_v62  ;;  %v9518_v53 = vld [vmem:[%s13400_s8 + $0xe4] ss:$28 sps:$4 sm:$0xff]   ;;  %v3035_v62 = vld [vmem:[%s11576_s12 + $0x28] sm:$0xff] }
 0x2fe   : > { %3132 = vrot.lane.b32.xlu1 %v9837_v63, %s10304_s21 }
 0x2ff   : > { %9842 = vpow2.f32 %v3090_v0  ;;  %3029 = vst [vmem:[%s11446_s15 + $0x78] sm:$0xff] %v11555_v1  ;;  %v3061_v2 = vmul.f32 0.5, %v11555_v1  ;;  %v9520_v0 = vld [vmem:[%s13400_s8 + $0xe0] ss:$28 sps:$4 sm:$0xff]  }
 0x301   : > { %v9839_v5 = vpop.eup %9838  ;;  %v3092_v6 = vmul.f32 1.442695, %v3061_v2  ;;  %v9523_v2 = vld [vmem:[%s13400_s8 + $0xe8] ss:$28 sps:$4 sm:$0xff]  }
 0x302   : > { %3134 = vrot.lane.b32.xlu0 %v9839_v5, %s10304_s21 }
 0x303   : > { %9844 = vpow2.f32 %v3092_v6  ;;  %v9524_v6 = vld [vmem:[%s13400_s8 + $0x11c] ss:$28 sps:$4 sm:$0xff]  }
 0x305   : > { %v9841_v8 = vpop.eup %9840 }
 0x306   : > { %3136 = vrot.lane.b32.xlu1 %v9841_v8, %s10304_s21 }
 0x309   : > { %v9843_v11 = vpop.eup %9842 }
 0x30a   : > { %3138 = vrot.lane.b32.xlu0 %v9843_v11, %s10304_s21  ;;  %v9526_v11 = vld [vmem:[%s13400_s8 + $0x118] ss:$28 sps:$4 sm:$0xff]  }
 0x30d   : > { %v9845_v12 = vpop.eup %9844 }
 0x30e   : > { %3140 = vrot.lane.b32.xlu1 %v9845_v12, %s10304_s21  ;;  %v9529_v12 = vld [vmem:[%s13400_s8 + $0x120] ss:$28 sps:$4 sm:$0xff]  }
 0x344   : > { %v3111_v14 = vpop.permute.xlu0 %3110 }
 0x345   : > { %v3158_v15 = vmul.f32 %v3111_v14, %v3030_v13  ;;  %v9530_v14 = vld [vmem:[%s13400_s8 + $0x154] ss:$28 sps:$4 sm:$0xff]  }
 0x347   : > { %v3174_v19 = vadd.f32 %v3158_v15, %v11448_v49  ;;  %v3032_v49 = vld [vmem:[%s11576_s12 + $0x10] sm:$0xff] }
 0x348   : > { %v3113_v22 = vpop.permute.xlu0 %3112 }
 0x349   : > { %v3159_v26 = vmul.f32 %v3113_v22, %v3031_v18  ;;  %6594 = vmatmul.mubr.msk.f32.vlgmr.msra.gmra.mrb[64].mxu0 %vm3260_vm0, %v3174_v19  ;;  %6610 = vmatmul.mubr.msk.f32.vlgmr.msra.gmra.mrb[64].mxu1 %vm3260_vm0, %v3174_v19  ;;  %v3037_v18 = vld [vmem:[%s11576_s12 + $0x38] sm:$0xff] }
 0x34a   : > { %3379 = vmatprep.mubr.f32.mxu0 %v10303_v3  ;;  %3540 = vmatprep.mubr.f32.mxu1 %v10303_v3 }
 0x34b   : > { %v3175_v57 = vadd.f32 %v3159_v26, %v11460_v7  ;;  %7766 = vmatpush1.bf16.msra.mxu0 %v9496_v20  ;;  %7894 = vmatpush1.bf16.msra.mxu1 %v9499_v21  ;;  %v9509_v7 = vld [vmem:[%s13400_s8 + $0x7c] ss:$28 sps:$4 sm:$0xff]   ;;  %v9532_v20 = vld [vmem:[%s13400_s8 + $0x150] ss:$28 sps:$4 sm:$0xff]   ;;  %v3038_v26 = vld [vmem:[%s11576_s12 + $0x40] sm:$0xff] }
 0x34c   : > { %v3115_v28 = vpop.permute.xlu1 %3114  ;;  %7768 = vmatprep.subr.bf16.mxu0 %v9500_v24  ;;  %7896 = vmatprep.subr.bf16.mxu1 %v9503_v25  ;;  %v9535_v21 = vld [vmem:[%s13400_s8 + $0x158] ss:$28 sps:$4 sm:$0xff]   ;;  %v9536_v24 = vld [vmem:[%s13400_s8 + $0x18c] ss:$28 sps:$4 sm:$0xff]  }
 0x34d   : > { %v3160_v30 = vmul.f32 %v3115_v28, %v3032_v49  ;;  %6595 = vmatmul.mubr.msk.f32.gmra.mrb[66].mxu0 %vm3260_vm0, %v3175_v57  ;;  %6611 = vmatmul.mubr.msk.f32.gmra.mrb[66].mxu1 %vm3260_vm0, %v3175_v57  ;;  %v9538_v57 = vld [vmem:[%s13400_s8 + $0x188] ss:$28 sps:$4 sm:$0xff]  }
 0x34e   : > { %3385 = vmatprep.mubr.f32.mxu0 %v10303_v3  ;;  %3546 = vmatprep.mubr.f32.mxu1 %v10303_v3  ;;  %v9542_v28 = vld [vmem:[%s13400_s8 + $0x1c4] ss:$28 sps:$4 sm:$0xff]  }
 0x34f   : > { %v3176_v33 = vadd.f32 %v3160_v30, %v11466_v17  ;;  %7770 = vmatpush1.bf16.msra.mxu0 %v9502_v59  ;;  %7898 = vmatpush1.bf16.msra.mxu1 %v9505_v27  ;;  %v9515_v17 = vld [vmem:[%s13400_s8 + $0xb4] ss:$28 sps:$4 sm:$0xff]  }
 0x350   : > { %v3117_v38 = vpop.permute.xlu1 %3116  ;;  %7772 = vmatprep.subr.bf16.mxu0 %v9506_v29  ;;  %7900 = vmatprep.subr.bf16.mxu1 %v9509_v7  ;;  %v9541_v59 = vld [vmem:[%s13400_s8 + $0x190] ss:$28 sps:$4 sm:$0xff]  }
 0x351   : > { %v3161_v41 = vmul.f32 %v3117_v38, %v3033_v31  ;;  %6596 = vmatmul.mubr.msk.f32.gmra.mrb[68].mxu0 %vm3260_vm0, %v3176_v33  ;;  %6612 = vmatmul.mubr.msk.f32.gmra.mrb[68].mxu1 %vm3260_vm0, %v3176_v33  ;;  %v3039_v7 = vld [vmem:[%s11576_s12 + $0x48] sm:$0xff]  ;;  %v9544_v31 = vld [vmem:[%s13400_s8 + $0x1c0] ss:$28 sps:$4 sm:$0xff]  }
 0x352   : > { %3391 = vmatprep.mubr.f32.mxu0 %v10303_v3  ;;  %3552 = vmatprep.mubr.f32.mxu1 %v10303_v3  ;;  %v9547_v33 = vld [vmem:[%s13400_s8 + $0x1c8] ss:$28 sps:$4 sm:$0xff]  }
 0x353   : > { %v3177_v43 = vadd.f32 %v3161_v41, %v11472_v56  ;;  %7774 = vmatpush1.bf16.msra.mxu0 %v9508_v35  ;;  %7902 = vmatpush1.bf16.msra.mxu1 %v9511_v36  ;;  %v9521_v56 = vld [vmem:[%s13400_s8 + $0xec] ss:$28 sps:$4 sm:$0xff]   ;;  %v9548_v36 = vld [vmem:[%s13400_s8 + $0x1fc] ss:$28 sps:$4 sm:$0xff]  }
 0x354   : > { %v3119_v48 = vpop.permute.xlu0 %3118  ;;  %7776 = vmatprep.subr.bf16.mxu0 %v9512_v40  ;;  %7904 = vmatprep.subr.bf16.mxu1 %v9515_v17  ;;  %v3040_v40 = vld [vmem:[%s11576_s12 + $0x50] sm:$0xff] }
 0x355   : > { %v3162_v61 = vmul.f32 %v3119_v48, %v3034_v42  ;;  %6597 = vmatmul.mubr.msk.f32.gmra.mrb[70].mxu0 %vm3260_vm0, %v3177_v43  ;;  %6613 = vmatmul.mubr.msk.f32.gmra.mrb[70].mxu1 %vm3260_vm0, %v3177_v43  ;;  %v9550_v41 = vld [vmem:[%s13400_s8 + $0x1f8] ss:$28 sps:$4 sm:$0xff]   ;;  %v9553_v42 = vld [vmem:[%s13400_s8 + $0x200] ss:$28 sps:$4 sm:$0xff]  }
 0x356   : > { %3397 = vmatprep.mubr.f32.mxu0 %v10303_v3  ;;  %3558 = vmatprep.mubr.f32.mxu1 %v10303_v3  ;;  %v3041_v48 = vld [vmem:[%s11576_s12 + $0x58] sm:$0xff] }
 0x357   : > { %v3178_v63 = vadd.f32 %v3162_v61, %v11478_v34  ;;  %7778 = vmatpush1.bf16.msra.mxu0 %v9514_v44  ;;  %7906 = vmatpush1.bf16.msra.mxu1 %v9517_v45  ;;  %v9527_v34 = vld [vmem:[%s13400_s8 + $0x124] ss:$28 sps:$4 sm:$0xff]   ;;  %v9554_v44 = vld [vmem:[%s13400_s8 + $0x234] ss:$28 sps:$4 sm:$0xff]  }
 0x358   : > { %v3121_v5 = vpop.permute.xlu1 %3120  ;;  %7780 = vmatprep.subr.bf16.mxu0 %v9518_v53  ;;  %7908 = vmatprep.subr.bf16.mxu1 %v9521_v56  ;;  %v9556_v56 = vld [vmem:[%s13400_s8 + $0x230] ss:$28 sps:$4 sm:$0xff]   ;;  %v9559_v61 = vld [vmem:[%s13400_s8 + $0x238] ss:$28 sps:$4 sm:$0xff]  }
 0x359   : > { %v3163_v8 = vmul.f32 %v3121_v5, %v3035_v62  ;;  %6598 = vmatmul.mubr.msk.f32.gmra.mrb[72].mxu0 %vm3260_vm0, %v3178_v63  ;;  %6614 = vmatmul.mubr.msk.f32.gmra.mrb[72].mxu1 %vm3260_vm0, %v3178_v63  ;;  %v9560_v63 = vld [vmem:[%s13400_s8 + $0x26c] ss:$28 sps:$4 sm:$0xff]  }
 0x35a   : > { %3403 = vmatprep.mubr.f32.mxu0 %v10303_v3  ;;  %3564 = vmatprep.mubr.f32.mxu1 %v10303_v3 }
 0x35b   : > { %v3179_v9 = vadd.f32 %v3163_v8, %v11485_v46  ;;  %7782 = vmatpush1.bf16.msra.mxu0 %v9520_v0  ;;  %7910 = vmatpush1.bf16.msra.mxu1 %v9523_v2  ;;  %v9533_v46 = vld [vmem:[%s13400_s8 + $0x15c] ss:$28 sps:$4 sm:$0xff]   ;;  %v3042_v2 = vld [vmem:[%s11576_s12 + $0x60] sm:$0xff] }
 0x35c   : > { %v3123_v13 = vpop.permute.xlu0 %3122  ;;  %7784 = vmatprep.subr.bf16.mxu0 %v9524_v6  ;;  %7912 = vmatprep.subr.bf16.mxu1 %v9527_v34  ;;  %v9562_v6 = vld [vmem:[%s13400_s8 + $0x268] ss:$28 sps:$4 sm:$0xff]   ;;  %v9565_v34 = vld [vmem:[%s13400_s8 + $0x270] ss:$28 sps:$4 sm:$0xff]  }
 0x35d   : > { %v3164_v15 = vmul.f32 %v3123_v13, %v3036_v39  ;;  %6599 = vmatmul.mubr.msk.f32.gmra.mrb[74].mxu0 %vm3260_vm0, %v3179_v9  ;;  %6615 = vmatmul.mubr.msk.f32.gmra.mrb[74].mxu1 %vm3260_vm0, %v3179_v9  ;;  %v9566_v39 = vld [vmem:[%s13400_s8 + $0x2a4] ss:$28 sps:$4 sm:$0xff]  }
 0x35e   : > { %3409 = vmatprep.mubr.f32.mxu0 %v10303_v3  ;;  %3570 = vmatprep.mubr.f32.mxu1 %v10303_v3  ;;  %v9568_v13 = vld [vmem:[%s13400_s8 + $0x2a0] ss:$28 sps:$4 sm:$0xff]  }
 0x35f   : > { %v3180_v19 = vadd.f32 %v3164_v15, %v11492_v4  ;;  %7786 = vmatpush1.bf16.msra.mxu0 %v9526_v11  ;;  %7914 = vmatpush1.bf16.msra.mxu1 %v9529_v12  ;;  %v9539_v4 = vld [vmem:[%s13400_s8 + $0x194] ss:$28 sps:$4 sm:$0xff]   ;;  %v3043_v11 = vld [vmem:[%s11576_s12 + $0x68] sm:$0xff]  ;;  %v9572_v15 = vld [vmem:[%s13400_s8 + $0x2dc] ss:$28 sps:$4 sm:$0xff]  }
 0x360   : > { %v3125_v22 = vpop.permute.xlu1 %3124  ;;  %7788 = vmatprep.subr.bf16.mxu0 %v9530_v14  ;;  %7916 = vmatprep.subr.bf16.mxu1 %v9533_v46  ;;  %v9571_v14 = vld [vmem:[%s13400_s8 + $0x2a8] ss:$28 sps:$4 sm:$0xff]  }
 0x361   : > { %v3165_v25 = vmul.f32 %v3125_v22, %v3037_v18  ;;  %6600 = vmatmul.mubr.msk.f32.gmra.mrb[76].mxu0 %vm3260_vm0, %v3180_v19  ;;  %6616 = vmatmul.mubr.msk.f32.gmra.mrb[76].mxu1 %vm3260_vm0, %v3180_v19  ;;  %v3044_v19 = vld [vmem:[%s11576_s12 + $0x70] sm:$0xff]  ;;  %v9577_v22 = vld [vmem:[%s13400_s8 + $0x2e0] ss:$28 sps:$4 sm:$0xff]  }
 0x362   : > { %3415 = vmatprep.mubr.f32.mxu0 %v10303_v3  ;;  %3576 = vmatprep.mubr.f32.mxu1 %v10303_v3 }
 0x363   : > { %v3181_v49 = vadd.f32 %v3165_v25, %v11499_v16  ;;  %7790 = vmatpush1.bf16.msra.mxu0 %v9532_v20  ;;  %7918 = vmatpush1.bf16.msra.mxu1 %v9535_v21  ;;  %v9545_v16 = vld [vmem:[%s13400_s8 + $0x1cc] ss:$28 sps:$4 sm:$0xff]   ;;  %v9574_v21 = vld [vmem:[%s13400_s8 + $0x2d8] ss:$28 sps:$4 sm:$0xff]  }
 0x364   : > { %v3127_v27 = vpop.permute.xlu0 %3126  ;;  %7792 = vmatprep.subr.bf16.mxu0 %v9536_v24  ;;  %7920 = vmatprep.subr.bf16.mxu1 %v9539_v4  ;;  %v9578_v4 = vld [vmem:[%s13400_s8 + $0x314] ss:$28 sps:$4 sm:$0xff]  }
 0x365   : > { %v3166_v29 = vmul.f32 %v3127_v27, %v3038_v26  ;;  %6601 = vmatmul.mubr.msk.f32.gmra.mrb[78].mxu0 %vm3260_vm0, %v3181_v49  ;;  %6617 = vmatmul.mubr.msk.f32.gmra.mrb[78].mxu1 %vm3260_vm0, %v3181_v49  ;;  %v3045_v26 = vld [vmem:[%s11576_s12 + $0x78] sm:$0xff] }
 0x366   : > { %3421 = vmatprep.mubr.f32.mxu0 %v10303_v3  ;;  %3582 = vmatprep.mubr.f32.mxu1 %v10303_v3 }
 0x367   : > { %v3182_v30 = vadd.f32 %v3166_v29, %v11506_v58  ;;  %7794 = vmatpush1.bf16.msra.mxu0 %v9538_v57  ;;  %7922 = vmatpush1.bf16.msra.mxu1 %v9541_v59  ;;  %v9551_v58 = vld [vmem:[%s13400_s8 + $0x204] ss:$28 sps:$4 sm:$0xff]   ;;  %v9580_v57 = vld [vmem:[%s13400_s8 + $0x310] ss:$28 sps:$4 sm:$0xff]   ;;  %v9583_v59 = vld [vmem:[%s13400_s8 + $0x318] ss:$28 sps:$4 sm:$0xff]  }
 0x368   : > { %v3129_v35 = vpop.permute.xlu1 %3128  ;;  %7796 = vmatprep.subr.bf16.mxu0 %v9542_v28  ;;  %7924 = vmatprep.subr.bf16.mxu1 %v9545_v16  ;;  %v9584_v16 = vld [vmem:[%s13400_s8 + $0x34c] ss:$28 sps:$4 sm:$0xff]   ;;  %v9587_v29 = vld [vmem:[%s13400_s8 + $0x354] ss:$28 sps:$4 sm:$0xff]  }
 0x369   : > { %v3167_v38 = vmul.f32 %v3129_v35, %v3039_v7  ;;  %6602 = vmatmul.mubr.msk.f32.gmra.mrb[80].mxu0 %vm3260_vm0, %v3182_v30  ;;  %6618 = vmatmul.mubr.msk.f32.gmra.mrb[80].mxu1 %vm3260_vm0, %v3182_v30  ;;  %v9590_v7 = vld [vmem:[%s13400_s8 + $0x384] ss:$28 sps:$4 sm:$0xff]   ;;  %v9593_v30 = vld [vmem:[%s13400_s8 + $0x38c] ss:$28 sps:$4 sm:$0xff]  }
 0x36a   : > { %3427 = vmatprep.mubr.f32.mxu0 %v10303_v3  ;;  %3588 = vmatprep.mubr.f32.mxu1 %v10303_v3 }
 0x36b   : > { %v3183_v17 = vadd.f32 %v3167_v38, %v11513_v37  ;;  %7798 = vmatpush1.bf16.msra.mxu0 %v9544_v31  ;;  %7926 = vmatpush1.bf16.msra.mxu1 %v9547_v33  ;;  %v9557_v37 = vld [vmem:[%s13400_s8 + $0x23c] ss:$28 sps:$4 sm:$0xff]   ;;  %v11867_v31 = vld [vmem:[%s13399_s7] sm:$0xf] }
 0x36c   : > { %v3131_v43 = vpop.permute.xlu0 %3130  ;;  %7800 = vmatprep.subr.bf16.mxu0 %v9548_v36  ;;  %7928 = vmatprep.subr.bf16.mxu1 %v9551_v58  ;;  %v11871_v33 = vrot.slane %v11867_v31, %v11300_v51  ;;  %v11875_v35 = vrot.slane %v11867_v31, %v11309_v54 }
 0x36d   : > { %v3168_v45 = vmul.f32 %v3131_v43, %v3040_v40  ;;  %6603 = vmatmul.mubr.msk.f32.gmra.mrb[82].mxu0 %vm3260_vm0, %v3183_v17  ;;  %6619 = vmatmul.mubr.msk.f32.gmra.mrb[82].mxu1 %vm3260_vm0, %v3183_v17  ;;  %v9595_v43 = vld [vmem:[%s13400_s8 + $0x388] ss:$28 sps:$4 sm:$0xff]  }
 0x36e   : > { %3433 = vmatprep.mubr.f32.mxu0 %v10303_v3  ;;  %3594 = vmatprep.mubr.f32.mxu1 %v10303_v3 }
 0x36f   : > { %v3184_v53 = vadd.f32 %v3168_v45, %v11520_v60  ;;  %7802 = vmatpush1.bf16.msra.mxu0 %v9550_v41  ;;  %7930 = vmatpush1.bf16.msra.mxu1 %v9553_v42  ;;  %v9563_v60 = vld [vmem:[%s13400_s8 + $0x274] ss:$28 sps:$4 sm:$0xff]   ;;  %v9592_v42 = vld [vmem:[%s13400_s8 + $0x380] ss:$28 sps:$4 sm:$0xff]  }
 0x370   : > { %v3133_v62 = vpop.permute.xlu1 %3132  ;;  %7804 = vmatprep.subr.bf16.mxu0 %v9554_v44  ;;  %7932 = vmatprep.subr.bf16.mxu1 %v9557_v37 }
 0x371   : > { %v3169_v0 = vmul.f32 %v3133_v62, %v3041_v48  ;;  %6604 = vmatmul.mubr.msk.f32.gmra.mrb[84].mxu0 %vm3260_vm0, %v3184_v53  ;;  %6620 = vmatmul.mubr.msk.f32.gmra.mrb[84].mxu1 %vm3260_vm0, %v3184_v53  ;;  %v9596_v48 = vld [vmem:[%s13400_s8 + $0x3bc] ss:$28 sps:$4 sm:$0xff]  }
 0x372   : > { %3439 = vmatprep.mubr.f32.mxu0 %v10303_v3  ;;  %3600 = vmatprep.mubr.f32.mxu1 %v10303_v3 }
 0x373   : > { %v3185_v5 = vadd.f32 %v3169_v0, %v11527_v10  ;;  %7806 = vmatpush1.bf16.msra.mxu0 %v9556_v56  ;;  %7934 = vmatpush1.bf16.msra.mxu1 %v9559_v61  ;;  %v9569_v10 = vld [vmem:[%s13400_s8 + $0x2ac] ss:$28 sps:$4 sm:$0xff]   ;;  %v9598_v0 = vld [vmem:[%s13400_s8 + $0x3b8] ss:$28 sps:$4 sm:$0xff]  }
 0x374   : > { %v3135_v8 = vpop.permute.xlu0 %3134  ;;  %7808 = vmatprep.subr.bf16.mxu0 %v9560_v63  ;;  %7936 = vmatprep.subr.bf16.mxu1 %v9563_v60  ;;  %v9599_v63 = vld [vmem:[%s13400_s8 + $0x3c4] ss:$28 sps:$4 sm:$0xff]  }
 0x375   : > { %v3170_v9 = vmul.f32 %v3135_v8, %v3042_v2  ;;  %6605 = vmatmul.mubr.msk.f32.gmra.mrb[86].mxu0 %vm3260_vm0, %v3185_v5  ;;  %6621 = vmatmul.mubr.msk.f32.gmra.mrb[86].mxu1 %vm3260_vm0, %v3185_v5  ;;  %v9601_v2 = vld [vmem:[%s13400_s8 + $0x3c0] ss:$28 sps:$4 sm:$0xff]   ;;  %v9602_v8 = vld [vmem:[%s13400_s8 + $0x3f4] ss:$28 sps:$4 sm:$0xff]  }
 0x376   : > { %3445 = vmatprep.mubr.f32.mxu0 %v10303_v3  ;;  %3606 = vmatprep.mubr.f32.mxu1 %v10303_v3 }
 0x377   : > { %v3186_v12 = vadd.f32 %v3170_v9, %v11534_v23  ;;  %7810 = vmatpush1.bf16.msra.mxu0 %v9562_v6  ;;  %7938 = vmatpush1.bf16.msra.mxu1 %v9565_v34  ;;  %v9575_v23 = vld [vmem:[%s13400_s8 + $0x2e4] ss:$28 sps:$4 sm:$0xff]  }
 0x378   : > { %v3137_v46 = vpop.permute.xlu1 %3136  ;;  %7812 = vmatprep.subr.bf16.mxu0 %v9566_v39  ;;  %7940 = vmatprep.subr.bf16.mxu1 %v9569_v10 }
 0x379   : > { %v3171_v18 = vmul.f32 %v3137_v46, %v3043_v11  ;;  %6606 = vmatmul.mubr.msk.f32.gmra.mrb[88].mxu0 %vm3260_vm0, %v3186_v12  ;;  %6622 = vmatmul.mubr.msk.f32.gmra.mrb[88].mxu1 %vm3260_vm0, %v3186_v12  ;;  %v9605_v12 = vld [vmem:[%s13400_s8 + $0x3fc] ss:$28 sps:$4 sm:$0xff]  }
 0x37a   : > { %3451 = vmatprep.mubr.f32.mxu0 %v10303_v3  ;;  %3612 = vmatprep.mubr.f32.mxu1 %v10303_v3  ;;  %v9607_v46 = vld [vmem:[%s13400_s8 + $0x3f8] ss:$28 sps:$4 sm:$0xff]  }
 0x37b   : > { %v3187_v20 = vadd.f32 %v3171_v18, %v11541_v32  ;;  %7814 = vmatpush1.bf16.msra.mxu0 %v9568_v13  ;;  %7942 = vmatpush1.bf16.msra.mxu1 %v9571_v14  ;;  %v9581_v32 = vld [vmem:[%s13400_s8 + $0x31c] ss:$28 sps:$4 sm:$0xff]   ;;  %v9604_v14 = vld [vmem:[%s13400_s8 + $0x3f0] ss:$28 sps:$4 sm:$0xff]  }
 0x37c   : > { %v3139_v24 = vpop.permute.xlu0 %3138  ;;  %7816 = vmatprep.subr.bf16.mxu0 %v9572_v15  ;;  %7944 = vmatprep.subr.bf16.mxu1 %v9575_v23 }
 0x37d   : > { %v3172_v25 = vmul.f32 %v3139_v24, %v3044_v19  ;;  %6607 = vmatmul.mubr.msk.f32.gmra.mrb[90].mxu0 %vm3260_vm0, %v3187_v20  ;;  %6623 = vmatmul.mubr.msk.f32.gmra.mrb[90].mxu1 %vm3260_vm0, %v3187_v20  ;;  %v9608_v19 = vld [vmem:[%s13400_s8 + $0x42c] ss:$28 sps:$4 sm:$0xff]  }
 0x37e   : > { %3457 = vmatprep.mubr.f32.mxu0 %v10303_v3  ;;  %3618 = vmatprep.mubr.f32.mxu1 %v10303_v3 }
 0x37f   : > { %v3188_v49 = vadd.f32 %v3172_v25, %v11548_v47  ;;  %7818 = vmatpush1.bf16.msra.mxu0 %v9574_v21  ;;  %7946 = vmatpush1.bf16.msra.mxu1 %v9577_v22  ;;  %v9610_v25 = vld [vmem:[%s13400_s8 + $0x428] ss:$28 sps:$4 sm:$0xff]  }
 0x380   : > { %v3141_v27 = vpop.permute.xlu1 %3140  ;;  %7820 = vmatprep.subr.bf16.mxu0 %v9578_v4  ;;  %7948 = vmatprep.subr.bf16.mxu1 %v9581_v32  ;;  %v9611_v4 = vld [vmem:[%s13400_s8 + $0x434] ss:$28 sps:$4 sm:$0xff]  }
 0x381   : > { %v3173_v28 = vmul.f32 %v3141_v27, %v3045_v26  ;;  %6608 = vmatmul.mubr.msk.f32.gmra.mrb[92].mxu0 %vm3260_vm0, %v3188_v49  ;;  %6624 = vmatmul.mubr.msk.f32.gmra.mrb[92].mxu1 %vm3260_vm0, %v3188_v49  ;;  %v9613_v26 = vld [vmem:[%s13400_s8 + $0x430] ss:$28 sps:$4 sm:$0xff]   ;;  %v9614_v27 = vld [vmem:[%s13400_s8 + $0x464] ss:$28 sps:$4 sm:$0xff]  }
 0x382   : > { %3463 = vmatprep.mubr.f32.mxu0 %v10303_v3  ;;  %3624 = vmatprep.mubr.f32.mxu1 %v10303_v3  ;;  %v9586_v3 = vld [vmem:[%s13400_s8 + $0x348] ss:$28 sps:$4 sm:$0xff]  }
 0x383   : > { %v3189_v47 = vadd.f32 %v3173_v28, %v11555_v1  ;;  %7822 = vmatpush1.bf16.msra.mxu0 %v9580_v57  ;;  %7950 = vmatpush1.bf16.msra.mxu1 %v9583_v59  ;;  %v9589_v1 = vld [vmem:[%s13400_s8 + $0x350] ss:$28 sps:$4 sm:$0xff]  }
 0x384   : > { %7824 = vmatprep.subr.bf16.mxu0 %v9584_v16  ;;  %7952 = vmatprep.subr.bf16.mxu1 %v9587_v29 }
 0x385   : > { %6609 = vmatmul.mubr.msk.f32.gmra.mrb[94].mxu0 %vm3260_vm0, %v3189_v47  ;;  %6625 = vmatmul.mubr.msk.f32.gmra.mrb[94].mxu1 %vm3260_vm0, %v3189_v47 }
 0x387   : > { %7826 = vmatpush1.bf16.msra.mxu0 %v9586_v3  ;;  %7954 = vmatpush1.bf16.msra.mxu1 %v9589_v1  ;;  %v9617_v3 = vld [vmem:[%s13400_s8 + $0x46c] ss:$28 sps:$4 sm:$0xff]  }
 0x388   : > { %7828 = vmatprep.subr.bf16.mxu0 %v9590_v7  ;;  %7956 = vmatprep.subr.bf16.mxu1 %v9593_v30  ;;  %v9616_v7 = vld [vmem:[%s13400_s8 + $0x460] ss:$28 sps:$4 sm:$0xff]   ;;  %v9619_v30 = vld [vmem:[%s13400_s8 + $0x468] ss:$28 sps:$4 sm:$0xff]  }
 0x41c   : > { %v3375_v36 = vpop.f32.mrb[64].mxu0  ;;  %v11877_v58 = vpop.f32.mrb[64].mxu1 }
 0x41d   : > { %v3376_v38 = vadd.f32 %v3375_v36, %v11871_v33  ;;  %v3377_v40 = vpop.f32.mrb[65].mxu0  ;;  %v11880_v17 = vpop.f32.mrb[65].mxu1 }
 0x41e   : > { %v3378_v41 = vadd.f32 %v3377_v40, %v11875_v35 }
 0x41f   : > { %v11896_v53 = vmax.f32 %v3376_v38, 0.0 }
 0x420   : > { %v11889_v44 = vmax.f32 %v3378_v41, 0.0  ;;  %v3381_v37 = vpop.f32.mrb[66].mxu0  ;;  %v11891_v45 = vpop.f32.mrb[66].mxu1  ;;  %v9620_v41 = vld [vmem:[%s13400_s8 + $0x49c] ss:$28 sps:$4 sm:$0xff]  }
 0x421   : > { %v3382_v56 = vadd.f32 %v3381_v37, %v11871_v33  ;;  %v3383_v61 = vpop.f32.mrb[67].mxu0  ;;  %v11899_v62 = vpop.f32.mrb[67].mxu1 }
 0x422   : > { %v3384_v60 = vadd.f32 %v3383_v61, %v11875_v35  ;;  %4500 = vmatprep.mubr.f32.mxu0 %v11889_v44  ;;  %4822 = vmatprep.mubr.f32.mxu1 %v11889_v44 }
 0x423   : > { %4501 = vmatmul.mubr.f32.vlgmr.msra.gmra.mrb[96].mxu0 %v11896_v53  ;;  %4823 = vmatmul.mubr.f32.vlgmr.msra.gmra.mrb[96].mxu1 %v11896_v53  ;;  %v11922_v39 = vmax.f32 %v3382_v56, 0.0  ;;  %v9623_v56 = vld [vmem:[%s13400_s8 + $0x4a4] ss:$28 sps:$4 sm:$0xff]  }
 0x424   : > { %v11915_v5 = vmax.f32 %v3384_v60, 0.0  ;;  %v3387_v6 = vpop.f32.mrb[68].mxu0  ;;  %v11917_v34 = vpop.f32.mrb[68].mxu1  ;;  %7830 = vmatpush1.bf16.msra.mxu0 %v9592_v42  ;;  %7958 = vmatpush1.bf16.msra.mxu1 %v9595_v43  ;;  %v9625_v60 = vld [vmem:[%s13400_s8 + $0x4a0] ss:$28 sps:$4 sm:$0xff]  }
 0x425   : > { %v3388_v10 = vadd.f32 %v3387_v6, %v11871_v33  ;;  %v3389_v9 = vpop.f32.mrb[69].mxu0  ;;  %v11925_v11 = vpop.f32.mrb[69].mxu1  ;;  %7832 = vmatprep.subr.bf16.mxu0 %v9596_v48  ;;  %7960 = vmatprep.subr.bf16.mxu1 %v9599_v63  ;;  %v9622_v63 = vld [vmem:[%s13400_s8 + $0x498] ss:$28 sps:$4 sm:$0xff]  }
 0x426   : > { %v3390_v13 = vadd.f32 %v3389_v9, %v11875_v35  ;;  %4506 = vmatprep.mubr.f32.mxu0 %v11915_v5  ;;  %4828 = vmatprep.mubr.f32.mxu1 %v11915_v5 }
 0x427   : > { %4507 = vmatmul.mubr.f32.gmra.mrb[98].mxu0 %v11922_v39  ;;  %4829 = vmatmul.mubr.f32.gmra.mrb[98].mxu1 %v11922_v39  ;;  %v11948_v20 = vmax.f32 %v3388_v10, 0.0 }
 0x428   : > { %v11941_v15 = vmax.f32 %v3390_v13, 0.0  ;;  %v3393_v23 = vpop.f32.mrb[70].mxu0  ;;  %v11943_v18 = vpop.f32.mrb[70].mxu1  ;;  %7834 = vmatpush1.bf16.msra.mxu0 %v9598_v0  ;;  %7962 = vmatpush1.bf16.msra.mxu1 %v9601_v2 }
 0x429   : > { %v3394_v21 = vadd.f32 %v3393_v23, %v11871_v33  ;;  %v3395_v22 = vpop.f32.mrb[71].mxu0  ;;  %v11951_v24 = vpop.f32.mrb[71].mxu1  ;;  %7836 = vmatprep.subr.bf16.mxu0 %v9602_v8  ;;  %7964 = vmatprep.subr.bf16.mxu1 %v9605_v12  ;;  %v9626_v8 = vld [vmem:[%s13400_s8 + $0x4d4] ss:$28 sps:$4 sm:$0xff]  }
 0x42a   : > { %v3396_v32 = vadd.f32 %v3395_v22, %v11875_v35  ;;  %4512 = vmatprep.mubr.f32.mxu0 %v11941_v15  ;;  %4834 = vmatprep.mubr.f32.mxu1 %v11941_v15  ;;  %v9628_v23 = vld [vmem:[%s13400_s8 + $0x4d0] ss:$28 sps:$4 sm:$0xff]  }
 0x42b   : > { %4513 = vmatmul.mubr.f32.gmra.mrb[100].mxu0 %v11948_v20  ;;  %4835 = vmatmul.mubr.f32.gmra.mrb[100].mxu1 %v11948_v20  ;;  %v11974_v28 = vmax.f32 %v3394_v21, 0.0 }
 0x42c   : > { %v11967_v49 = vmax.f32 %v3396_v32, 0.0  ;;  %v3399_v57 = vpop.f32.mrb[72].mxu0  ;;  %v11969_v59 = vpop.f32.mrb[72].mxu1  ;;  %7838 = vmatpush1.bf16.msra.mxu0 %v9604_v14  ;;  %7966 = vmatpush1.bf16.msra.mxu1 %v9607_v46  ;;  %v9629_v14 = vld [vmem:[%s13400_s8 + $0x4dc] ss:$28 sps:$4 sm:$0xff]  }
 0x42d   : > { %v3400_v47 = vadd.f32 %v3399_v57, %v11871_v33  ;;  %v3401_v16 = vpop.f32.mrb[73].mxu0  ;;  %v11977_v29 = vpop.f32.mrb[73].mxu1  ;;  %7840 = vmatprep.subr.bf16.mxu0 %v9608_v19  ;;  %7968 = vmatprep.subr.bf16.mxu1 %v9611_v4  ;;  %v9631_v19 = vld [vmem:[%s13400_s8 + $0x4d8] ss:$28 sps:$4 sm:$0xff]   ;;  %v9632_v32 = vld [vmem:[%s13400_s8 + $0x50c] ss:$28 sps:$4 sm:$0xff]  }
 0x42e   : > { %v3402_v1 = vadd.f32 %v3401_v16, %v11875_v35  ;;  %4518 = vmatprep.mubr.f32.mxu0 %v11967_v49  ;;  %4840 = vmatprep.mubr.f32.mxu1 %v11967_v49 }
 0x42f   : > { %4519 = vmatmul.mubr.f32.gmra.mrb[102].mxu0 %v11974_v28  ;;  %4841 = vmatmul.mubr.f32.gmra.mrb[102].mxu1 %v11974_v28  ;;  %v12000_v42 = vmax.f32 %v3400_v47, 0.0  ;;  %v9635_v47 = vld [vmem:[%s13400_s8 + $0x514] ss:$28 sps:$4 sm:$0xff]  }
 0x430   : > { %v11993_v36 = vmax.f32 %v3402_v1, 0.0  ;;  %v3405_v38 = vpop.f32.mrb[74].mxu0  ;;  %v11995_v40 = vpop.f32.mrb[74].mxu1  ;;  %7842 = vmatpush1.bf16.msra.mxu0 %v9610_v25  ;;  %7970 = vmatpush1.bf16.msra.mxu1 %v9613_v26  ;;  %v9637_v1 = vld [vmem:[%s13400_s8 + $0x510] ss:$28 sps:$4 sm:$0xff]  }
 0x431   : > { %v3406_v43 = vadd.f32 %v3405_v38, %v11871_v33  ;;  %v3407_v37 = vpop.f32.mrb[75].mxu0  ;;  %v12003_v48 = vpop.f32.mrb[75].mxu1  ;;  %7844 = vmatprep.subr.bf16.mxu0 %v9614_v27  ;;  %7972 = vmatprep.subr.bf16.mxu1 %v9617_v3  ;;  %v9634_v3 = vld [vmem:[%s13400_s8 + $0x508] ss:$28 sps:$4 sm:$0xff]  }
 0x432   : > { %v3408_v61 = vadd.f32 %v3407_v37, %v11875_v35  ;;  %4524 = vmatprep.mubr.f32.mxu0 %v11993_v36  ;;  %4846 = vmatprep.mubr.f32.mxu1 %v11993_v36 }
 0x433   : > { %4525 = vmatmul.mubr.f32.gmra.mrb[104].mxu0 %v12000_v42  ;;  %4847 = vmatmul.mubr.f32.gmra.mrb[104].mxu1 %v12000_v42  ;;  %v12026_v10 = vmax.f32 %v3406_v43, 0.0 }
 0x434   : > { %v12019_v0 = vmax.f32 %v3408_v61, 0.0  ;;  %v3411_v2 = vpop.f32.mrb[76].mxu0  ;;  %v12021_v6 = vpop.f32.mrb[76].mxu1  ;;  %7846 = vmatpush1.bf16.msra.mxu0 %v9616_v7  ;;  %7974 = vmatpush1.bf16.msra.mxu1 %v9619_v30 }
 0x435   : > { %v3412_v9 = vadd.f32 %v3411_v2, %v11871_v33  ;;  %v3413_v12 = vpop.f32.mrb[77].mxu0  ;;  %v12029_v13 = vpop.f32.mrb[77].mxu1  ;;  %7848 = vmatprep.subr.bf16.mxu0 %v9620_v41  ;;  %7976 = vmatprep.subr.bf16.mxu1 %v9623_v56  ;;  %v9638_v41 = vld [vmem:[%s13400_s8 + $0x544] ss:$28 sps:$4 sm:$0xff]  }
 0x436   : > { %v3414_v46 = vadd.f32 %v3413_v12, %v11875_v35  ;;  %4530 = vmatprep.mubr.f32.mxu0 %v12019_v0  ;;  %4852 = vmatprep.mubr.f32.mxu1 %v12019_v0  ;;  %v9640_v2 = vld [vmem:[%s13400_s8 + $0x540] ss:$28 sps:$4 sm:$0xff]  }
 0x437   : > { %4531 = vmatmul.mubr.f32.gmra.mrb[106].mxu0 %v12026_v10  ;;  %4853 = vmatmul.mubr.f32.gmra.mrb[106].mxu1 %v12026_v10  ;;  %v12052_v25 = vmax.f32 %v3412_v9, 0.0 }
 0x438   : > { %v12045_v21 = vmax.f32 %v3414_v46, 0.0  ;;  %v3417_v22 = vpop.f32.mrb[78].mxu0  ;;  %v12047_v4 = vpop.f32.mrb[78].mxu1  ;;  %7850 = vmatpush1.bf16.msra.mxu0 %v9622_v63  ;;  %7978 = vmatpush1.bf16.msra.mxu1 %v9625_v60  ;;  %v9641_v63 = vld [vmem:[%s13400_s8 + $0x54c] ss:$28 sps:$4 sm:$0xff]  }
 0x439   : > { %13446 = vst [vmem:[#allocation7_spill] sm:$0xff] %v12052_v25  ;;  %v3418_v26 = vadd.f32 %v3417_v22, %v11871_v33  ;;  %v3419_v57 = vpop.f32.mrb[79].mxu0  ;;  %v12055_v27 = vpop.f32.mrb[79].mxu1  ;;  %7852 = vmatprep.subr.bf16.mxu0 %v9626_v8  ;;  %7980 = vmatprep.subr.bf16.mxu1 %v9629_v14  ;;  %v9643_v8 = vld [vmem:[%s13400_s8 + $0x548] ss:$28 sps:$4 sm:$0xff]  }
 0x43a   : > { %13445 = vst [vmem:[#allocation6_spill] sm:$0xff] %v12045_v21  ;;  %v3420_v16 = vadd.f32 %v3419_v57, %v11875_v35  ;;  %4536 = vmatprep.mubr.f32.mxu0 %v12045_v21  ;;  %4858 = vmatprep.mubr.f32.mxu1 %v12045_v21  ;;  %v9644_v46 = vld [vmem:[%s13400_s8 + $0x57c] ss:$28 sps:$4 sm:$0xff]  }
 0x43b   : > { %4537 = vmatmul.mubr.f32.gmra.mrb[108].mxu0 %v12052_v25  ;;  %4859 = vmatmul.mubr.f32.gmra.mrb[108].mxu1 %v12052_v25  ;;  %v12078_v43 = vmax.f32 %v3418_v26, 0.0  ;;  %v9647_v26 = vld [vmem:[%s13400_s8 + $0x584] ss:$28 sps:$4 sm:$0xff]  }
 0x43c   : > { %v12071_v7 = vmax.f32 %v3420_v16, 0.0  ;;  %v3423_v30 = vpop.f32.mrb[80].mxu0  ;;  %v12073_v38 = vpop.f32.mrb[80].mxu1  ;;  %7854 = vmatpush1.bf16.msra.mxu0 %v9628_v23  ;;  %7982 = vmatpush1.bf16.msra.mxu1 %v9631_v19  ;;  %v9649_v16 = vld [vmem:[%s13400_s8 + $0x580] ss:$28 sps:$4 sm:$0xff]  }
 0x43d   : > { %13448 = vst [vmem:[#allocation9_spill] sm:$0xff] %v12078_v43  ;;  %v3424_v37 = vadd.f32 %v3423_v30, %v11871_v33  ;;  %v3425_v56 = vpop.f32.mrb[81].mxu0  ;;  %v12081_v61 = vpop.f32.mrb[81].mxu1  ;;  %7856 = vmatprep.subr.bf16.mxu0 %v9632_v32  ;;  %7984 = vmatprep.subr.bf16.mxu1 %v9635_v47  ;;  %v9646_v47 = vld [vmem:[%s13400_s8 + $0x578] ss:$28 sps:$4 sm:$0xff]  }
 0x43e   : > { %13447 = vst [vmem:[#allocation8_spill] sm:$0xff] %v12071_v7  ;;  %v3426_v60 = vadd.f32 %v3425_v56, %v11875_v35  ;;  %4542 = vmatprep.mubr.f32.mxu0 %v12071_v7  ;;  %4864 = vmatprep.mubr.f32.mxu1 %v12071_v7 }
 0x43f   : > { %4543 = vmatmul.mubr.f32.gmra.mrb[110].mxu0 %v12078_v43  ;;  %4865 = vmatmul.mubr.f32.gmra.mrb[110].mxu1 %v12078_v43  ;;  %v12104_v23 = vmax.f32 %v3424_v37, 0.0 }
 0x440   : > { %v12097_v9 = vmax.f32 %v3426_v60, 0.0  ;;  %v3429_v12 = vpop.f32.mrb[82].mxu0  ;;  %v12099_v14 = vpop.f32.mrb[82].mxu1  ;;  %7858 = vmatpush1.bf16.msra.mxu0 %v9634_v3  ;;  %7986 = vmatpush1.bf16.msra.mxu1 %v9637_v1 }
 0x441   : > { %13450 = vst [vmem:[#allocation11_spill] sm:$0xff] %v12104_v23  ;;  %v3430_v19 = vadd.f32 %v3429_v12, %v11871_v33  ;;  %v3431_v22 = vpop.f32.mrb[83].mxu0  ;;  %v12107_v32 = vpop.f32.mrb[83].mxu1  ;;  %7860 = vmatprep.subr.bf16.mxu0 %v9638_v41  ;;  %7988 = vmatprep.subr.bf16.mxu1 %v9641_v63  ;;  %v9650_v41 = vld [vmem:[%s13400_s8 + $0x5b4] ss:$28 sps:$4 sm:$0xff]  }
 0x442   : > { %13449 = vst [vmem:[#allocation10_spill] sm:$0xff] %v12097_v9  ;;  %v3432_v57 = vadd.f32 %v3431_v22, %v11875_v35  ;;  %4548 = vmatprep.mubr.f32.mxu0 %v12097_v9  ;;  %4870 = vmatprep.mubr.f32.mxu1 %v12097_v9  ;;  %v9653_v12 = vld [vmem:[%s13400_s8 + $0x5bc] ss:$28 sps:$4 sm:$0xff]  }
 0x443   : > { %4549 = vmatmul.mubr.f32.gmra.mrb[112].mxu0 %v12104_v23  ;;  %4871 = vmatmul.mubr.f32.gmra.mrb[112].mxu1 %v12104_v23  ;;  %v12130_v37 = vmax.f32 %v3430_v19, 0.0 }
 0x444   : > { %v12123_v3 = vmax.f32 %v3432_v57, 0.0  ;;  %v3435_v1 = vpop.f32.mrb[84].mxu0  ;;  %v12125_v30 = vpop.f32.mrb[84].mxu1  ;;  %7862 = vmatpush1.bf16.msra.mxu0 %v9640_v2  ;;  %7990 = vmatpush1.bf16.msra.mxu1 %v9643_v8  ;;  %v9652_v8 = vld [vmem:[%s13400_s8 + $0x5b0] ss:$28 sps:$4 sm:$0xff]  }
 0x445   : > { %13452 = vst [vmem:[#allocation13_spill] sm:$0xff] %v12130_v37  ;;  %v3436_v56 = vadd.f32 %v3435_v1, %v11871_v33  ;;  %v3437_v63 = vpop.f32.mrb[85].mxu0  ;;  %v12133_v60 = vpop.f32.mrb[85].mxu1  ;;  %7864 = vmatprep.subr.bf16.mxu0 %v9644_v46  ;;  %7992 = vmatprep.subr.bf16.mxu1 %v9647_v26  ;;  %v9655_v46 = vld [vmem:[%s13400_s8 + $0x5b8] ss:$28 sps:$4 sm:$0xff]  }
 0x446   : > { %13451 = vst [vmem:[#allocation12_spill] sm:$0xff] %v12123_v3  ;;  %v3438_v2 = vadd.f32 %v3437_v63, %v11875_v35  ;;  %4554 = vmatprep.mubr.f32.mxu0 %v12123_v3  ;;  %4876 = vmatprep.mubr.f32.mxu1 %v12123_v3  ;;  %v9656_v57 = vld [vmem:[%s13400_s8 + $0x5ec] ss:$28 sps:$4 sm:$0xff]  }
 0x447   : > { %4555 = vmatmul.mubr.f32.gmra.mrb[114].mxu0 %v12130_v37  ;;  %4877 = vmatmul.mubr.f32.gmra.mrb[114].mxu1 %v12130_v37  ;;  %v12156_v1 = vmax.f32 %v3436_v56, 0.0 }
 0x448   : > { %v12149_v19 = vmax.f32 %v3438_v2, 0.0  ;;  %v3441_v22 = vpop.f32.mrb[86].mxu0  ;;  %v12151_v26 = vpop.f32.mrb[86].mxu1  ;;  %7866 = vmatpush1.bf16.msra.mxu0 %v9646_v47  ;;  %7994 = vmatpush1.bf16.msra.mxu1 %v9649_v16  ;;  %v9659_v2 = vld [vmem:[%s13400_s8 + $0x5f4] ss:$28 sps:$4 sm:$0xff]  }
 0x449   : > { %13454 = vst [vmem:[#allocation15_spill] sm:$0xff] %v12156_v1  ;;  %v3442_v63 = vadd.f32 %v3441_v22, %v11871_v33  ;;  %v3443_v50 = vpop.f32.mrb[87].mxu0  ;;  %v12159_v54 = vpop.f32.mrb[87].mxu1  ;;  %7868 = vmatprep.subr.bf16.mxu0 %v9650_v41  ;;  %7996 = vmatprep.subr.bf16.mxu1 %v9653_v12  ;;  %v9658_v16 = vld [vmem:[%s13400_s8 + $0x5e8] ss:$28 sps:$4 sm:$0xff]  }
 0x44a   : > { %13453 = vst [vmem:[#allocation14_spill] sm:$0xff] %v12149_v19  ;;  %v3444_v47 = vadd.f32 %v3443_v50, %v11875_v35  ;;  %4560 = vmatprep.mubr.f32.mxu0 %v12149_v19  ;;  %4882 = vmatprep.mubr.f32.mxu1 %v12149_v19  ;;  %v9661_v41 = vld [vmem:[%s13400_s8 + $0x5f0] ss:$28 sps:$4 sm:$0xff]   ;;  %v9662_v22 = vld [vmem:[%s13400_s8 + $0x624] ss:$28 sps:$4 sm:$0xff]  }
 0x44b   : > { %4561 = vmatmul.mubr.f32.gmra.mrb[116].mxu0 %v12156_v1  ;;  %4883 = vmatmul.mubr.f32.gmra.mrb[116].mxu1 %v12156_v1  ;;  %v12182_v51 = vmax.f32 %v3442_v63, 0.0 }
 0x44c   : > { %v12175_v56 = vmax.f32 %v3444_v47, 0.0  ;;  %v3447_v12 = vpop.f32.mrb[88].mxu0  ;;  %v12177_v50 = vpop.f32.mrb[88].mxu1  ;;  %7870 = vmatpush1.bf16.msra.mxu0 %v9652_v8  ;;  %7998 = vmatpush1.bf16.msra.mxu1 %v9655_v46  ;;  %v9665_v47 = vld [vmem:[%s13400_s8 + $0x62c] ss:$28 sps:$4 sm:$0xff]  }
 0x44d   : > { %13456 = vst [vmem:[#allocation17_spill] sm:$0xff] %v12182_v51  ;;  %v3448_v1 = vadd.f32 %v3447_v12, %v11871_v33  ;;  %v3449_v19 = vpop.f32.mrb[89].mxu0  ;;  %v12185_v37 = vpop.f32.mrb[89].mxu1  ;;  %7872 = vmatprep.subr.bf16.mxu0 %v9656_v57  ;;  %8000 = vmatprep.subr.bf16.mxu1 %v9659_v2  ;;  %v9664_v46 = vld [vmem:[%s13400_s8 + $0x620] ss:$28 sps:$4 sm:$0xff]  }
 0x44e   : > { %13455 = vst [vmem:[#allocation16_spill] sm:$0xff] %v12175_v56  ;;  %v3450_v8 = vadd.f32 %v3449_v19, %v11875_v35  ;;  %4566 = vmatprep.mubr.f32.mxu0 %v12175_v56  ;;  %4888 = vmatprep.mubr.f32.mxu1 %v12175_v56  ;;  %v9667_v57 = vld [vmem:[%s13400_s8 + $0x628] ss:$28 sps:$4 sm:$0xff]   ;;  %v9668_v12 = vld [vmem:[%s13400_s8 + $0x65c] ss:$28 sps:$4 sm:$0xff]  }
 0x44f   : > { %4567 = vmatmul.mubr.f32.gmra.mrb[118].mxu0 %v12182_v51  ;;  %4889 = vmatmul.mubr.f32.gmra.mrb[118].mxu1 %v12182_v51  ;;  %v12208_v51 = vmax.f32 %v3448_v1, 0.0  ;;  %v9670_v1 = vld [vmem:[%s13400_s8 + $0x658] ss:$28 sps:$4 sm:$0xff]  }
 0x450   : > { %v12201_v63 = vmax.f32 %v3450_v8, 0.0  ;;  %v3453_v2 = vpop.f32.mrb[90].mxu0  ;;  %v12203_v19 = vpop.f32.mrb[90].mxu1  ;;  %7874 = vmatpush1.bf16.msra.mxu0 %v9658_v16  ;;  %8002 = vmatpush1.bf16.msra.mxu1 %v9661_v41  ;;  %v9671_v8 = vld [vmem:[%s13400_s8 + $0x664] ss:$28 sps:$4 sm:$0xff]  }
 0x451   : > { %13458 = vst [vmem:[#allocation19_spill] sm:$0xff] %v12208_v51  ;;  %v3454_v56 = vadd.f32 %v3453_v2, %v11871_v33  ;;  %v3455_v3 = vpop.f32.mrb[91].mxu0  ;;  %v12211_v23 = vpop.f32.mrb[91].mxu1  ;;  %7876 = vmatprep.subr.bf16.mxu0 %v9662_v22  ;;  %8004 = vmatprep.subr.bf16.mxu1 %v9665_v47  ;;  %v9673_v41 = vld [vmem:[%s13400_s8 + $0x660] ss:$28 sps:$4 sm:$0xff]  }
 0x452   : > { %13457 = vst [vmem:[#allocation18_spill] sm:$0xff] %v12201_v63  ;;  %v3456_v16 = vadd.f32 %v3455_v3, %v11875_v35  ;;  %4572 = vmatprep.mubr.f32.mxu0 %v12201_v63  ;;  %4894 = vmatprep.mubr.f32.mxu1 %v12201_v63  ;;  %v9674_v2 = vld [vmem:[%s13400_s8 + $0x694] ss:$28 sps:$4 sm:$0xff]  }
 0x453   : > { %4573 = vmatmul.mubr.f32.gmra.mrb[120].mxu0 %v12208_v51  ;;  %4895 = vmatmul.mubr.f32.gmra.mrb[120].mxu1 %v12208_v51  ;;  %v12234_v51 = vmax.f32 %v3454_v56, 0.0  ;;  %v9676_v56 = vld [vmem:[%s13400_s8 + $0x690] ss:$28 sps:$4 sm:$0xff]  }
 0x454   : > { %v12227_v22 = vmax.f32 %v3456_v16, 0.0  ;;  %v3459_v47 = vpop.f32.mrb[92].mxu0  ;;  %v12229_v3 = vpop.f32.mrb[92].mxu1  ;;  %7878 = vmatpush1.bf16.msra.mxu0 %v9664_v46  ;;  %8006 = vmatpush1.bf16.msra.mxu1 %v9667_v57  ;;  %v9677_v16 = vld [vmem:[%s13400_s8 + $0x69c] ss:$28 sps:$4 sm:$0xff]   ;;  %v12244_v46 = vrot.slane %v11867_v31, %v11312_v55 }
 0x455   : > { %13460 = vst [vmem:[#allocation21_spill] sm:$0xff] %v12234_v51  ;;  %v3460_v63 = vadd.f32 %v3459_v47, %v11871_v33  ;;  %v3461_v9 = vpop.f32.mrb[93].mxu0  ;;  %v12237_v43 = vpop.f32.mrb[93].mxu1  ;;  %7880 = vmatprep.subr.bf16.mxu0 %v9668_v12  ;;  %8008 = vmatprep.subr.bf16.mxu1 %v9671_v8  ;;  %v9679_v12 = vld [vmem:[%s13400_s8 + $0x698] ss:$28 sps:$4 sm:$0xff]  }
 0x456   : > { %13459 = vst [vmem:[#allocation20_spill] sm:$0xff] %v12227_v22  ;;  %v3462_v57 = vadd.f32 %v3461_v9, %v11875_v35  ;;  %4578 = vmatprep.mubr.f32.mxu0 %v12227_v22  ;;  %4900 = vmatprep.mubr.f32.mxu1 %v12227_v22  ;;  %v9680_v55 = vld [vmem:[%s13400_s8 + $0x6cc] ss:$28 sps:$4 sm:$0xff]  }
 0x457   : > { %4579 = vmatmul.mubr.f32.gmra.mrb[122].mxu0 %v12234_v51  ;;  %4901 = vmatmul.mubr.f32.gmra.mrb[122].mxu1 %v12234_v51  ;;  %v12266_v51 = vrot.slane %v11867_v31, %v11303_v52  ;;  %v12268_v22 = vmax.f32 %v3460_v63, 0.0 }
 0x458   : > { %v12257_v8 = vmax.f32 %v3462_v57, 0.0  ;;  %v3465_v47 = vpop.f32.mrb[94].mxu0  ;;  %v12259_v9 = vpop.f32.mrb[94].mxu1  ;;  %7882 = vmatpush1.bf16.msra.mxu0 %v9670_v1  ;;  %8010 = vmatpush1.bf16.msra.mxu1 %v9673_v41  ;;  %v9683_v1 = vld [vmem:[%s13400_s8 + $0x6d4] ss:$28 sps:$4 sm:$0xff]   ;;  %v3539_v41 = vadd.f32 %v11880_v17, %v12244_v46 }
 0x459   : > { %v3466_v7 = vadd.f32 %v3465_v47, %v11871_v33  ;;  %v3467_v25 = vpop.f32.mrb[95].mxu0  ;;  %v12271_v57 = vpop.f32.mrb[95].mxu1  ;;  %7884 = vmatprep.subr.bf16.mxu0 %v9674_v2  ;;  %8012 = vmatprep.subr.bf16.mxu1 %v9677_v16  ;;  %v9682_v33 = vld [vmem:[%s13400_s8 + $0x6c8] ss:$28 sps:$4 sm:$0xff]   ;;  %v3537_v17 = vadd.f32 %v11877_v58, %v12266_v51  ;;  %v9686_v58 = vld [vmem:[%s13400_s8 + $0x14] ss:$28 sps:$4 sm:$0xff]  }
 0x45a   : > { %v3468_v21 = vadd.f32 %v3467_v25, %v11875_v35  ;;  %4584 = vmatprep.mubr.f32.mxu0 %v12257_v8  ;;  %4906 = vmatprep.mubr.f32.mxu1 %v12257_v8  ;;  %v9685_v25 = vld [vmem:[%s13400_s8 + $0x6d0] ss:$28 sps:$4 sm:$0xff]   ;;  %v12295_v63 = vmax.f32 %v3539_v41, 0.0  ;;  %v9693_v41 = vld [vmem:[%s13400_s8 + $0x48] ss:$28 sps:$4 sm:$0xff]  }
 0x45b   : > { %4585 = vmatmul.mubr.f32.gmra.mrb[124].mxu0 %v12268_v22  ;;  %4907 = vmatmul.mubr.f32.gmra.mrb[124].mxu1 %v12268_v22  ;;  %v12290_v35 = vmax.f32 %v3466_v7, 0.0  ;;  %v3543_v7 = vadd.f32 %v11891_v45, %v12266_v51  ;;  %v9688_v2 = vld [vmem:[%s13400_s8 + $0x10] ss:$28 sps:$4 sm:$0xff]  }
 0x45c   : > { %v12283_v31 = vmax.f32 %v3468_v21, 0.0  ;;  %7886 = vmatpush1.bf16.msra.mxu0 %v9676_v56  ;;  %8014 = vmatpush1.bf16.msra.mxu1 %v9679_v12  ;;  %v3545_v21 = vadd.f32 %v11899_v62, %v12244_v46  ;;  %v12310_v62 = vmax.f32 %v3537_v17, 0.0  ;;  %v3551_v56 = vadd.f32 %v11925_v11, %v12244_v46  ;;  %v9690_v12 = vld [vmem:[%s13400_s8 + $0x18] ss:$28 sps:$4 sm:$0xff]   ;;  %v9691_v45 = vld [vmem:[%s13400_s8 + $0x4c] ss:$28 sps:$4 sm:$0xff]  }
 0x45d   : > { %7888 = vmatprep.subr.bf16.mxu0 %v9680_v55  ;;  %8016 = vmatprep.subr.bf16.mxu1 %v9683_v1  ;;  %v9689_v55 = vld [vmem:[%s13400_s8 + $0x1d8] ss:$28 sps:$4 sm:$0xff]   ;;  %v9697_v47 = vld [vmem:[%s13400_s8 + $0x210] ss:$28 sps:$4 sm:$0xff]   ;;  %v12334_v11 = vmax.f32 %v3543_v7, 0.0  ;;  %v3549_v1 = vadd.f32 %v11917_v34, %v12266_v51  ;;  %v3557_v17 = vadd.f32 %v11951_v24, %v12244_v46 }
 0x45e   : > { %4590 = vmatprep.mubr.f32.mxu0 %v12283_v31  ;;  %4912 = vmatprep.mubr.f32.mxu1 %v12283_v31  ;;  %v12318_v16 = vmax.f32 %v3545_v21, 0.0  ;;  %v9698_v34 = vld [vmem:[%s13400_s8 + $0x50] ss:$28 sps:$4 sm:$0xff]   ;;  %v9705_v21 = vld [vmem:[%s13400_s8 + $0x248] ss:$28 sps:$4 sm:$0xff]  }
 0x45f   : > { %4591 = vmatmul.mubr.f32.gmra.mrb[126].mxu0 %v12290_v35  ;;  %4913 = vmatmul.mubr.f32.gmra.mrb[126].mxu1 %v12290_v35  ;;  %v12358_v24 = vmax.f32 %v3549_v1, 0.0  ;;  %v12366_v7 = vmax.f32 %v3557_v17, 0.0  ;;  %v9702_v17 = vld [vmem:[%s13400_s8 + $0xf4] ss:$28 sps:$4 sm:$0xff]  }
 0x460   : > { %7890 = vmatpush1.bf16.msra.mxu0 %v9682_v33  ;;  %4661 = vmatprep.mubr.f32.mxu0 %v12295_v63  ;;  %v12342_v33 = vmax.f32 %v3551_v56, 0.0  ;;  %v9699_v56 = vld [vmem:[%s13400_s8 + $0xbc] ss:$28 sps:$4 sm:$0xff]  }
 0x461   : > { %8018 = vmatpush1.bf16.msra.mxu1 %v9685_v25  ;;  %4983 = vmatprep.mubr.f32.mxu1 %v12295_v63  ;;  %v9694_v25 = vld [vmem:[%s13400_s8 + $0x84] ss:$28 sps:$4 sm:$0xff]  }
 0x462   : > { %8020 = vmatprep.subr.bf16.mxu0 %v9686_v58  ;;  %8148 = vmatprep.subr.bf16.mxu1 %v9689_v55  ;;  %v3555_v58 = vadd.f32 %v11943_v18, %v12266_v51  ;;  %v9696_v55 = vld [vmem:[%s13400_s8 + $0x80] ss:$28 sps:$4 sm:$0xff]   ;;  %v9706_v18 = vld [vmem:[%s13400_s8 + $0x88] ss:$28 sps:$4 sm:$0xff]  }
 0x463   : > { %4662 = vmatmul.mubr.f32.vlgmr.msra.gmra.mrb[96].mxu0 %v12310_v62 }
 0x464   : > { %4984 = vmatmul.mubr.f32.vlgmr.msra.gmra.mrb[96].mxu1 %v12310_v62  ;;  %4667 = vmatprep.mubr.f32.mxu0 %v12318_v16 }
 0x465   : > { %4989 = vmatprep.mubr.f32.mxu1 %v12318_v16  ;;  %8022 = vmatpush1.bf16.msra.mxu0 %v9688_v2  ;;  %v3563_v2 = vadd.f32 %v11977_v29, %v12244_v46  ;;  %v12382_v29 = vmax.f32 %v3555_v58, 0.0 }
 0x466   : > { %8150 = vmatpush3.bf16.msra.mxu1 %v9690_v12  ;;  %8024 = vmatprep.subr.bf16.mxu0 %v9691_v45  ;;  %v9713_v12 = vld [vmem:[%s13400_s8 + $0x280] ss:$28 sps:$4 sm:$0xff]   ;;  %v3561_v45 = vadd.f32 %v11969_v59, %v12266_v51 }
 0x467   : > { %4668 = vmatmul.mubr.f32.gmra.mrb[98].mxu0 %v12334_v11  ;;  %8152 = vmatprep.subr.bf16.mxu1 %v9697_v47  ;;  %v9701_v47 = vld [vmem:[%s13400_s8 + $0xb8] ss:$28 sps:$4 sm:$0xff]   ;;  %v12390_v1 = vmax.f32 %v3563_v2, 0.0  ;;  %v9714_v59 = vld [vmem:[%s13400_s8 + $0xc0] ss:$28 sps:$4 sm:$0xff]  }
 0x468   : > { %4990 = vmatmul.mubr.f32.gmra.mrb[98].mxu1 %v12334_v11  ;;  %4673 = vmatprep.mubr.f32.mxu0 %v12342_v33  ;;  %v9707_v2 = vld [vmem:[%s13400_s8 + $0x12c] ss:$28 sps:$4 sm:$0xff]  }
 0x469   : > { %4995 = vmatprep.mubr.f32.mxu1 %v12342_v33  ;;  %8026 = vmatpush1.bf16.msra.mxu0 %v9693_v41  ;;  %v3569_v41 = vadd.f32 %v12003_v48, %v12244_v46  ;;  %v12406_v48 = vmax.f32 %v3561_v45, 0.0 }
 0x46a   : > { %8028 = vmatprep.subr.bf16.mxu0 %v9694_v25  ;;  %8154 = vmatpush3.bf16.msra.mxu1 %v9698_v34  ;;  %v9721_v25 = vld [vmem:[%s13400_s8 + $0x2b8] ss:$28 sps:$4 sm:$0xff]   ;;  %v3567_v34 = vadd.f32 %v11995_v40, %v12266_v51 }
 0x46b   : > { %4674 = vmatmul.mubr.f32.gmra.mrb[100].mxu0 %v12358_v24  ;;  %8156 = vmatprep.subr.bf16.mxu1 %v9705_v21  ;;  %v9704_v21 = vld [vmem:[%s13400_s8 + $0xf0] ss:$28 sps:$4 sm:$0xff]   ;;  %v12414_v58 = vmax.f32 %v3569_v41, 0.0  ;;  %v9722_v40 = vld [vmem:[%s13400_s8 + $0xf8] ss:$28 sps:$4 sm:$0xff]  }
 0x46c   : > { %4996 = vmatmul.mubr.f32.gmra.mrb[100].mxu1 %v12358_v24  ;;  %4679 = vmatprep.mubr.f32.mxu0 %v12366_v7  ;;  %v9710_v41 = vld [vmem:[%s13400_s8 + $0x164] ss:$28 sps:$4 sm:$0xff]  }
 0x46d   : > { %5001 = vmatprep.mubr.f32.mxu1 %v12366_v7  ;;  %8030 = vmatpush1.bf16.msra.mxu0 %v9696_v55  ;;  %v3575_v55 = vadd.f32 %v12029_v13, %v12244_v46  ;;  %v12430_v13 = vmax.f32 %v3567_v34, 0.0 }
 0x46e   : > { %8032 = vmatprep.subr.bf16.mxu0 %v9699_v56  ;;  %8158 = vmatpush3.bf16.msra.mxu1 %v9706_v18  ;;  %v9729_v56 = vld [vmem:[%s13400_s8 + $0x2f0] ss:$28 sps:$4 sm:$0xff]   ;;  %v3573_v18 = vadd.f32 %v12021_v6, %v12266_v51 }
 0x46f   : > { %4680 = vmatmul.mubr.f32.gmra.mrb[102].mxu0 %v12382_v29  ;;  %8160 = vmatprep.subr.bf16.mxu1 %v9713_v12  ;;  %v9709_v12 = vld [vmem:[%s13400_s8 + $0x128] ss:$28 sps:$4 sm:$0xff]   ;;  %v12438_v45 = vmax.f32 %v3575_v55, 0.0  ;;  %v9730_v6 = vld [vmem:[%s13400_s8 + $0x130] ss:$28 sps:$4 sm:$0xff]  }
 0x470   : > { %5002 = vmatmul.mubr.f32.gmra.mrb[102].mxu1 %v12382_v29  ;;  %4685 = vmatprep.mubr.f32.mxu0 %v12390_v1  ;;  %v9715_v55 = vld [vmem:[%s13400_s8 + $0x19c] ss:$28 sps:$4 sm:$0xff]  }
 0x471   : > { %5007 = vmatprep.mubr.f32.mxu1 %v12390_v1  ;;  %8034 = vmatpush1.bf16.msra.mxu0 %v9701_v47  ;;  %v3581_v47 = vadd.f32 %v12055_v27, %v12244_v46  ;;  %v12454_v27 = vmax.f32 %v3573_v18, 0.0 }
 0x472   : > { %8036 = vmatprep.subr.bf16.mxu0 %v9702_v17  ;;  %8162 = vmatpush3.bf16.msra.mxu1 %v9714_v59  ;;  %v9737_v17 = vld [vmem:[%s13400_s8 + $0x328] ss:$28 sps:$4 sm:$0xff]   ;;  %v3579_v59 = vadd.f32 %v12047_v4, %v12266_v51 }
 0x473   : > { %4686 = vmatmul.mubr.f32.gmra.mrb[104].mxu0 %v12406_v48  ;;  %8164 = vmatprep.subr.bf16.mxu1 %v9721_v25  ;;  %v9712_v25 = vld [vmem:[%s13400_s8 + $0x160] ss:$28 sps:$4 sm:$0xff]   ;;  %v12462_v34 = vmax.f32 %v3581_v47, 0.0  ;;  %v9738_v4 = vld [vmem:[%s13400_s8 + $0x168] ss:$28 sps:$4 sm:$0xff]  }
 0x474   : > { %5008 = vmatmul.mubr.f32.gmra.mrb[104].mxu1 %v12406_v48  ;;  %4691 = vmatprep.mubr.f32.mxu0 %v12414_v58  ;;  %v9718_v47 = vld [vmem:[%s13400_s8 + $0x1d4] ss:$28 sps:$4 sm:$0xff]  }
 0x475   : > { %5013 = vmatprep.mubr.f32.mxu1 %v12414_v58  ;;  %8038 = vmatpush1.bf16.msra.mxu0 %v9704_v21  ;;  %v3587_v21 = vadd.f32 %v12081_v61, %v12244_v46  ;;  %v12478_v61 = vmax.f32 %v3579_v59, 0.0 }
 0x476   : > { %8040 = vmatprep.subr.bf16.mxu0 %v9707_v2  ;;  %8166 = vmatpush3.bf16.msra.mxu1 %v9722_v40  ;;  %v9745_v2 = vld [vmem:[%s13400_s8 + $0x360] ss:$28 sps:$4 sm:$0xff]   ;;  %v3585_v40 = vadd.f32 %v12073_v38, %v12266_v51 }
 0x477   : > { %4692 = vmatmul.mubr.f32.gmra.mrb[106].mxu0 %v12430_v13  ;;  %8168 = vmatprep.subr.bf16.mxu1 %v9729_v56  ;;  %v9717_v56 = vld [vmem:[%s13400_s8 + $0x198] ss:$28 sps:$4 sm:$0xff]   ;;  %v12486_v18 = vmax.f32 %v3587_v21, 0.0  ;;  %v9746_v38 = vld [vmem:[%s13400_s8 + $0x1a0] ss:$28 sps:$4 sm:$0xff]  }
 0x478   : > { %5014 = vmatmul.mubr.f32.gmra.mrb[106].mxu1 %v12430_v13  ;;  %4697 = vmatprep.mubr.f32.mxu0 %v12438_v45  ;;  %v9723_v21 = vld [vmem:[%s13400_s8 + $0x20c] ss:$28 sps:$4 sm:$0xff]  }
 0x479   : > { %5019 = vmatprep.mubr.f32.mxu1 %v12438_v45  ;;  %8042 = vmatpush1.bf16.msra.mxu0 %v9709_v12  ;;  %v3593_v12 = vadd.f32 %v12107_v32, %v12244_v46  ;;  %v12502_v32 = vmax.f32 %v3585_v40, 0.0  ;;  %v9726_v40 = vld [vmem:[%s13400_s8 + $0x244] ss:$28 sps:$4 sm:$0xff]  }
 0x47a   : > { %8044 = vmatprep.subr.bf16.mxu0 %v9710_v41  ;;  %8170 = vmatpush3.bf16.msra.mxu1 %v9730_v6  ;;  %v9753_v41 = vld [vmem:[%s13400_s8 + $0x558] ss:$28 sps:$4 sm:$0xff]   ;;  %v3591_v6 = vadd.f32 %v12099_v14, %v12266_v51 }
 0x47b   : > { %4698 = vmatmul.mubr.f32.gmra.mrb[108].mxu0 %v12454_v27  ;;  %8172 = vmatprep.subr.bf16.mxu1 %v9737_v17  ;;  %v9720_v17 = vld [vmem:[%s13400_s8 + $0x1d0] ss:$28 sps:$4 sm:$0xff]   ;;  %v12510_v59 = vmax.f32 %v3593_v12, 0.0 }
 0x47c   : > { %5020 = vmatmul.mubr.f32.gmra.mrb[108].mxu1 %v12454_v27  ;;  %4703 = vmatprep.mubr.f32.mxu0 %v12462_v34  ;;  %v12520_v14 = vmax.f32 %v3591_v6, 0.0 }
 0x47d   : > { %5025 = vmatprep.mubr.f32.mxu1 %v12462_v34  ;;  %8046 = vmatpush1.bf16.msra.mxu0 %v9712_v25  ;;  %v3599_v25 = vadd.f32 %v12133_v60, %v12244_v46  ;;  %v9725_v60 = vld [vmem:[%s13400_s8 + $0x208] ss:$28 sps:$4 sm:$0xff]  }
 0x47e   : > { %8048 = vmatprep.subr.bf16.mxu0 %v9715_v55  ;;  %8174 = vmatpush3.bf16.msra.mxu1 %v9738_v4  ;;  %v3597_v55 = vadd.f32 %v12125_v30, %v12266_v51 }
 0x47f   : > { %4704 = vmatmul.mubr.f32.gmra.mrb[110].mxu0 %v12478_v61  ;;  %8176 = vmatprep.subr.bf16.mxu1 %v9745_v2  ;;  %v12528_v4 = vmax.f32 %v3599_v25, 0.0  ;;  %v3605_v2 = vadd.f32 %v12159_v54, %v12244_v46  ;;  %v9728_v54 = vld [vmem:[%s13400_s8 + $0x240] ss:$28 sps:$4 sm:$0xff]   ;;  %v9734_v25 = vld [vmem:[%s13400_s8 + $0x2b4] ss:$28 sps:$4 sm:$0xff]  }
 0x480   : > { %5026 = vmatmul.mubr.f32.gmra.mrb[110].mxu1 %v12478_v61  ;;  %4709 = vmatprep.mubr.f32.mxu0 %v12486_v18  ;;  %v12538_v30 = vmax.f32 %v3597_v55, 0.0 }
 0x481   : > { %5031 = vmatprep.mubr.f32.mxu1 %v12486_v18  ;;  %8050 = vmatpush1.bf16.msra.mxu0 %v9717_v56  ;;  %v3603_v56 = vadd.f32 %v12151_v26, %v12266_v51  ;;  %v12546_v12 = vmax.f32 %v3605_v2, 0.0  ;;  %v9739_v2 = vld [vmem:[%s13400_s8 + $0x2ec] ss:$28 sps:$4 sm:$0xff]  }
 0x482   : > { %8052 = vmatprep.subr.bf16.mxu0 %v9718_v47  ;;  %8178 = vmatpush3.bf16.msra.mxu1 %v9746_v38  ;;  %v3611_v47 = vadd.f32 %v12185_v37, %v12244_v46  ;;  %v9731_v38 = vld [vmem:[%s13400_s8 + $0x27c] ss:$28 sps:$4 sm:$0xff]  }
 0x483   : > { %4710 = vmatmul.mubr.f32.gmra.mrb[112].mxu0 %v12502_v32  ;;  %8180 = vmatprep.subr.bf16.mxu1 %v9753_v41  ;;  %v12556_v26 = vmax.f32 %v3603_v56, 0.0  ;;  %v3609_v41 = vadd.f32 %v12177_v50, %v12266_v51  ;;  %v9733_v37 = vld [vmem:[%s13400_s8 + $0x278] ss:$28 sps:$4 sm:$0xff]  }
 0x484   : > { %5032 = vmatmul.mubr.f32.gmra.mrb[112].mxu1 %v12502_v32  ;;  %4715 = vmatprep.mubr.f32.mxu0 %v12510_v59  ;;  %v12564_v6 = vmax.f32 %v3611_v47, 0.0  ;;  %v9742_v47 = vld [vmem:[%s13400_s8 + $0x324] ss:$28 sps:$4 sm:$0xff]  }
 0x485   : > { %5037 = vmatprep.mubr.f32.mxu1 %v12510_v59  ;;  %8054 = vmatpush1.bf16.msra.mxu0 %v9720_v17  ;;  %v3617_v17 = vadd.f32 %v12211_v23, %v12244_v46  ;;  %v12574_v50 = vmax.f32 %v3609_v41, 0.0  ;;  %v9736_v23 = vld [vmem:[%s13400_s8 + $0x2b0] ss:$28 sps:$4 sm:$0xff]   ;;  %v9747_v41 = vld [vmem:[%s13400_s8 + $0x35c] ss:$28 sps:$4 sm:$0xff]  }
 0x486   : > { %8056 = vmatprep.subr.bf16.mxu0 %v9723_v21  ;;  %v3615_v21 = vadd.f32 %v12203_v19, %v12266_v51 }
 0x487   : > { %4716 = vmatmul.mubr.f32.gmra.mrb[114].mxu0 %v12520_v14  ;;  %v12582_v55 = vmax.f32 %v3617_v17, 0.0  ;;  %v9752_v17 = vld [vmem:[%s13400_s8 + $0x390] ss:$28 sps:$4 sm:$0xff]  }
 0x488   : > { %5038 = vmatmul.mubr.f32.gmra.mrb[114].mxu1 %v12520_v14  ;;  %4721 = vmatprep.mubr.f32.mxu0 %v12528_v4  ;;  %v12592_v19 = vmax.f32 %v3615_v21, 0.0  ;;  %v9755_v21 = vld [vmem:[%s13400_s8 + $0x3cc] ss:$28 sps:$4 sm:$0xff]  }
 0x489   : > { %5043 = vmatprep.mubr.f32.mxu1 %v12528_v4  ;;  %8058 = vmatpush1.bf16.msra.mxu0 %v9725_v60  ;;  %v3623_v60 = vadd.f32 %v12237_v43, %v12244_v46  ;;  %v9741_v43 = vld [vmem:[%s13400_s8 + $0x2e8] ss:$28 sps:$4 sm:$0xff]  }
 0x48a   : > { %8060 = vmatprep.subr.bf16.mxu0 %v9726_v40  ;;  %v3621_v40 = vadd.f32 %v12229_v3, %v12266_v51 }
 0x48b   : > { %4722 = vmatmul.mubr.f32.gmra.mrb[116].mxu0 %v12538_v30  ;;  %v12600_v56 = vmax.f32 %v3623_v60, 0.0  ;;  %v9758_v60 = vld [vmem:[%s13400_s8 + $0x404] ss:$28 sps:$4 sm:$0xff]  }
 0x48c   : > { %5044 = vmatmul.mubr.f32.gmra.mrb[116].mxu1 %v12538_v30  ;;  %4727 = vmatprep.mubr.f32.mxu0 %v12546_v12  ;;  %v12610_v3 = vmax.f32 %v3621_v40, 0.0  ;;  %v9769_v40 = vld [vmem:[%s13400_s8 + $0x5c8] ss:$28 sps:$4 sm:$0xff]  }
 0x48d   : > { %5049 = vmatprep.mubr.f32.mxu1 %v12546_v12  ;;  %8062 = vmatpush1.bf16.msra.mxu0 %v9728_v54  ;;  %v3629_v54 = vadd.f32 %v12271_v57, %v12244_v46  ;;  %v9744_v46 = vld [vmem:[%s13400_s8 + $0x320] ss:$28 sps:$4 sm:$0xff]  }
 0x48e   : > { %8064 = vmatprep.subr.bf16.mxu0 %v9731_v38  ;;  %v3627_v38 = vadd.f32 %v12259_v9, %v12266_v51  ;;  %v9749_v9 = vld [vmem:[%s13400_s8 + $0x358] ss:$28 sps:$4 sm:$0xff]  }
 0x48f   : > { %4728 = vmatmul.mubr.f32.gmra.mrb[118].mxu0 %v12556_v26  ;;  %v12618_v57 = vmax.f32 %v3629_v54, 0.0  ;;  %v9777_v54 = vld [vmem:[%s13400_s8 + $0x600] ss:$28 sps:$4 sm:$0xff]  }
 0x490   : > { %5050 = vmatmul.mubr.f32.gmra.mrb[118].mxu1 %v12556_v26  ;;  %4733 = vmatprep.mubr.f32.mxu0 %v12564_v6  ;;  %v12626_v51 = vmax.f32 %v3627_v38, 0.0  ;;  %v9779_v38 = vld [vmem:[%s13400_s8 + $0x51c] ss:$28 sps:$4 sm:$0xff]  }
 0x491   : > { %5055 = vmatprep.mubr.f32.mxu1 %v12564_v6  ;;  %8066 = vmatpush1.bf16.msra.mxu0 %v9733_v37  ;;  %v9750_v37 = vld [vmem:[%s13400_s8 + $0x394] ss:$28 sps:$4 sm:$0xff]  }
 0x492   : > { %8068 = vmatprep.subr.bf16.mxu0 %v9734_v25  ;;  %v9754_v25 = vld [vmem:[%s13400_s8 + $0x398] ss:$28 sps:$4 sm:$0xff]  }
 0x493   : > { %4734 = vmatmul.mubr.f32.gmra.mrb[120].mxu0 %v12574_v50 }
 0x494   : > { %5056 = vmatmul.mubr.f32.gmra.mrb[120].mxu1 %v12574_v50  ;;  %4739 = vmatprep.mubr.f32.mxu0 %v12582_v55 }
 0x495   : > { %5061 = vmatprep.mubr.f32.mxu1 %v12582_v55  ;;  %8070 = vmatpush1.bf16.msra.mxu0 %v9736_v23  ;;  %v9761_v23 = vld [vmem:[%s13400_s8 + $0x590] ss:$28 sps:$4 sm:$0xff]  }
 0x496   : > { %8072 = vmatprep.subr.bf16.mxu0 %v9739_v2  ;;  %v9763_v2 = vld [vmem:[%s13400_s8 + $0x43c] ss:$28 sps:$4 sm:$0xff]  }
 0x497   : > { %4740 = vmatmul.mubr.f32.gmra.mrb[122].mxu0 %v12592_v19 }
 0x498   : > { %5062 = vmatmul.mubr.f32.gmra.mrb[122].mxu1 %v12592_v19  ;;  %4745 = vmatprep.mubr.f32.mxu0 %v12600_v56 }
 0x499   : > { %5067 = vmatprep.mubr.f32.mxu1 %v12600_v56  ;;  %8074 = vmatpush1.bf16.msra.mxu0 %v9741_v43  ;;  %v9770_v43 = vld [vmem:[%s13400_s8 + $0x408] ss:$28 sps:$4 sm:$0xff]  }
 0x49a   : > { %8076 = vmatprep.subr.bf16.mxu0 %v9742_v47  ;;  %v9778_v47 = vld [vmem:[%s13400_s8 + $0x440] ss:$28 sps:$4 sm:$0xff]  }
 0x49b   : > { %4746 = vmatmul.mubr.f32.gmra.mrb[124].mxu0 %v12610_v3 }
 0x49c   : > { %5068 = vmatmul.mubr.f32.gmra.mrb[124].mxu1 %v12610_v3  ;;  %4751 = vmatprep.mubr.f32.mxu0 %v12618_v57 }
 0x49d   : > { %5073 = vmatprep.mubr.f32.mxu1 %v12618_v57  ;;  %8078 = vmatpush1.bf16.msra.mxu0 %v9744_v46  ;;  %v9785_v46 = vld [vmem:[%s13400_s8 + $0x638] ss:$28 sps:$4 sm:$0xff]  }
 0x49e   : > { %8080 = vmatprep.subr.bf16.mxu0 %v9747_v41  ;;  %v13463_v41 = vld [vmem:[#allocation8_spill] sm:$0xff] }
 0x49f   : > { %4752 = vmatmul.mubr.f32.gmra.mrb[126].mxu0 %v12626_v51 }
 0x4a0   : > { %5074 = vmatmul.mubr.f32.gmra.mrb[126].mxu1 %v12626_v51  ;;  %5144 = vmatprep.mubr.f32.mxu0 %v11889_v44 }
 0x4a1   : > { %8082 = vmatpush1.bf16.msra.mxu0 %v9749_v9  ;;  %5466 = vmatprep.mubr.f32.mxu1 %v11889_v44  ;;  %v9757_v44 = vld [vmem:[%s13400_s8 + $0x3c8] ss:$28 sps:$4 sm:$0xff]   ;;  %v9781_v9 = vld [vmem:[%s13400_s8 + $0x518] ss:$28 sps:$4 sm:$0xff]  }
 0x4a2   : > { %8084 = vmatprep.subr.bf16.mxu0 %v9750_v37  ;;  %v9782_v37 = vld [vmem:[%s13400_s8 + $0x554] ss:$28 sps:$4 sm:$0xff]  }
 0x4a4   : > { %5145 = vmatmul.mubr.f32.vlgmr.msra.gmra.mrb[128].mxu0 %v11896_v53  ;;  %5467 = vmatmul.mubr.f32.vlgmr.msra.gmra.mrb[128].mxu1 %v11896_v53  ;;  %v9762_v53 = vld [vmem:[%s13400_s8 + $0x3d0] ss:$28 sps:$4 sm:$0xff]  }
 0x4a5   : > { %5150 = vmatprep.mubr.f32.mxu0 %v11915_v5  ;;  %8086 = vmatpush1.bf16.msra.mxu0 %v9752_v17  ;;  %v9786_v17 = vld [vmem:[%s13400_s8 + $0x478] ss:$28 sps:$4 sm:$0xff]  }
 0x4a6   : > { %5471 = vmatprep.mubr.f32.mxu1 %v11915_v5  ;;  %8182 = vmatpush3.bf16.msra.mxu1 %v9754_v25  ;;  %v9760_v5 = vld [vmem:[%s13400_s8 + $0x400] ss:$28 sps:$4 sm:$0xff]  }
 0x4a7   : > { %8088 = vmatprep.subr.bf16.mxu0 %v9755_v21  ;;  %8184 = vmatprep.subr.bf16.mxu1 %v9761_v23  ;;  %v13464_v25 = vld [vmem:[#allocation9_spill] sm:$0xff]  ;;  %v13465_v21 = vld [vmem:[#allocation10_spill] sm:$0xff]  ;;  %v9784_v23 = vld [vmem:[%s13400_s8 + $0x550] ss:$28 sps:$4 sm:$0xff]  }
 0x4a8   : > { %5151 = vmatmul.mubr.f32.gmra.mrb[130].mxu0 %v11922_v39  ;;  %5472 = vmatmul.mubr.f32.gmra.mrb[130].mxu1 %v11922_v39  ;;  %v9765_v39 = vld [vmem:[%s13400_s8 + $0x438] ss:$28 sps:$4 sm:$0xff]  }
 0x4a9   : > { %5156 = vmatprep.mubr.f32.mxu0 %v11941_v15  ;;  %8090 = vmatpush1.bf16.msra.mxu0 %v9757_v44  ;;  %v9787_v44 = vld [vmem:[%s13400_s8 + $0x58c] ss:$28 sps:$4 sm:$0xff]  }
 0x4aa   : > { %5476 = vmatprep.mubr.f32.mxu1 %v11941_v15  ;;  %8092 = vmatprep.subr.bf16.mxu0 %v9758_v60  ;;  %v9766_v15 = vld [vmem:[%s13400_s8 + $0x474] ss:$28 sps:$4 sm:$0xff]  }
 0x4ab   : > { %8186 = vmatpush3.bf16.msra.mxu1 %v9762_v53  ;;  %v9793_v60 = vld [vmem:[%s13400_s8 + $0x670] ss:$28 sps:$4 sm:$0xff]  }
 0x4ac   : > { %5157 = vmatmul.mubr.f32.gmra.mrb[132].mxu0 %v11948_v20  ;;  %5477 = vmatmul.mubr.f32.gmra.mrb[132].mxu1 %v11948_v20  ;;  %v9768_v20 = vld [vmem:[%s13400_s8 + $0x470] ss:$28 sps:$4 sm:$0xff]  }
 0x4ad   : > { %5162 = vmatprep.mubr.f32.mxu0 %v11967_v49  ;;  %8094 = vmatpush1.bf16.msra.mxu0 %v9760_v5  ;;  %v13466_v53 = vld [vmem:[#allocation11_spill] sm:$0xff]  ;;  %v13467_v5 = vld [vmem:[#allocation12_spill] sm:$0xff] }
 0x4ae   : > { %5481 = vmatprep.mubr.f32.mxu1 %v11967_v49  ;;  %8096 = vmatprep.subr.bf16.mxu0 %v9763_v2  ;;  %v9771_v49 = vld [vmem:[%s13400_s8 + $0x4ac] ss:$28 sps:$4 sm:$0xff]  }
 0x4af   : > { %8188 = vmatprep.subr.bf16.mxu1 %v9769_v40  ;;  %v9789_v2 = vld [vmem:[%s13400_s8 + $0x588] ss:$28 sps:$4 sm:$0xff]  }
 0x4b0   : > { %5163 = vmatmul.mubr.f32.gmra.mrb[134].mxu0 %v11974_v28  ;;  %5482 = vmatmul.mubr.f32.gmra.mrb[134].mxu1 %v11974_v28  ;;  %v9773_v28 = vld [vmem:[%s13400_s8 + $0x4a8] ss:$28 sps:$4 sm:$0xff]  }
 0x4b1   : > { %5168 = vmatprep.mubr.f32.mxu0 %v11993_v36  ;;  %8098 = vmatpush1.bf16.msra.mxu0 %v9765_v39  ;;  %v9790_v40 = vld [vmem:[%s13400_s8 + $0x5c4] ss:$28 sps:$4 sm:$0xff]   ;;  %v9794_v39 = vld [vmem:[%s13400_s8 + $0x4b0] ss:$28 sps:$4 sm:$0xff]  }
 0x4b2   : > { %5486 = vmatprep.mubr.f32.mxu1 %v11993_v36  ;;  %8100 = vmatprep.subr.bf16.mxu0 %v9766_v15  ;;  %v9774_v36 = vld [vmem:[%s13400_s8 + $0x4e4] ss:$28 sps:$4 sm:$0xff]   ;;  %v13468_v15 = vld [vmem:[#allocation13_spill] sm:$0xff] }
 0x4b3   : > { %8190 = vmatpush3.bf16.msra.mxu1 %v9770_v43  ;;  %v13469_v43 = vld [vmem:[#allocation14_spill] sm:$0xff] }
 0x4b4   : > { %5169 = vmatmul.mubr.f32.gmra.mrb[136].mxu0 %v12000_v42  ;;  %5487 = vmatmul.mubr.f32.gmra.mrb[136].mxu1 %v12000_v42  ;;  %v13461_v42 = vld [vmem:[#allocation6_spill] sm:$0xff] }
 0x4b5   : > { %5174 = vmatprep.mubr.f32.mxu0 %v12019_v0  ;;  %8102 = vmatpush1.bf16.msra.mxu0 %v9768_v20  ;;  %v9792_v20 = vld [vmem:[%s13400_s8 + $0x5c0] ss:$28 sps:$4 sm:$0xff]  }
 0x4b6   : > { %5491 = vmatprep.mubr.f32.mxu1 %v12019_v0  ;;  %8104 = vmatprep.subr.bf16.mxu0 %v9771_v49  ;;  %v9776_v0 = vld [vmem:[%s13400_s8 + $0x4e0] ss:$28 sps:$4 sm:$0xff]  }
 0x4b7   : > { %8192 = vmatprep.subr.bf16.mxu1 %v9777_v54  ;;  %v9795_v49 = vld [vmem:[%s13400_s8 + $0x5fc] ss:$28 sps:$4 sm:$0xff]   ;;  %v9801_v54 = vld [vmem:[%s13400_s8 + $0x6a8] ss:$28 sps:$4 sm:$0xff]  }
 0x4b8   : > { %5175 = vmatmul.mubr.f32.gmra.mrb[138].mxu0 %v12026_v10  ;;  %5492 = vmatmul.mubr.f32.gmra.mrb[138].mxu1 %v12026_v10  ;;  %v13462_v10 = vld [vmem:[#allocation7_spill] sm:$0xff] }
 0x4b9   : > { %5180 = vmatprep.mubr.f32.mxu0 %v13461_v42  ;;  %8106 = vmatpush1.bf16.msra.mxu0 %v9773_v28  ;;  %v13470_v28 = vld [vmem:[#allocation15_spill] sm:$0xff] }
 0x4ba   : > { %5496 = vmatprep.mubr.f32.mxu1 %v13461_v42  ;;  %8108 = vmatprep.subr.bf16.mxu0 %v9774_v36  ;;  %v13471_v36 = vld [vmem:[#allocation16_spill] sm:$0xff] }
 0x4bb   : > { %8194 = vmatpush3.bf16.msra.mxu1 %v9778_v47  ;;  %v9797_v47 = vld [vmem:[%s13400_s8 + $0x5f8] ss:$28 sps:$4 sm:$0xff]  }
 0x4bc   : > { %5181 = vmatmul.mubr.f32.gmra.mrb[140].mxu0 %v13462_v10  ;;  %5497 = vmatmul.mubr.f32.gmra.mrb[140].mxu1 %v13462_v10  ;;  %v9798_v42 = vld [vmem:[%s13400_s8 + $0x634] ss:$28 sps:$4 sm:$0xff]  }
 0x4bd   : > { %5186 = vmatprep.mubr.f32.mxu0 %v13463_v41  ;;  %8110 = vmatpush1.bf16.msra.mxu0 %v9776_v0  ;;  %v9802_v0 = vld [vmem:[%s13400_s8 + $0x4e8] ss:$28 sps:$4 sm:$0xff]   ;;  %v9800_v10 = vld [vmem:[%s13400_s8 + $0x630] ss:$28 sps:$4 sm:$0xff]  }
 0x4be   : > { %5501 = vmatprep.mubr.f32.mxu1 %v13463_v41  ;;  %8112 = vmatprep.subr.bf16.mxu0 %v9779_v38  ;;  %v13472_v38 = vld [vmem:[#allocation17_spill] sm:$0xff]  ;;  %v9803_v41 = vld [vmem:[%s13400_s8 + $0x66c] ss:$28 sps:$4 sm:$0xff]  }
 0x4bf   : > { %8196 = vmatprep.subr.bf16.mxu1 %v9785_v46  ;;  %v13473_v46 = vld [vmem:[#allocation18_spill] sm:$0xff] }
 0x4c0   : > { %5187 = vmatmul.mubr.f32.gmra.mrb[142].mxu0 %v13464_v25  ;;  %5502 = vmatmul.mubr.f32.gmra.mrb[142].mxu1 %v13464_v25  ;;  %v9805_v25 = vld [vmem:[%s13400_s8 + $0x668] ss:$28 sps:$4 sm:$0xff]  }
 0x4c1   : > { %5192 = vmatprep.mubr.f32.mxu0 %v13465_v21  ;;  %8114 = vmatpush1.bf16.msra.mxu0 %v9781_v9  ;;  %v9809_v9 = vld [vmem:[%s13400_s8 + $0x6e0] ss:$28 sps:$4 sm:$0xff]  }
 0x4c2   : > { %5506 = vmatprep.mubr.f32.mxu1 %v13465_v21  ;;  %8116 = vmatprep.subr.bf16.mxu0 %v9782_v37  ;;  %v13474_v37 = vld [vmem:[#allocation19_spill] sm:$0xff]  ;;  %v9806_v21 = vld [vmem:[%s13400_s8 + $0x6a4] ss:$28 sps:$4 sm:$0xff]  }
 0x4c3   : > { %8198 = vmatpush3.bf16.msra.mxu1 %v9786_v17  ;;  %v13475_v17 = vld [vmem:[#allocation20_spill] sm:$0xff] }
 0x4c4   : > { %5193 = vmatmul.mubr.f32.gmra.mrb[144].mxu0 %v13466_v53  ;;  %5507 = vmatmul.mubr.f32.gmra.mrb[144].mxu1 %v13466_v53  ;;  %v9811_v53 = vld [vmem:[%s13400_s8 + $0x6dc] ss:$28 sps:$4 sm:$0xff]  }
 0x4c5   : > { %5198 = vmatprep.mubr.f32.mxu0 %v13467_v5  ;;  %8118 = vmatpush1.bf16.msra.mxu0 %v9784_v23  ;;  %v9810_v23 = vld [vmem:[%s13400_s8 + $0x520] ss:$28 sps:$4 sm:$0xff]  }
 0x4c6   : > { %5511 = vmatprep.mubr.f32.mxu1 %v13467_v5  ;;  %8120 = vmatprep.subr.bf16.mxu0 %v9787_v44  ;;  %v13476_v44 = vld [vmem:[#allocation21_spill] sm:$0xff] }
 0x4c7   : > { %8200 = vmatprep.subr.bf16.mxu1 %v9793_v60  ;;  %v9808_v60 = vld [vmem:[%s13400_s8 + $0x6a0] ss:$28 sps:$4 sm:$0xff]   ;;  %v9813_v5 = vld [vmem:[%s13400_s8 + $0x6d8] ss:$28 sps:$4 sm:$0xff]  }
 0x4c8   : > { %5199 = vmatmul.mubr.f32.gmra.mrb[146].mxu0 %v13468_v15  ;;  %5512 = vmatmul.mubr.f32.gmra.mrb[146].mxu1 %v13468_v15 }
 0x4c9   : > { %5204 = vmatprep.mubr.f32.mxu0 %v13469_v43  ;;  %8122 = vmatpush1.bf16.msra.mxu0 %v9789_v2 }
 0x4ca   : > { %5516 = vmatprep.mubr.f32.mxu1 %v13469_v43  ;;  %8124 = vmatprep.subr.bf16.mxu0 %v9790_v40 }
 0x4cb   : > { %8202 = vmatpush3.bf16.msra.mxu1 %v9794_v39 }
 0x4cc   : > { %5205 = vmatmul.mubr.f32.gmra.mrb[148].mxu0 %v13470_v28  ;;  %5517 = vmatmul.mubr.f32.gmra.mrb[148].mxu1 %v13470_v28 }
 0x4cd   : > { %5210 = vmatprep.mubr.f32.mxu0 %v13471_v36  ;;  %8126 = vmatpush1.bf16.msra.mxu0 %v9792_v20 }
 0x4ce   : > { %5521 = vmatprep.mubr.f32.mxu1 %v13471_v36  ;;  %8128 = vmatprep.subr.bf16.mxu0 %v9795_v49 }
 0x4cf   : > { %8204 = vmatprep.subr.bf16.mxu1 %v9801_v54 }
 0x4d0   : > { %5211 = vmatmul.mubr.f32.gmra.mrb[150].mxu0 %v13472_v38  ;;  %5522 = vmatmul.mubr.f32.gmra.mrb[150].mxu1 %v13472_v38 }
 0x4d1   : > { %5216 = vmatprep.mubr.f32.mxu0 %v13473_v46  ;;  %8130 = vmatpush1.bf16.msra.mxu0 %v9797_v47 }
 0x4d2   : > { %5526 = vmatprep.mubr.f32.mxu1 %v13473_v46  ;;  %8132 = vmatprep.subr.bf16.mxu0 %v9798_v42 }
 0x4d3   : > { %8206 = vmatpush3.bf16.msra.mxu1 %v9802_v0 }
 0x4d4   : > { %5217 = vmatmul.mubr.f32.gmra.mrb[152].mxu0 %v13474_v37  ;;  %5527 = vmatmul.mubr.f32.gmra.mrb[152].mxu1 %v13474_v37 }
 0x4d5   : > { %5222 = vmatprep.mubr.f32.mxu0 %v13475_v17  ;;  %8134 = vmatpush1.bf16.msra.mxu0 %v9800_v10 }
 0x4d6   : > { %5531 = vmatprep.mubr.f32.mxu1 %v13475_v17  ;;  %8136 = vmatprep.subr.bf16.mxu0 %v9803_v41 }
 0x4d7   : > { %8208 = vmatprep.subr.bf16.mxu1 %v9809_v9 }
 0x4d8   : > { %5223 = vmatmul.mubr.f32.gmra.mrb[154].mxu0 %v13476_v44  ;;  %5532 = vmatmul.mubr.f32.gmra.mrb[154].mxu1 %v13476_v44 }
 0x4d9   : > { %5228 = vmatprep.mubr.f32.mxu0 %v12257_v8  ;;  %8138 = vmatpush1.bf16.msra.mxu0 %v9805_v25 }
 0x4da   : > { %5536 = vmatprep.mubr.f32.mxu1 %v12257_v8  ;;  %8140 = vmatprep.subr.bf16.mxu0 %v9806_v21  ;;  %v13477_v8 = vld [vmem:[#allocation3_spill] sm:$0xff] }
 0x4db   : > { %8210 = vmatpush3.bf16.msra.mxu1 %v9810_v23 }
 0x4dc   : > { %5229 = vmatmul.mubr.f32.gmra.mrb[156].mxu0 %v12268_v22  ;;  %5537 = vmatmul.mubr.f32.gmra.mrb[156].mxu1 %v12268_v22  ;;  %v4399_v22 = vld [vmem:[%s13401_s9] sm:$0xff] }
 0x4dd   : > { %5234 = vmatprep.mubr.f32.mxu0 %v12283_v31  ;;  %8142 = vmatpush1.bf16.msra.mxu0 %v9808_v60 }
 0x4de   : > { %5541 = vmatprep.mubr.f32.mxu1 %v12283_v31  ;;  %8144 = vmatprep.subr.bf16.mxu0 %v9811_v53  ;;  %v12907_v31 = vrot.slane %v4399_v22, %v13477_v8 }
 0x4e0   : > { %5235 = vmatmul.mubr.f32.gmra.mrb[158].mxu0 %v12290_v35  ;;  %5542 = vmatmul.mubr.f32.gmra.mrb[158].mxu1 %v12290_v35  ;;  %v12910_v35 = vrot.slane %v4399_v22, %v11303_v52 }
 0x4e1   : > { %8146 = vmatpush1.bf16.msra.mxu0 %v9813_v5  ;;  %5305 = vmatprep.mubr.f32.mxu0 %v12295_v63 }
 0x4e2   : > { %5611 = vmatprep.mubr.f32.mxu1 %v12295_v63  ;;  %v13478_v63 = vld [vmem:[#allocation4_spill] sm:$0xff] }
 0x4e4   : > { %5306 = vmatmul.mubr.f32.vlgmr.msra.gmra.mrb[128].mxu0 %v12310_v62  ;;  %5612 = vmatmul.mubr.f32.vlgmr.msra.gmra.mrb[160].mxu1 %v12310_v62  ;;  %v12913_v62 = vrot.slane %v4399_v22, %v13478_v63 }
 0x4e5   : > { %5311 = vmatprep.mubr.f32.mxu0 %v12318_v16  ;;  %5616 = vmatprep.mubr.f32.mxu1 %v12318_v16  ;;  %v13479_v16 = vld [vmem:[#allocation5_spill] sm:$0xff] }
 0x4e8   : > { %5312 = vmatmul.mubr.f32.gmra.mrb[130].mxu0 %v12334_v11  ;;  %5617 = vmatmul.mubr.f32.gmra.mrb[162].mxu1 %v12334_v11  ;;  %v12916_v11 = vrot.slane %v4399_v22, %v13479_v16 }
 0x4e9   : > { %5317 = vmatprep.mubr.f32.mxu0 %v12342_v33  ;;  %5621 = vmatprep.mubr.f32.mxu1 %v12342_v33 }
 0x4ec   : > { %5318 = vmatmul.mubr.f32.gmra.mrb[132].mxu0 %v12358_v24  ;;  %5622 = vmatmul.mubr.f32.gmra.mrb[164].mxu1 %v12358_v24 }
 0x4ed   : > { %5323 = vmatprep.mubr.f32.mxu0 %v12366_v7  ;;  %5626 = vmatprep.mubr.f32.mxu1 %v12366_v7 }
 0x4f0   : > { %5324 = vmatmul.mubr.f32.gmra.mrb[134].mxu0 %v12382_v29  ;;  %5627 = vmatmul.mubr.f32.gmra.mrb[166].mxu1 %v12382_v29 }
 0x4f1   : > { %5329 = vmatprep.mubr.f32.mxu0 %v12390_v1  ;;  %5631 = vmatprep.mubr.f32.mxu1 %v12390_v1 }
 0x4f4   : > { %5330 = vmatmul.mubr.f32.gmra.mrb[136].mxu0 %v12406_v48  ;;  %5632 = vmatmul.mubr.f32.gmra.mrb[168].mxu1 %v12406_v48 }
 0x4f5   : > { %5335 = vmatprep.mubr.f32.mxu0 %v12414_v58  ;;  %5636 = vmatprep.mubr.f32.mxu1 %v12414_v58 }
 0x4f8   : > { %5336 = vmatmul.mubr.f32.gmra.mrb[138].mxu0 %v12430_v13  ;;  %5637 = vmatmul.mubr.f32.gmra.mrb[170].mxu1 %v12430_v13 }
 0x4f9   : > { %5341 = vmatprep.mubr.f32.mxu0 %v12438_v45  ;;  %5641 = vmatprep.mubr.f32.mxu1 %v12438_v45 }
 0x4fc   : > { %5342 = vmatmul.mubr.f32.gmra.mrb[140].mxu0 %v12454_v27  ;;  %5642 = vmatmul.mubr.f32.gmra.mrb[172].mxu1 %v12454_v27 }
 0x4fd   : > { %5347 = vmatprep.mubr.f32.mxu0 %v12462_v34  ;;  %5646 = vmatprep.mubr.f32.mxu1 %v12462_v34 }
 0x500   : > { %5348 = vmatmul.mubr.f32.gmra.mrb[142].mxu0 %v12478_v61  ;;  %5647 = vmatmul.mubr.f32.gmra.mrb[174].mxu1 %v12478_v61 }
 0x501   : > { %5353 = vmatprep.mubr.f32.mxu0 %v12486_v18  ;;  %5651 = vmatprep.mubr.f32.mxu1 %v12486_v18 }
 0x504   : > { %5354 = vmatmul.mubr.f32.gmra.mrb[144].mxu0 %v12502_v32  ;;  %5652 = vmatmul.mubr.f32.gmra.mrb[176].mxu1 %v12502_v32 }
 0x505   : > { %5359 = vmatprep.mubr.f32.mxu0 %v12510_v59  ;;  %5656 = vmatprep.mubr.f32.mxu1 %v12510_v59 }
 0x508   : > { %5360 = vmatmul.mubr.f32.gmra.mrb[146].mxu0 %v12520_v14  ;;  %5657 = vmatmul.mubr.f32.gmra.mrb[178].mxu1 %v12520_v14 }
 0x509   : > { %5365 = vmatprep.mubr.f32.mxu0 %v12528_v4  ;;  %5661 = vmatprep.mubr.f32.mxu1 %v12528_v4 }
 0x50c   : > { %5366 = vmatmul.mubr.f32.gmra.mrb[148].mxu0 %v12538_v30  ;;  %5662 = vmatmul.mubr.f32.gmra.mrb[180].mxu1 %v12538_v30 }
 0x50d   : > { %5371 = vmatprep.mubr.f32.mxu0 %v12546_v12  ;;  %5666 = vmatprep.mubr.f32.mxu1 %v12546_v12 }
 0x510   : > { %5372 = vmatmul.mubr.f32.gmra.mrb[150].mxu0 %v12556_v26  ;;  %5667 = vmatmul.mubr.f32.gmra.mrb[182].mxu1 %v12556_v26 }
 0x511   : > { %5377 = vmatprep.mubr.f32.mxu0 %v12564_v6  ;;  %5671 = vmatprep.mubr.f32.mxu1 %v12564_v6 }
 0x514   : > { %5378 = vmatmul.mubr.f32.gmra.mrb[152].mxu0 %v12574_v50  ;;  %5672 = vmatmul.mubr.f32.gmra.mrb[184].mxu1 %v12574_v50 }
 0x515   : > { %5383 = vmatprep.mubr.f32.mxu0 %v12582_v55  ;;  %5676 = vmatprep.mubr.f32.mxu1 %v12582_v55 }
 0x518   : > { %5384 = vmatmul.mubr.f32.gmra.mrb[154].mxu0 %v12592_v19  ;;  %5677 = vmatmul.mubr.f32.gmra.mrb[186].mxu1 %v12592_v19 }
 0x519   : > { %5389 = vmatprep.mubr.f32.mxu0 %v12600_v56  ;;  %5681 = vmatprep.mubr.f32.mxu1 %v12600_v56 }
 0x51c   : > { %5390 = vmatmul.mubr.f32.gmra.mrb[156].mxu0 %v12610_v3  ;;  %5682 = vmatmul.mubr.f32.gmra.mrb[188].mxu1 %v12610_v3 }
 0x51d   : > { %5395 = vmatprep.mubr.f32.mxu0 %v12618_v57  ;;  %5686 = vmatprep.mubr.f32.mxu1 %v12618_v57 }
 0x520   : > { %5396 = vmatmul.mubr.f32.gmra.mrb[158].mxu0 %v12626_v51  ;;  %5687 = vmatmul.mubr.f32.gmra.mrb[190].mxu1 %v12626_v51 }
 0x536   : > { %v4663_v33 = vpop.f32.mrb[96].mxu0 }
 0x537   : > { %v8275_v24 = vadd.f32 %v4663_v33, %v12907_v31  ;;  %v4985_v7 = vpop.f32.mrb[96].mxu1  ;;  %v4665_v29 = vpop.f32.mrb[97].mxu0 }
 0x538   : > { %v8307_v1 = vadd.f32 %v4985_v7, %v12910_v35  ;;  %v8276_v48 = vadd.f32 %v4665_v29, %v12913_v62  ;;  %v4987_v58 = vpop.f32.mrb[97].mxu1 }
 0x539   : > { %v6626_v13 = vmul.f32 -1.442695, %v8275_v24  ;;  %v8308_v52 = vadd.f32 %v4987_v58, %v12916_v11 }
 0x53a   : > { %v6628_v45 = vmul.f32 -1.442695, %v8307_v1  ;;  %v6627_v27 = vmul.f32 -1.442695, %v8276_v48  ;;  %v4669_v34 = vpop.f32.mrb[98].mxu0 }
 0x53b   : > { %9846 = vpow2.f32 %v6626_v13  ;;  %v6629_v61 = vmul.f32 -1.442695, %v8308_v52  ;;  %v8277_v18 = vadd.f32 %v4669_v34, %v12907_v31  ;;  %v4991_v32 = vpop.f32.mrb[98].mxu1  ;;  %v4671_v59 = vpop.f32.mrb[99].mxu0 }
 0x53c   : > { %9848 = vpow2.f32 %v6628_v45  ;;  %v8309_v14 = vadd.f32 %v4991_v32, %v12910_v35  ;;  %v8278_v4 = vadd.f32 %v4671_v59, %v12913_v62  ;;  %v4993_v30 = vpop.f32.mrb[99].mxu1 }
 0x53d   : > { %9850 = vpow2.f32 %v6627_v27  ;;  %v6633_v12 = vmul.f32 -1.442695, %v8277_v18  ;;  %v8310_v26 = vadd.f32 %v4993_v30, %v12916_v11 }
 0x53e   : > { %9852 = vpow2.f32 %v6629_v61  ;;  %v6635_v6 = vmul.f32 -1.442695, %v8309_v14  ;;  %v6634_v50 = vmul.f32 -1.442695, %v8278_v4  ;;  %v4675_v55 = vpop.f32.mrb[100].mxu0 }
 0x53f   : > { %9854 = vpow2.f32 %v6633_v12  ;;  %v6636_v19 = vmul.f32 -1.442695, %v8310_v26  ;;  %v8279_v56 = vadd.f32 %v4675_v55, %v12907_v31  ;;  %v4997_v3 = vpop.f32.mrb[100].mxu1  ;;  %v4677_v57 = vpop.f32.mrb[101].mxu0 }
 0x540   : > { %9856 = vpow2.f32 %v6635_v6  ;;  %v8311_v51 = vadd.f32 %v4997_v3, %v12910_v35  ;;  %v8280_v2 = vadd.f32 %v4677_v57, %v12913_v62  ;;  %v4999_v40 = vpop.f32.mrb[101].mxu1 }
 0x541   : > { %9858 = vpow2.f32 %v6634_v50  ;;  %v6640_v39 = vmul.f32 -1.442695, %v8279_v56  ;;  %v8312_v15 = vadd.f32 %v4999_v40, %v12916_v11 }
 0x542   : > { %9860 = vpow2.f32 %v6636_v19  ;;  %v6642_v43 = vmul.f32 -1.442695, %v8311_v51  ;;  %v6641_v20 = vmul.f32 -1.442695, %v8280_v2  ;;  %v4681_v49 = vpop.f32.mrb[102].mxu0 }
 0x543   : > { %9862 = vpow2.f32 %v6640_v39  ;;  %v6643_v54 = vmul.f32 -1.442695, %v8312_v15  ;;  %v8281_v28 = vadd.f32 %v4681_v49, %v12907_v31  ;;  %v5003_v36 = vpop.f32.mrb[102].mxu1  ;;  %v4683_v47 = vpop.f32.mrb[103].mxu0 }
 0x544   : > { %9864 = vpow2.f32 %v6642_v43  ;;  %v5005_v42 = vpop.f32.mrb[103].mxu1  ;;  %v8313_v13 = vadd.f32 %v5003_v36, %v12910_v35  ;;  %v8282_v27 = vadd.f32 %v4683_v47, %v12913_v62 }
 0x545   : > { %v9847_v0 = vpop.eup %9846  ;;  %9866 = vpow2.f32 %v6641_v20  ;;  %v6647_v38 = vmul.f32 -1.442695, %v8281_v28  ;;  %v8314_v32 = vadd.f32 %v5005_v42, %v12916_v11 }
 0x546   : > { %v9849_v46 = vpop.eup %9848  ;;  %v6028_v10 = vadd.f32 1.0, %v9847_v0  ;;  %9868 = vpow2.f32 %v6643_v54  ;;  %v4687_v41 = vpop.f32.mrb[104].mxu0  ;;  %v6649_v55 = vmul.f32 -1.442695, %v8313_v13  ;;  %v6648_v57 = vmul.f32 -1.442695, %v8282_v27 }
 0x547   : > { %v9851_v9 = vpop.eup %9850  ;;  %v6030_v37 = vadd.f32 1.0, %v9849_v46  ;;  %9870 = vpow2.f32 %v6647_v38  ;;  %v5009_v17 = vpop.f32.mrb[104].mxu1  ;;  %v8283_v12 = vadd.f32 %v4687_v41, %v12907_v31  ;;  %v6650_v39 = vmul.f32 -1.442695, %v8314_v32 }
 0x548   : > { %v4689_v25 = vpop.f32.mrb[105].mxu0  ;;  %v9853_v21 = vpop.eup %9852  ;;  %9872 = vrcp.f32 %v6028_v10  ;;  %v6029_v23 = vadd.f32 1.0, %v9851_v9  ;;  %v8315_v19 = vadd.f32 %v5009_v17, %v12910_v35 }
 0x549   : > { %v5011_v44 = vpop.f32.mrb[105].mxu1  ;;  %v9855_v60 = vpop.eup %9854  ;;  %9874 = vrcp.f32 %v6030_v37  ;;  %v6031_v53 = vadd.f32 1.0, %v9853_v21  ;;  %v8284_v51 = vadd.f32 %v4689_v25, %v12913_v62  ;;  %v6654_v54 = vmul.f32 -1.442695, %v8283_v12 }
 0x54a   : > { %v9857_v5 = vpop.eup %9856  ;;  %9876 = vrcp.f32 %v6029_v23  ;;  %v6035_v22 = vadd.f32 1.0, %v9855_v60  ;;  %v4693_v8 = vpop.f32.mrb[106].mxu0  ;;  %v8316_v15 = vadd.f32 %v5011_v44, %v12916_v11  ;;  %v6656_v42 = vmul.f32 -1.442695, %v8315_v19 }
 0x54b   : > { %v9859_v63 = vpop.eup %9858  ;;  %9878 = vrcp.f32 %v6031_v53  ;;  %v6037_v16 = vadd.f32 1.0, %v9857_v5  ;;  %v5015_v33 = vpop.f32.mrb[106].mxu1  ;;  %v8285_v28 = vadd.f32 %v4693_v8, %v12907_v31  ;;  %v6655_v46 = vmul.f32 -1.442695, %v8284_v51 }
 0x54c   : > { %v4695_v24 = vpop.f32.mrb[107].mxu0  ;;  %v9861_v7 = vpop.eup %9860  ;;  %9880 = vrcp.f32 %v6035_v22  ;;  %v6036_v29 = vadd.f32 1.0, %v9859_v63  ;;  %v8317_v0 = vadd.f32 %v5015_v33, %v12910_v35  ;;  %v6657_v37 = vmul.f32 -1.442695, %v8316_v15 }
 0x54d   : > { %v5017_v1 = vpop.f32.mrb[107].mxu1  ;;  %v9863_v48 = vpop.eup %9862  ;;  %9882 = vrcp.f32 %v6037_v16  ;;  %v6038_v58 = vadd.f32 1.0, %v9861_v7  ;;  %v8286_v10 = vadd.f32 %v4695_v24, %v12913_v62  ;;  %v6661_v44 = vmul.f32 -1.442695, %v8285_v28 }
 0x54e   : > { %v9865_v52 = vpop.eup %9864  ;;  %9884 = vrcp.f32 %v6036_v29  ;;  %v6042_v45 = vadd.f32 1.0, %v9863_v48  ;;  %v4699_v34 = vpop.f32.mrb[108].mxu0  ;;  %v8318_v17 = vadd.f32 %v5017_v1, %v12916_v11  ;;  %v6663_v22 = vmul.f32 -1.442695, %v8317_v0 }
 0x54f   : > { %v9867_v61 = vpop.eup %9866  ;;  %9886 = vrcp.f32 %v6038_v58  ;;  %v6044_v18 = vadd.f32 1.0, %v9865_v52  ;;  %v5021_v59 = vpop.f32.mrb[108].mxu1  ;;  %v8287_v60 = vadd.f32 %v4699_v34, %v12907_v31  ;;  %v6662_v16 = vmul.f32 -1.442695, %v8286_v10 }
 0x550   : > { %v12934_v14 = vpop.f32.mrb[109].mxu0  ;;  %v9869_v4 = vpop.eup %9868  ;;  %9888 = vrcp.f32 %v6042_v45  ;;  %v6043_v30 = vadd.f32 1.0, %v9867_v61  ;;  %v8319_v8 = vadd.f32 %v5021_v59, %v12910_v35  ;;  %v6664_v7 = vmul.f32 -1.442695, %v8318_v17 }
 0x551   : > { %v12944_v26 = vpop.f32.mrb[109].mxu1  ;;  %v9871_v6 = vpop.eup %9870  ;;  %9890 = vrcp.f32 %v6044_v18  ;;  %v6045_v50 = vadd.f32 1.0, %v9869_v4  ;;  %v6668_v58 = vmul.f32 -1.442695, %v8287_v60 }
 0x552   : > { %v9873_v56 = vpop.eup %9872  ;;  %9892 = vrcp.f32 %v6043_v30  ;;  %v6049_v3 = vadd.f32 1.0, %v9871_v6  ;;  %v12948_v2 = vpop.f32.mrb[110].mxu0  ;;  %v6670_v45 = vmul.f32 -1.442695, %v8319_v8 }
 0x553   : > { %v9875_v40 = vpop.eup %9874  ;;  %6364 = vst [vmem:[%s12941_s22] sm:$0xff] %v9873_v56  ;;  %9894 = vrcp.f32 %v6045_v50  ;;  %v12952_v43 = vpop.f32.mrb[110].mxu1 }
 0x554   : > { %v12954_v20 = vpop.f32.mrb[111].mxu0  ;;  %v9877_v49 = vpop.eup %9876  ;;  %6366 = vst [vmem:[%s12941_s22 + $0x10] sm:$0xff] %v9875_v40  ;;  %9896 = vrcp.f32 %v6049_v3  ;;  %v8288_v40 = vadd.f32 %v12934_v14, %v12913_v62 }
 0x555   : > { %v12958_v36 = vpop.f32.mrb[111].mxu1  ;;  %v9879_v47 = vpop.eup %9878  ;;  %6365 = vst [vmem:[%s12941_s22 + $0x8] sm:$0xff] %v9877_v49  ;;  %9898 = vpow2.f32 %v6649_v55 }
 0x556   : > { %v9881_v38 = vpop.eup %9880  ;;  %6367 = vst [vmem:[%s12941_s22 + $0x18] sm:$0xff] %v9879_v47  ;;  %9900 = vpow2.f32 %v6648_v57  ;;  %v12964_v41 = vpop.f32.mrb[112].mxu0 }
 0x557   : > { %v9883_v9 = vpop.eup %9882  ;;  %6371 = vst [vmem:[%s12941_s22 + $0x38] sm:$0xff] %v9881_v38  ;;  %9902 = vpow2.f32 %v6650_v39  ;;  %v12968_v25 = vpop.f32.mrb[112].mxu1 }
 0x558   : > { %v12970_v21 = vpop.f32.mrb[113].mxu0  ;;  %v9885_v23 = vpop.eup %9884  ;;  %6373 = vst [vmem:[%s12941_s22 + $0x48] sm:$0xff] %v9883_v9  ;;  %9904 = vpow2.f32 %v6654_v54  ;;  %v8320_v54 = vadd.f32 %v12944_v26, %v12916_v11 }
 0x559   : > { %v12974_v53 = vpop.f32.mrb[113].mxu1  ;;  %v9887_v5 = vpop.eup %9886  ;;  %6372 = vst [vmem:[%s12941_s22 + $0x40] sm:$0xff] %v9885_v23  ;;  %9906 = vpow2.f32 %v6656_v42 }
 0x55a   : > { %v9889_v63 = vpop.eup %9888  ;;  %6374 = vst [vmem:[%s12941_s22 + $0x50] sm:$0xff] %v9887_v5  ;;  %9908 = vpow2.f32 %v6655_v46  ;;  %v12979_v33 = vpop.f32.mrb[114].mxu0  ;;  %v6671_v8 = vmul.f32 -1.442695, %v8320_v54 }
 0x55b   : > { %v9891_v24 = vpop.eup %9890  ;;  %6378 = vst [vmem:[%s12941_s22 + $0x70] sm:$0xff] %v9889_v63  ;;  %9910 = vpow2.f32 %v6657_v37  ;;  %v12982_v29 = vpop.f32.mrb[114].mxu1 }
 0x55c   : > { %v12984_v1 = vpop.f32.mrb[115].mxu0  ;;  %v9893_v48 = vpop.eup %9892  ;;  %6380 = vst [vmem:[%s12941_s22 + $0x80] sm:$0xff] %v9891_v24  ;;  %9912 = vpow2.f32 %v6661_v44  ;;  %v6669_v44 = vmul.f32 -1.442695, %v8288_v40 }
 0x55d   : > { %v5041_v13 = vpop.f32.mrb[115].mxu1  ;;  %v9895_v52 = vpop.eup %9894  ;;  %6379 = vst [vmem:[%s12941_s22 + $0x78] sm:$0xff] %v9893_v48  ;;  %9914 = vpow2.f32 %v6663_v22 }
 0x55e   : > { %v12989_v27 = vadd.f32 %v5041_v13, %v12916_v11  ;;  %v9897_v34 = vpop.eup %9896  ;;  %6381 = vst [vmem:[%s12941_s22 + $0x88] sm:$0xff] %v9895_v52  ;;  %9916 = vpow2.f32 %v6662_v16  ;;  %v4723_v61 = vpop.f32.mrb[116].mxu0 }
 0x55f   : > { %v9899_v18 = vpop.eup %9898  ;;  %6385 = vst [vmem:[%s12941_s22 + $0xa8] sm:$0xff] %v9897_v34  ;;  %9918 = vpow2.f32 %v6664_v7  ;;  %v12994_v32 = vadd.f32 %v4723_v61, %v12907_v31  ;;  %v5045_v59 = vpop.f32.mrb[116].mxu1  ;;  %v8289_v61 = vadd.f32 %v12948_v2, %v12907_v31  ;;  %v8322_v2 = vadd.f32 %v12958_v36, %v12916_v11 }
 0x560   : > { %v4725_v4 = vpop.f32.mrb[117].mxu0  ;;  %v9901_v30 = vpop.eup %9900  ;;  %v6051_v12 = vadd.f32 1.0, %v9899_v18  ;;  %9920 = vpow2.f32 %v6668_v58  ;;  %v12997_v6 = vadd.f32 %v5045_v59, %v12910_v35 }
 0x561   : > { %v13000_v50 = vadd.f32 %v4725_v4, %v12913_v62  ;;  %v5047_v55 = vpop.f32.mrb[117].mxu1  ;;  %v9903_v19 = vpop.eup %9902  ;;  %v6050_v56 = vadd.f32 1.0, %v9901_v30  ;;  %9922 = vpow2.f32 %v6670_v45  ;;  %v8321_v30 = vadd.f32 %v12952_v43, %v12910_v35 }
 0x562   : > { %v13003_v3 = vadd.f32 %v5047_v55, %v12916_v11  ;;  %v9905_v57 = vpop.eup %9904  ;;  %9924 = vrcp.f32 %v6051_v12  ;;  %v6052_v51 = vadd.f32 1.0, %v9903_v19  ;;  %v4729_v39 = vpop.f32.mrb[118].mxu0  ;;  %v8290_v12 = vadd.f32 %v12954_v20, %v12913_v62 }
 0x563   : > { %v9907_v15 = vpop.eup %9906  ;;  %9926 = vrcp.f32 %v6050_v56  ;;  %v6056_v49 = vadd.f32 1.0, %v9905_v57  ;;  %v13010_v28 = vadd.f32 %v4729_v39, %v12907_v31  ;;  %v5051_v47 = vpop.f32.mrb[118].mxu1  ;;  %v6675_v36 = vmul.f32 -1.442695, %v8289_v61 }
 0x564   : > { %v4731_v42 = vpop.f32.mrb[119].mxu0  ;;  %v9909_v0 = vpop.eup %9908  ;;  %9928 = vrcp.f32 %v6052_v51  ;;  %v6058_v38 = vadd.f32 1.0, %v9907_v15  ;;  %v13013_v46 = vadd.f32 %v5051_v47, %v12910_v35  ;;  %v8291_v47 = vadd.f32 %v12964_v41, %v12907_v31 }
 0x565   : > { %v13016_v14 = vadd.f32 %v4731_v42, %v12913_v62  ;;  %v5053_v10 = vpop.f32.mrb[119].mxu1  ;;  %v9911_v9 = vpop.eup %9910  ;;  %9930 = vrcp.f32 %v6056_v49  ;;  %v6057_v37 = vadd.f32 1.0, %v9909_v0  ;;  %v8292_v41 = vadd.f32 %v12970_v21, %v12913_v62 }
 0x566   : > { %v13019_v26 = vadd.f32 %v5053_v10, %v12916_v11  ;;  %v9913_v17 = vpop.eup %9912  ;;  %9932 = vrcp.f32 %v6058_v38  ;;  %v6059_v23 = vadd.f32 1.0, %v9911_v9  ;;  %v4735_v60 = vpop.f32.mrb[120].mxu0  ;;  %v6677_v38 = vmul.f32 -1.442695, %v8321_v30 }
 0x567   : > { %v9915_v5 = vpop.eup %9914  ;;  %9934 = vrcp.f32 %v6057_v37  ;;  %v6063_v22 = vadd.f32 1.0, %v9913_v17  ;;  %v13022_v63 = vadd.f32 %v4735_v60, %v12907_v31  ;;  %v5057_v16 = vpop.f32.mrb[120].mxu1  ;;  %v6676_v10 = vmul.f32 -1.442695, %v8290_v12 }
 0x568   : > { %v4737_v24 = vpop.f32.mrb[121].mxu0  ;;  %v9917_v7 = vpop.eup %9916  ;;  %9936 = vrcp.f32 %v6059_v23  ;;  %v6065_v48 = vadd.f32 1.0, %v9915_v5  ;;  %v13025_v58 = vadd.f32 %v5057_v16, %v12910_v35  ;;  %v8323_v9 = vadd.f32 %v12968_v25, %v12910_v35 }
 0x569   : > { %v13028_v13 = vadd.f32 %v4737_v24, %v12913_v62  ;;  %v5059_v52 = vpop.f32.mrb[121].mxu1  ;;  %v9919_v45 = vpop.eup %9918  ;;  %9938 = vrcp.f32 %v6063_v22  ;;  %v6064_v34 = vadd.f32 1.0, %v9917_v7  ;;  %v6678_v23 = vmul.f32 -1.442695, %v8322_v2 }
 0x56a   : > { %v13033_v18 = vadd.f32 %v5059_v52, %v12916_v11  ;;  %v9921_v59 = vpop.eup %9920  ;;  %9940 = vrcp.f32 %v6065_v48  ;;  %v6066_v4 = vadd.f32 1.0, %v9919_v45  ;;  %v4741_v55 = vpop.f32.mrb[122].mxu0  ;;  %v8324_v25 = vadd.f32 %v12974_v53, %v12916_v11 }
 0x56b   : > { %v9923_v19 = vpop.eup %9922  ;;  %9942 = vrcp.f32 %v6064_v34  ;;  %v6070_v56 = vadd.f32 1.0, %v9921_v59  ;;  %v13042_v57 = vadd.f32 %v4741_v55, %v12907_v31  ;;  %v5063_v51 = vpop.f32.mrb[122].mxu1  ;;  %v6682_v48 = vmul.f32 -1.442695, %v8291_v47 }
 0x56c   : > { %v4743_v40 = vpop.f32.mrb[123].mxu0  ;;  %v9925_v39 = vpop.eup %9924  ;;  %9944 = vrcp.f32 %v6066_v4  ;;  %v6072_v43 = vadd.f32 1.0, %v9923_v19  ;;  %v13045_v15 = vadd.f32 %v5063_v51, %v12910_v35  ;;  %v8293_v52 = vadd.f32 %v12979_v33, %v12907_v31 }
 0x56d   : > { %v13048_v20 = vadd.f32 %v4743_v40, %v12913_v62  ;;  %v5065_v49 = vpop.f32.mrb[123].mxu1  ;;  %v9927_v54 = vpop.eup %9926  ;;  %6387 = vst [vmem:[%s12941_s22 + $0xb8] sm:$0xff] %v9925_v39  ;;  %9946 = vrcp.f32 %v6070_v56  ;;  %v6684_v45 = vmul.f32 -1.442695, %v8323_v9  ;;  %v8325_v34 = vadd.f32 %v12982_v29, %v12910_v35 }
 0x56e   : > { %v13054_v42 = vadd.f32 %v5065_v49, %v12916_v11  ;;  %v9929_v0 = vpop.eup %9928  ;;  %6386 = vst [vmem:[%s12941_s22 + $0xb0] sm:$0xff] %v9927_v54  ;;  %9948 = vrcp.f32 %v6072_v43  ;;  %v4747_v37 = vpop.f32.mrb[124].mxu0  ;;  %v6683_v4 = vmul.f32 -1.442695, %v8292_v41  ;;  %v8294_v33 = vadd.f32 %v12984_v1, %v12913_v62 }
 0x56f   : > { %v9931_v17 = vpop.eup %9930  ;;  %6388 = vst [vmem:[%s12941_s22 + $0xc0] sm:$0xff] %v9929_v0  ;;  %9950 = vpow2.f32 %v6669_v44  ;;  %v13063_v60 = vadd.f32 %v4747_v37, %v12907_v31  ;;  %v5069_v5 = vpop.f32.mrb[124].mxu1  ;;  %v6685_v29 = vmul.f32 -1.442695, %v8324_v25  ;;  %v6691_v43 = vmul.f32 -1.442695, %v8325_v34 }
 0x570   : > { %v4749_v22 = vpop.f32.mrb[125].mxu0  ;;  %v9933_v16 = vpop.eup %9932  ;;  %6392 = vst [vmem:[%s12941_s22 + $0xe0] sm:$0xff] %v9931_v17  ;;  %9952 = vpow2.f32 %v6671_v8  ;;  %v13069_v24 = vadd.f32 %v5069_v5, %v12910_v35 }
 0x571   : > { %v13072_v44 = vadd.f32 %v4749_v22, %v12913_v62  ;;  %v5071_v21 = vpop.f32.mrb[125].mxu1  ;;  %v9935_v7 = vpop.eup %9934  ;;  %6394 = vst [vmem:[%s12941_s22 + $0xf0] sm:$0xff] %v9933_v16  ;;  %9954 = vpow2.f32 %v6675_v36 }
 0x572   : > { %v13078_v8 = vadd.f32 %v5071_v21, %v12916_v11  ;;  %v9937_v53 = vpop.eup %9936  ;;  %6393 = vst [vmem:[%s12941_s22 + $0xe8] sm:$0xff] %v9935_v7  ;;  %9956 = vpow2.f32 %v6677_v38  ;;  %v4753_v61 = vpop.f32.mrb[126].mxu0 }
 0x573   : > { %v9939_v59 = vpop.eup %9938  ;;  %6395 = vst [vmem:[%s12941_s22 + $0xf8] sm:$0xff] %v9937_v53  ;;  %9958 = vpow2.f32 %v6676_v10  ;;  %v13087_v30 = vadd.f32 %v4753_v61, %v12907_v31  ;;  %v5075_v12 = vpop.f32.mrb[126].mxu1  ;;  %v6689_v31 = vmul.f32 -1.442695, %v8293_v52 }
 0x574   : > { %v4755_v55 = vpop.f32.mrb[127].mxu0  ;;  %v9941_v19 = vpop.eup %9940  ;;  %6399 = vst [vmem:[%s12941_s22 + $0x118] sm:$0xff] %v9939_v59  ;;  %9960 = vpow2.f32 %v6678_v23  ;;  %v13091_v56 = vadd.f32 %v5075_v12, %v12910_v35  ;;  %v6690_v35 = vmul.f32 -1.442695, %v8294_v33 }
 0x575   : > { %v13094_v2 = vadd.f32 %v4755_v55, %v12913_v62  ;;  %v5077_v51 = vpop.f32.mrb[127].mxu1  ;;  %v9943_v1 = vpop.eup %9942  ;;  %6401 = vst [vmem:[%s12941_s22 + $0x128] sm:$0xff] %v9941_v19  ;;  %9962 = vpow2.f32 %v6682_v48 }
 0x576   : > { %v13098_v40 = vadd.f32 %v5077_v51, %v12916_v11  ;;  %v9945_v39 = vpop.eup %9944  ;;  %6400 = vst [vmem:[%s12941_s22 + $0x120] sm:$0xff] %v9943_v1  ;;  %9964 = vpow2.f32 %v6684_v45 }
 0x577   : > { %v9947_v49 = vpop.eup %9946  ;;  %6402 = vst [vmem:[%s12941_s22 + $0x130] sm:$0xff] %v9945_v39  ;;  %9966 = vpow2.f32 %v6683_v4  ;;  %v7091_v62 = vpop.f32.mrb[128].mxu1 }
 0x578   : > { %v9949_v54 = vpop.eup %9948  ;;  %6406 = vst [vmem:[%s12941_s22 + $0x150] sm:$0xff] %v9947_v49  ;;  %9968 = vpow2.f32 %v6685_v29  ;;  %v7092_v36 = vpop.f32.mrb[129].mxu1  ;;  %v6692_v49 = vmul.f32 -1.442695, %v12989_v27  ;;  %v6697_v27 = vmul.f32 -1.442695, %v13000_v50 }
 0x579   : > { %v9951_v47 = vpop.eup %9950  ;;  %6408 = vst [vmem:[%s12941_s22 + $0x160] sm:$0xff] %v9949_v54  ;;  %9970 = vpow2.f32 %v6689_v31  ;;  %v13104_v0 = vadd.f32 %v7092_v36, %v7091_v62  ;;  %v6696_v36 = vmul.f32 -1.442695, %v12994_v32  ;;  %v6699_v32 = vmul.f32 -1.442695, %v13003_v3 }
 0x57a   : > { %v9953_v11 = vpop.eup %9952  ;;  %v6071_v38 = vadd.f32 1.0, %v9951_v47  ;;  %9972 = vpow2.f32 %v6691_v43  ;;  %v6705_v50 = vmul.f32 -1.442695, %v13013_v46  ;;  %v6704_v3 = vmul.f32 -1.442695, %v13016_v14 }
 0x57b   : > { %v9955_v10 = vpop.eup %9954  ;;  %v6073_v9 = vadd.f32 1.0, %v9953_v11  ;;  %9974 = vpow2.f32 %v6690_v35  ;;  %v7094_v37 = vpop.f32.mrb[130].mxu1  ;;  %v6698_v11 = vmul.f32 -1.442695, %v12997_v6  ;;  %v6703_v6 = vmul.f32 -1.442695, %v13010_v28 }
 0x57c   : > { %v9957_v17 = vpop.eup %9956  ;;  %9976 = vrcp.f32 %v6071_v38  ;;  %v6077_v23 = vadd.f32 1.0, %v9955_v10  ;;  %v7095_v41 = vpop.f32.mrb[131].mxu1  ;;  %v6706_v28 = vmul.f32 -1.442695, %v13019_v26  ;;  %v6710_v46 = vmul.f32 -1.442695, %v13022_v63 }
 0x57d   : > { %v9959_v5 = vpop.eup %9958  ;;  %9978 = vrcp.f32 %v6073_v9  ;;  %v6079_v22 = vadd.f32 1.0, %v9957_v17  ;;  %v13106_v16 = vadd.f32 %v7095_v41, %v7094_v37  ;;  %v6712_v14 = vmul.f32 -1.442695, %v13025_v58 }
 0x57e   : > { %v9961_v25 = vpop.eup %9960  ;;  %9980 = vrcp.f32 %v6077_v23  ;;  %v6078_v21 = vadd.f32 1.0, %v9959_v5  ;;  %v6711_v26 = vmul.f32 -1.442695, %v13028_v13 }
 0x57f   : > { %v9963_v7 = vpop.eup %9962  ;;  %9982 = vrcp.f32 %v6079_v22  ;;  %v6080_v48 = vadd.f32 1.0, %v9961_v25  ;;  %v7097_v52 = vpop.f32.mrb[132].mxu1 }
 0x580   : > { %v9965_v53 = vpop.eup %9964  ;;  %9984 = vrcp.f32 %v6078_v21  ;;  %v6084_v45 = vadd.f32 1.0, %v9963_v7  ;;  %v7098_v34 = vpop.f32.mrb[133].mxu1 }
 0x581   : > { %v9967_v61 = vpop.eup %9966  ;;  %9986 = vrcp.f32 %v6080_v48  ;;  %v6086_v59 = vadd.f32 1.0, %v9965_v53  ;;  %v13108_v4 = vadd.f32 %v7098_v34, %v7097_v52 }
 0x582   : > { %v9969_v33 = vpop.eup %9968  ;;  %9988 = vrcp.f32 %v6084_v45  ;;  %v6085_v12 = vadd.f32 1.0, %v9967_v61 }
 0x583   : > { %v9971_v55 = vpop.eup %9970  ;;  %9990 = vrcp.f32 %v6086_v59  ;;  %v6087_v19 = vadd.f32 1.0, %v9969_v33  ;;  %v7100_v29 = vpop.f32.mrb[134].mxu1  ;;  %v6713_v59 = vmul.f32 -1.442695, %v13033_v18 }
 0x584   : > { %v9973_v51 = vpop.eup %9972  ;;  %9992 = vrcp.f32 %v6085_v12  ;;  %v6091_v1 = vadd.f32 1.0, %v9971_v55  ;;  %v7101_v31 = vpop.f32.mrb[135].mxu1 }
 0x585   : > { %v9975_v39 = vpop.eup %9974  ;;  %9994 = vrcp.f32 %v6087_v19  ;;  %v6093_v43 = vadd.f32 1.0, %v9973_v51  ;;  %v13111_v35 = vadd.f32 %v7101_v31, %v7100_v29 }
 0x586   : > { %v9977_v62 = vpop.eup %9976  ;;  %9996 = vrcp.f32 %v6091_v1  ;;  %v6092_v54 = vadd.f32 1.0, %v9975_v39 }
 0x587   : > { %v9979_v47 = vpop.eup %9978  ;;  %6407 = vst [vmem:[%s12941_s22 + $0x158] sm:$0xff] %v9977_v62  ;;  %9998 = vrcp.f32 %v6093_v43  ;;  %v7103_v38 = vpop.f32.mrb[136].mxu1 }
 0x588   : > { %v9981_v10 = vpop.eup %9980  ;;  %6409 = vst [vmem:[%s12941_s22 + $0x168] sm:$0xff] %v9979_v47  ;;  %10000 = vrcp.f32 %v6092_v54  ;;  %v7104_v9 = vpop.f32.mrb[137].mxu1 }
 0x589   : > { %v9983_v37 = vpop.eup %9982  ;;  %6413 = vst [vmem:[%s12941_s22 + $0x188] sm:$0xff] %v9981_v10  ;;  %10002 = vpow2.f32 %v6692_v49  ;;  %v13120_v17 = vadd.f32 %v7104_v9, %v7103_v38 }
 0x58a   : > { %v9985_v23 = vpop.eup %9984  ;;  %6415 = vst [vmem:[%s12941_s22 + $0x198] sm:$0xff] %v9983_v37  ;;  %10004 = vpow2.f32 %v6696_v36 }
 0x58b   : > { %v9987_v41 = vpop.eup %9986  ;;  %6414 = vst [vmem:[%s12941_s22 + $0x190] sm:$0xff] %v9985_v23  ;;  %10006 = vpow2.f32 %v6698_v11  ;;  %v7106_v5 = vpop.f32.mrb[138].mxu1 }
 0x58c   : > { %v9989_v22 = vpop.eup %9988  ;;  %6416 = vst [vmem:[%s12941_s22 + $0x1a0] sm:$0xff] %v9987_v41  ;;  %10008 = vpow2.f32 %v6697_v27  ;;  %v7107_v25 = vpop.f32.mrb[139].mxu1 }
 0x58d   : > { %v9991_v21 = vpop.eup %9990  ;;  %6420 = vst [vmem:[%s12941_s22 + $0x1c0] sm:$0xff] %v9989_v22  ;;  %10010 = vpow2.f32 %v6699_v32  ;;  %v13130_v7 = vadd.f32 %v7107_v25, %v7106_v5 }
 0x58e   : > { %v9993_v48 = vpop.eup %9992  ;;  %6422 = vst [vmem:[%s12941_s22 + $0x1d0] sm:$0xff] %v9991_v21  ;;  %10012 = vpow2.f32 %v6703_v6 }
 0x58f   : > { %v9995_v52 = vpop.eup %9994  ;;  %6421 = vst [vmem:[%s12941_s22 + $0x1c8] sm:$0xff] %v9993_v48  ;;  %10014 = vpow2.f32 %v6705_v50  ;;  %v7109_v53 = vpop.f32.mrb[140].mxu1  ;;  %v6717_v48 = vmul.f32 -1.442695, %v13042_v57  ;;  %v6720_v57 = vmul.f32 -1.442695, %v13054_v42 }
 0x590   : > { %v9997_v45 = vpop.eup %9996  ;;  %6423 = vst [vmem:[%s12941_s22 + $0x1d8] sm:$0xff] %v9995_v52  ;;  %10016 = vpow2.f32 %v6704_v3  ;;  %v7110_v34 = vpop.f32.mrb[141].mxu1  ;;  %v6725_v42 = vmul.f32 -1.442695, %v13072_v44  ;;  %v6733_v44 = vmul.f32 -1.442695, %v13091_v56 }
 0x591   : > { %v9999_v61 = vpop.eup %9998  ;;  %6427 = vst [vmem:[%s12941_s22 + $0x1f8] sm:$0xff] %v9997_v45  ;;  %10018 = vpow2.f32 %v6706_v28  ;;  %v13140_v63 = vadd.f32 %v7110_v34, %v7109_v53  ;;  %v6719_v53 = vmul.f32 -1.442695, %v13045_v15  ;;  %v6718_v34 = vmul.f32 -1.442695, %v13048_v20 }
 0x592   : > { %v10001_v33 = vpop.eup %10000  ;;  %6429 = vst [vmem:[%s12941_s22 + $0x208] sm:$0xff] %v9999_v61  ;;  %10020 = vpow2.f32 %v6710_v46  ;;  %v6724_v15 = vmul.f32 -1.442695, %v13063_v60  ;;  %v6726_v20 = vmul.f32 -1.442695, %v13069_v24 }
 0x593   : > { %v10003_v12 = vpop.eup %10002  ;;  %6428 = vst [vmem:[%s12941_s22 + $0x200] sm:$0xff] %v10001_v33  ;;  %10022 = vpow2.f32 %v6712_v14  ;;  %v7112_v58 = vpop.f32.mrb[142].mxu1  ;;  %v6731_v24 = vmul.f32 -1.442695, %v13087_v30  ;;  %v6734_v56 = vmul.f32 -1.442695, %v13098_v40 }
 0x594   : > { %v10005_v55 = vpop.eup %10004  ;;  %v6094_v19 = vadd.f32 1.0, %v10003_v12  ;;  %10024 = vpow2.f32 %v6711_v26  ;;  %v7113_v29 = vpop.f32.mrb[143].mxu1 }
 0x595   : > { %v10007_v13 = vpop.eup %10006  ;;  %v6098_v51 = vadd.f32 1.0, %v10005_v55  ;;  %10026 = vpow2.f32 %v6713_v59  ;;  %v13144_v1 = vadd.f32 %v7113_v29, %v7112_v58  ;;  %v13480_v29 = vld [vmem:[#allocation2_spill] sm:$0xff] }
 0x596   : > { %v10009_v31 = vpop.eup %10008  ;;  %10028 = vrcp.f32 %v6094_v19  ;;  %v6100_v18 = vadd.f32 1.0, %v10007_v13  ;;  %v4427_v13 = vsub.s32 6, %v13480_v29 }
 0x597   : > { %v10011_v39 = vpop.eup %10010  ;;  %10030 = vrcp.f32 %v6098_v51  ;;  %v6099_v43 = vadd.f32 1.0, %v10009_v31  ;;  %v7115_v49 = vpop.f32.mrb[144].mxu1  ;;  %v6727_v31 = vmul.f32 -1.442695, %v13078_v8  ;;  %v6732_v8 = vmul.f32 -1.442695, %v13094_v2 }
 0x598   : > { %v10013_v62 = vpop.eup %10012  ;;  %10032 = vrcp.f32 %v6100_v18  ;;  %v6101_v54 = vadd.f32 1.0, %v10011_v39  ;;  %v7116_v36 = vpop.f32.mrb[145].mxu1 }
 0x599   : > { %v10015_v47 = vpop.eup %10014  ;;  %10034 = vrcp.f32 %v6099_v43  ;;  %v6105_v11 = vadd.f32 1.0, %v10013_v62  ;;  %v13146_v38 = vadd.f32 %v7116_v36, %v7115_v49 }
 0x59a   : > { %v10017_v10 = vpop.eup %10016  ;;  %10036 = vrcp.f32 %v6101_v54  ;;  %v6107_v27 = vadd.f32 1.0, %v10015_v47  ;;  %v10294_v54 = vld [vmem:[%s13401_s9] sm:$0xff] }
 0x59b   : > { %v10019_v9 = vpop.eup %10018  ;;  %10038 = vrcp.f32 %v6105_v11  ;;  %v6106_v37 = vadd.f32 1.0, %v10017_v10  ;;  %v7118_v32 = vpop.f32.mrb[146].mxu1  ;;  %v13178_v36 = vrot.slane %v10294_v54, %v4427_v13 }
 0x59c   : > { %v10021_v23 = vpop.eup %10020  ;;  %10040 = vrcp.f32 %v6107_v27  ;;  %v6108_v6 = vadd.f32 1.0, %v10019_v9  ;;  %v7119_v41 = vpop.f32.mrb[147].mxu1 }
 0x59d   : > { %v10023_v50 = vpop.eup %10022  ;;  %10042 = vrcp.f32 %v6106_v37  ;;  %v6112_v5 = vadd.f32 1.0, %v10021_v23  ;;  %v13148_v22 = vadd.f32 %v7119_v41, %v7118_v32 }
 0x59e   : > { %v10025_v3 = vpop.eup %10024  ;;  %10044 = vrcp.f32 %v6108_v6  ;;  %v6114_v25 = vadd.f32 1.0, %v10023_v50 }
 0x59f   : > { %v10027_v21 = vpop.eup %10026  ;;  %10046 = vrcp.f32 %v6112_v5  ;;  %v6113_v28 = vadd.f32 1.0, %v10025_v3  ;;  %v7121_v46 = vpop.f32.mrb[148].mxu1 }
 0x5a0   : > { %v10029_v52 = vpop.eup %10028  ;;  %10048 = vrcp.f32 %v6114_v25  ;;  %v6115_v14 = vadd.f32 1.0, %v10027_v21  ;;  %v7122_v45 = vpop.f32.mrb[149].mxu1 }
 0x5a1   : > { %v10031_v26 = vpop.eup %10030  ;;  %6430 = vst [vmem:[%s12941_s22 + $0x210] sm:$0xff] %v10029_v52  ;;  %10050 = vrcp.f32 %v6113_v28  ;;  %v13154_v61 = vadd.f32 %v7122_v45, %v7121_v46  ;;  %v4419_v28 = vsub.s32 4, %v13480_v29 }
 0x5a2   : > { %v10033_v59 = vpop.eup %10032  ;;  %6434 = vst [vmem:[%s12941_s22 + $0x230] sm:$0xff] %v10031_v26  ;;  %10052 = vrcp.f32 %v6115_v14  ;;  %v4423_v14 = vsub.s32 5, %v13480_v29 }
 0x5a3   : > { %v10035_v33 = vpop.eup %10034  ;;  %6436 = vst [vmem:[%s12941_s22 + $0x240] sm:$0xff] %v10033_v59  ;;  %10054 = vpow2.f32 %v6717_v48  ;;  %v7124_v12 = vpop.f32.mrb[150].mxu1 }
 0x5a4   : > { %v10037_v58 = vpop.eup %10036  ;;  %6435 = vst [vmem:[%s12941_s22 + $0x238] sm:$0xff] %v10035_v33  ;;  %10056 = vpow2.f32 %v6719_v53  ;;  %v7125_v55 = vpop.f32.mrb[151].mxu1 }
 0x5a5   : > { %v10039_v19 = vpop.eup %10038  ;;  %6437 = vst [vmem:[%s12941_s22 + $0x248] sm:$0xff] %v10037_v58  ;;  %10058 = vpow2.f32 %v6718_v34  ;;  %v13165_v51 = vadd.f32 %v7125_v55, %v7124_v12  ;;  %v13196_v58 = vrot.slane %v10294_v54, %v4419_v28 }
 0x5a6   : > { %v10041_v60 = vpop.eup %10040  ;;  %6441 = vst [vmem:[%s12941_s22 + $0x268] sm:$0xff] %v10039_v19  ;;  %10060 = vpow2.f32 %v6720_v57 }
 0x5a7   : > { %v10043_v18 = vpop.eup %10042  ;;  %6443 = vst [vmem:[%s12941_s22 + $0x278] sm:$0xff] %v10041_v60  ;;  %10062 = vpow2.f32 %v6724_v15  ;;  %v7127_v39 = vpop.f32.mrb[152].mxu1 }
 0x5a8   : > { %v10045_v43 = vpop.eup %10044  ;;  %6442 = vst [vmem:[%s12941_s22 + $0x270] sm:$0xff] %v10043_v18  ;;  %10064 = vpow2.f32 %v6726_v20  ;;  %v7128_v49 = vpop.f32.mrb[153].mxu1 }
 0x5a9   : > { %v10047_v62 = vpop.eup %10046  ;;  %6444 = vst [vmem:[%s12941_s22 + $0x280] sm:$0xff] %v10045_v43  ;;  %10066 = vpow2.f32 %v6725_v42  ;;  %v7129_v30 = vadd.f32 %v7128_v49, %v7127_v39  ;;  %v13198_v42 = vrot.slane %v10294_v54, %v4423_v14  ;;  %v5469_v49 = vadd.f32 %v13104_v0, %v13178_v36 }
 0x5aa   : > { %v10049_v47 = vpop.eup %10048  ;;  %6448 = vst [vmem:[%s12941_s22 + $0x2a0] sm:$0xff] %v10047_v62  ;;  %10068 = vpow2.f32 %v6727_v31 }
 0x5ab   : > { %v10051_v11 = vpop.eup %10050  ;;  %6450 = vst [vmem:[%s12941_s22 + $0x2b0] sm:$0xff] %v10049_v47  ;;  %10070 = vpow2.f32 %v6731_v24  ;;  %v13184_v10 = vadd.f32 %v7129_v30, %v13178_v36  ;;  %v7130_v2 = vpop.f32.mrb[154].mxu1 }
 0x5ac   : > { %v10053_v27 = vpop.eup %10052  ;;  %6449 = vst [vmem:[%s12941_s22 + $0x2a8] sm:$0xff] %v10051_v11  ;;  %10072 = vpow2.f32 %v6733_v44  ;;  %v7131_v9 = vpop.f32.mrb[155].mxu1 }
 0x5ad   : > { %v10055_v37 = vpop.eup %10054  ;;  %6451 = vst [vmem:[%s12941_s22 + $0x2b8] sm:$0xff] %v10053_v27  ;;  %10074 = vpow2.f32 %v6732_v8  ;;  %v7132_v32 = vadd.f32 %v7131_v9, %v7130_v2 }
 0x5ae   : > { %v10057_v23 = vpop.eup %10056  ;;  %v6119_v6 = vadd.f32 1.0, %v10055_v37  ;;  %10076 = vpow2.f32 %v6734_v56 }
 0x5af   : > { %v10059_v41 = vpop.eup %10058  ;;  %v6121_v40 = vadd.f32 1.0, %v10057_v23  ;;  %v13189_v50 = vadd.f32 %v7132_v32, %v13178_v36  ;;  %v7133_v5 = vpop.f32.mrb[156].mxu1 }
 0x5b0   : > { %v10061_v3 = vpop.eup %10060  ;;  %10078 = vrcp.f32 %v6119_v6  ;;  %v6120_v25 = vadd.f32 1.0, %v10059_v41  ;;  %v7134_v21 = vpop.f32.mrb[157].mxu1  ;;  %v5474_v6 = vadd.f32 %v13106_v16, %v13178_v36 }
 0x5b1   : > { %v10063_v48 = vpop.eup %10062  ;;  %10080 = vrcp.f32 %v6121_v40  ;;  %v6122_v46 = vadd.f32 1.0, %v10061_v3  ;;  %v7135_v52 = vadd.f32 %v7134_v21, %v7133_v5 }
 0x5b2   : > { %v10065_v53 = vpop.eup %10064  ;;  %10082 = vrcp.f32 %v6120_v25  ;;  %v6126_v45 = vadd.f32 1.0, %v10063_v48 }
 0x5b3   : > { %v10067_v26 = vpop.eup %10066  ;;  %10084 = vrcp.f32 %v6122_v46  ;;  %v6128_v34 = vadd.f32 1.0, %v10065_v53  ;;  %v13194_v59 = vadd.f32 %v7135_v52, %v13178_v36  ;;  %v7136_v57 = vpop.f32.mrb[158].mxu1 }
 0x5b4   : > { %v10069_v33 = vpop.eup %10068  ;;  %10086 = vrcp.f32 %v6126_v45  ;;  %v6127_v15 = vadd.f32 1.0, %v10067_v26  ;;  %v7137_v12 = vpop.f32.mrb[159].mxu1 }
 0x5b5   : > { %v10071_v20 = vpop.eup %10070  ;;  %10088 = vrcp.f32 %v6128_v34  ;;  %v6129_v55 = vadd.f32 1.0, %v10069_v33  ;;  %v7138_v19 = vadd.f32 %v7137_v12, %v7136_v57  ;;  %v5479_v34 = vadd.f32 %v13108_v4, %v13178_v36 }
 0x5b6   : > { %v10073_v29 = vpop.eup %10072  ;;  %10090 = vrcp.f32 %v6127_v15  ;;  %v6133_v13 = vadd.f32 1.0, %v10071_v20 }
 0x5b7   : > { %v10075_v60 = vpop.eup %10074  ;;  %10092 = vrcp.f32 %v6129_v55  ;;  %v6135_v31 = vadd.f32 1.0, %v10073_v29  ;;  %v13201_v18 = vadd.f32 %v7138_v19, %v13178_v36  ;;  %v5307_v24 = vpop.f32.mrb[128].mxu0 }
 0x5b8   : > { %v7171_v39 = vpop.f32.mrb[160].mxu1  ;;  %v10077_v43 = vpop.eup %10076  ;;  %10094 = vrcp.f32 %v6133_v13  ;;  %v6134_v44 = vadd.f32 1.0, %v10075_v60  ;;  %v8339_v62 = vadd.f32 %v5307_v24, %v13196_v58 }
 0x5b9   : > { %v5309_v8 = vpop.f32.mrb[129].mxu0  ;;  %v7172_v54 = vpop.f32.mrb[161].mxu1  ;;  %10096 = vrcp.f32 %v6135_v31  ;;  %v6136_v30 = vadd.f32 1.0, %v10077_v43 }
 0x5ba   : > { %v8340_v47 = vadd.f32 %v5309_v8, %v13198_v42  ;;  %v7173_v56 = vadd.f32 %v7172_v54, %v7171_v39  ;;  %v10079_v11 = vpop.eup %10078  ;;  %10098 = vrcp.f32 %v6134_v44  ;;  %v6630_v2 = vmul.f32 -1.442695, %v8339_v62 }
 0x5bb   : > { %v10081_v27 = vpop.eup %10080  ;;  %6455 = vst [vmem:[%s12941_s22 + $0x2d8] sm:$0xff] %v10079_v11  ;;  %10100 = vrcp.f32 %v6136_v30  ;;  %v5313_v0 = vpop.f32.mrb[130].mxu0  ;;  %v5484_v44 = vadd.f32 %v13111_v35, %v13178_v36 }
 0x5bc   : > { %v6631_v9 = vmul.f32 -1.442695, %v8340_v47  ;;  %v5614_v37 = vadd.f32 %v7173_v56, %v5469_v49  ;;  %v7174_v32 = vpop.f32.mrb[162].mxu1  ;;  %v10083_v23 = vpop.eup %10082  ;;  %6457 = vst [vmem:[%s12941_s22 + $0x2e8] sm:$0xff] %v10081_v27  ;;  %10102 = vpow2.f32 %v6630_v2  ;;  %v8341_v41 = vadd.f32 %v5313_v0, %v13196_v58 }
 0x5bd   : > { %v5315_v40 = vpop.f32.mrb[131].mxu0  ;;  %v7175_v5 = vpop.f32.mrb[163].mxu1  ;;  %6456 = vst [vmem:[%s12941_s22 + $0x2e0] sm:$0xff] %v10083_v23 }
 0x5be   : > { %v10085_v3 = vpop.eup %10084  ;;  %10104 = vpow2.f32 %v6631_v9  ;;  %v6632_v25 = vmul.f32 -1.442695, %v5614_v37  ;;  %v8342_v21 = vadd.f32 %v5315_v40, %v13198_v42  ;;  %v7176_v28 = vadd.f32 %v7175_v5, %v7174_v32 }
 0x5bf   : > { %v10087_v48 = vpop.eup %10086  ;;  %6458 = vst [vmem:[%s12941_s22 + $0x2f0] sm:$0xff] %v10085_v3  ;;  %v6637_v46 = vmul.f32 -1.442695, %v8341_v41  ;;  %v5319_v53 = vpop.f32.mrb[132].mxu0  ;;  %v5489_v5 = vadd.f32 %v13120_v17, %v13178_v36  ;;  %v5494_v17 = vadd.f32 %v13130_v7, %v13178_v36  ;;  %v5499_v7 = vadd.f32 %v13140_v63, %v13178_v36 }
 0x5c0   : > { %v10089_v52 = vpop.eup %10088  ;;  %6462 = vst [vmem:[%s12941_s22 + $0x310] sm:$0xff] %v10087_v48  ;;  %10106 = vpow2.f32 %v6632_v25  ;;  %v6638_v16 = vmul.f32 -1.442695, %v8342_v21  ;;  %v5619_v14 = vadd.f32 %v7176_v28, %v5474_v6  ;;  %v7177_v45 = vpop.f32.mrb[164].mxu1  ;;  %v8343_v57 = vadd.f32 %v5319_v53, %v13196_v58 }
 0x5c1   : > { %v10091_v26 = vpop.eup %10090  ;;  %6464 = vst [vmem:[%s12941_s22 + $0x320] sm:$0xff] %v10089_v52  ;;  %10108 = vpow2.f32 %v6637_v46  ;;  %v5321_v33 = vpop.f32.mrb[133].mxu0 }
 0x5c2   : > { %v7178_v15 = vpop.f32.mrb[165].mxu1  ;;  %v10093_v12 = vpop.eup %10092  ;;  %6463 = vst [vmem:[%s12941_s22 + $0x318] sm:$0xff] %v10091_v26  ;;  %10110 = vpow2.f32 %v6638_v16  ;;  %v6639_v20 = vmul.f32 -1.442695, %v5619_v14  ;;  %v8344_v55 = vadd.f32 %v5321_v33, %v13198_v42  ;;  %v6644_v13 = vmul.f32 -1.442695, %v8343_v57 }
 0x5c3   : > { %v7179_v19 = vadd.f32 %v7178_v15, %v7177_v45  ;;  %v10095_v29 = vpop.eup %10094  ;;  %6465 = vst [vmem:[%s12941_s22 + $0x328] sm:$0xff] %v10093_v12  ;;  %v5325_v24 = vpop.f32.mrb[134].mxu0 }
 0x5c4   : > { %v10097_v60 = vpop.eup %10096  ;;  %6469 = vst [vmem:[%s12941_s22 + $0x348] sm:$0xff] %v10095_v29  ;;  %10112 = vpow2.f32 %v6639_v20  ;;  %v6645_v4 = vmul.f32 -1.442695, %v8344_v55  ;;  %v7180_v39 = vpop.f32.mrb[166].mxu1  ;;  %v8345_v49 = vadd.f32 %v5325_v24, %v13196_v58 }
 0x5c5   : > { %v5624_v31 = vadd.f32 %v7179_v19, %v5479_v34  ;;  %v10099_v43 = vpop.eup %10098  ;;  %6471 = vst [vmem:[%s12941_s22 + $0x358] sm:$0xff] %v10097_v60  ;;  %10114 = vpow2.f32 %v6644_v13  ;;  %v5327_v62 = vpop.f32.mrb[135].mxu0 }
 0x5c6   : > { %v7181_v8 = vpop.f32.mrb[167].mxu1  ;;  %v10101_v54 = vpop.eup %10100  ;;  %6470 = vst [vmem:[%s12941_s22 + $0x350] sm:$0xff] %v10099_v43  ;;  %10116 = vpow2.f32 %v6645_v4  ;;  %v8346_v47 = vadd.f32 %v5327_v62, %v13198_v42  ;;  %v6651_v2 = vmul.f32 -1.442695, %v8345_v49 }
 0x5c7   : > { %v6646_v30 = vmul.f32 -1.442695, %v5624_v31  ;;  %v7182_v56 = vadd.f32 %v7181_v8, %v7180_v39  ;;  %v10103_v11 = vpop.eup %10102  ;;  %6472 = vst [vmem:[%s12941_s22 + $0x360] sm:$0xff] %v10101_v54  ;;  %v5331_v0 = vpop.f32.mrb[136].mxu0 }
 0x5c8   : > { %v10105_v27 = vpop.eup %10104  ;;  %v6032_v9 = vadd.f32 1.0, %v10103_v11  ;;  %v6652_v37 = vmul.f32 -1.442695, %v8346_v47  ;;  %v7183_v32 = vpop.f32.mrb[168].mxu1  ;;  %v8347_v28 = vadd.f32 %v5331_v0, %v13196_v58 }
 0x5c9   : > { %10118 = vpow2.f32 %v6646_v30  ;;  %v5629_v35 = vadd.f32 %v7182_v56, %v5484_v44  ;;  %v6033_v23 = vadd.f32 1.0, %v10105_v27  ;;  %v5333_v6 = vpop.f32.mrb[137].mxu0  ;;  %v7184_v41 = vpop.f32.mrb[169].mxu1 }
 0x5ca   : > { %10120 = vpow2.f32 %v6651_v2  ;;  %v10107_v40 = vpop.eup %10106  ;;  %v7185_v3 = vadd.f32 %v7184_v41, %v7183_v32  ;;  %v8348_v20 = vadd.f32 %v5333_v6, %v13198_v42  ;;  %v6658_v29 = vmul.f32 -1.442695, %v8347_v28 }
 0x5cb   : > { %10122 = vrcp.f32 %v6032_v9  ;;  %v10109_v25 = vpop.eup %10108  ;;  %v6034_v21 = vadd.f32 1.0, %v10107_v40  ;;  %v6653_v52 = vmul.f32 -1.442695, %v5629_v35  ;;  %v5337_v14 = vpop.f32.mrb[138].mxu0 }
 0x5cc   : > { %10124 = vrcp.f32 %v6033_v23  ;;  %v10111_v48 = vpop.eup %10110  ;;  %v6039_v46 = vadd.f32 1.0, %v10109_v25  ;;  %v5634_v16 = vadd.f32 %v7185_v3, %v5489_v5  ;;  %v7186_v53 = vpop.f32.mrb[170].mxu1  ;;  %v8349_v44 = vadd.f32 %v5337_v14, %v13196_v58 }
 0x5cd   : > { %10126 = vpow2.f32 %v6652_v37  ;;  %v6040_v45 = vadd.f32 1.0, %v10111_v48  ;;  %v5339_v26 = vpop.f32.mrb[139].mxu0  ;;  %v7187_v34 = vpop.f32.mrb[171].mxu1  ;;  %v6659_v54 = vmul.f32 -1.442695, %v8348_v20  ;;  %v5504_v37 = vadd.f32 %v13144_v1, %v13178_v36 }
 0x5ce   : > { %10128 = vrcp.f32 %v6034_v21  ;;  %v10113_v57 = vpop.eup %10112  ;;  %v7188_v33 = vadd.f32 %v7187_v34, %v7186_v53  ;;  %v8350_v30 = vadd.f32 %v5339_v26, %v13198_v42  ;;  %v6660_v11 = vmul.f32 -1.442695, %v5634_v16 }
 0x5cf   : > { %10130 = vrcp.f32 %v6039_v46  ;;  %v10115_v15 = vpop.eup %10114  ;;  %v6041_v12 = vadd.f32 1.0, %v10113_v57  ;;  %v5343_v60 = vpop.f32.mrb[140].mxu0  ;;  %v6665_v23 = vmul.f32 -1.442695, %v8349_v44  ;;  %v5509_v16 = vadd.f32 %v13146_v38, %v13178_v36 }
 0x5d0   : > { %10132 = vrcp.f32 %v6040_v45  ;;  %v10117_v55 = vpop.eup %10116  ;;  %v6046_v19 = vadd.f32 1.0, %v10115_v15  ;;  %v5639_v13 = vadd.f32 %v7188_v33, %v5494_v17  ;;  %v7189_v4 = vpop.f32.mrb[172].mxu1  ;;  %v8351_v6 = vadd.f32 %v5343_v60, %v13196_v58 }
 0x5d1   : > { %10134 = vpow2.f32 %v6653_v52  ;;  %v6047_v31 = vadd.f32 1.0, %v10117_v55  ;;  %v5345_v24 = vpop.f32.mrb[141].mxu0  ;;  %v7190_v39 = vpop.f32.mrb[173].mxu1  ;;  %v6666_v3 = vmul.f32 -1.442695, %v8350_v30 }
 0x5d2   : > { %10136 = vrcp.f32 %v6041_v12  ;;  %v7191_v49 = vadd.f32 %v7190_v39, %v7189_v4  ;;  %v8352_v1 = vadd.f32 %v5345_v24, %v13198_v42  ;;  %v6667_v21 = vmul.f32 -1.442695, %v5639_v13 }
 0x5d3   : > { %v10119_v43 = vpop.eup %10118  ;;  %10138 = vrcp.f32 %v6046_v19  ;;  %v5349_v27 = vpop.f32.mrb[142].mxu0  ;;  %v6672_v26 = vmul.f32 -1.442695, %v8351_v6  ;;  %v5514_v24 = vadd.f32 %v13148_v22, %v13178_v36 }
 0x5d4   : > { %v10121_v62 = vpop.eup %10120  ;;  %10140 = vrcp.f32 %v6047_v31  ;;  %v6048_v8 = vadd.f32 1.0, %v10119_v43  ;;  %v5644_v2 = vadd.f32 %v7191_v49, %v5499_v7  ;;  %v7192_v9 = vpop.f32.mrb[174].mxu1  ;;  %v8353_v34 = vadd.f32 %v5349_v27, %v13196_v58 }
 0x5d5   : > { %v10123_v47 = vpop.eup %10122  ;;  %v6053_v56 = vadd.f32 1.0, %v10121_v62  ;;  %10142 = vpow2.f32 %v6658_v29  ;;  %v5351_v35 = vpop.f32.mrb[143].mxu0  ;;  %v6673_v15 = vmul.f32 -1.442695, %v8352_v1 }
 0x5d6   : > { %v10125_v63 = vpop.eup %10124  ;;  %6368 = vst [vmem:[%s12941_s22 + $0x20] sm:$0xff] %v10123_v47  ;;  %10144 = vrcp.f32 %v6048_v8  ;;  %v7193_v0 = vpop.f32.mrb[175].mxu1  ;;  %v8354_v38 = vadd.f32 %v5351_v35, %v13198_v42  ;;  %v6674_v20 = vmul.f32 -1.442695, %v5644_v2  ;;  %v6679_v39 = vmul.f32 -1.442695, %v8353_v34 }
 0x5d7   : > { %v10127_v32 = vpop.eup %10126  ;;  %6369 = vst [vmem:[%s12941_s22 + $0x28] sm:$0xff] %v10125_v63  ;;  %10146 = vrcp.f32 %v6053_v56  ;;  %v7194_v41 = vadd.f32 %v7193_v0, %v7192_v9  ;;  %v5355_v48 = vpop.f32.mrb[144].mxu0 }
 0x5d8   : > { %v10129_v40 = vpop.eup %10128  ;;  %v6054_v5 = vadd.f32 1.0, %v10127_v32  ;;  %10148 = vpow2.f32 %v6659_v54  ;;  %v7195_v46 = vpop.f32.mrb[176].mxu1  ;;  %v6680_v49 = vmul.f32 -1.442695, %v8354_v38  ;;  %v8355_v9 = vadd.f32 %v5355_v48, %v13196_v58 }
 0x5d9   : > { %v10131_v25 = vpop.eup %10130  ;;  %6370 = vst [vmem:[%s12941_s22 + $0x30] sm:$0xff] %v10129_v40  ;;  %10150 = vpow2.f32 %v6660_v11  ;;  %v5649_v28 = vadd.f32 %v7194_v41, %v5504_v37  ;;  %v13251_v14 = vpop.f32.mrb[145].mxu0  ;;  %v5519_v37 = vadd.f32 %v13154_v61, %v13178_v36 }
 0x5da   : > { %v10133_v52 = vpop.eup %10132  ;;  %6375 = vst [vmem:[%s12941_s22 + $0x58] sm:$0xff] %v10131_v25  ;;  %10152 = vrcp.f32 %v6054_v5  ;;  %v7196_v53 = vpop.f32.mrb[177].mxu1 }
 0x5db   : > { %v10135_v45 = vpop.eup %10134  ;;  %6376 = vst [vmem:[%s12941_s22 + $0x60] sm:$0xff] %v10133_v52  ;;  %10154 = vpow2.f32 %v6665_v23  ;;  %v7197_v57 = vadd.f32 %v7196_v53, %v7195_v46  ;;  %v5361_v19 = vpop.f32.mrb[146].mxu0  ;;  %v6681_v27 = vmul.f32 -1.442695, %v5649_v28  ;;  %v5524_v23 = vadd.f32 %v13165_v51, %v13178_v36 }
 0x5dc   : > { %v10137_v17 = vpop.eup %10136  ;;  %v6055_v33 = vadd.f32 1.0, %v10135_v45  ;;  %10156 = vpow2.f32 %v6666_v3  ;;  %v7198_v29 = vpop.f32.mrb[178].mxu1  ;;  %v8356_v3 = vadd.f32 %v13251_v14, %v13198_v42  ;;  %v6686_v51 = vmul.f32 -1.442695, %v8355_v9 }
 0x5dd   : > { %v10139_v12 = vpop.eup %10138  ;;  %6377 = vst [vmem:[%s12941_s22 + $0x68] sm:$0xff] %v10137_v17  ;;  %10158 = vpow2.f32 %v6667_v21  ;;  %v13257_v55 = vadd.f32 %v7197_v57, %v5509_v16  ;;  %v13260_v60 = vpop.f32.mrb[147].mxu0  ;;  %v8357_v16 = vadd.f32 %v5361_v19, %v13196_v58 }
 0x5de   : > { %v10141_v13 = vpop.eup %10140  ;;  %6382 = vst [vmem:[%s12941_s22 + $0x90] sm:$0xff] %v10139_v12  ;;  %10160 = vrcp.f32 %v6055_v33  ;;  %v7199_v4 = vpop.f32.mrb[179].mxu1  ;;  %v6687_v12 = vmul.f32 -1.442695, %v8356_v3 }
 0x5df   : > { %v10143_v31 = vpop.eup %10142  ;;  %6383 = vst [vmem:[%s12941_s22 + $0x98] sm:$0xff] %v10141_v13  ;;  %10162 = vpow2.f32 %v6672_v26  ;;  %v7200_v43 = vadd.f32 %v7199_v4, %v7198_v29  ;;  %v13268_v54 = vpop.f32.mrb[148].mxu0  ;;  %v8358_v13 = vadd.f32 %v13260_v60, %v13198_v42 }
 0x5e0   : > { %v10145_v7 = vpop.eup %10144  ;;  %v6060_v44 = vadd.f32 1.0, %v10143_v31  ;;  %10164 = vpow2.f32 %v6673_v15  ;;  %v7201_v30 = vpop.f32.mrb[180].mxu1 }
 0x5e1   : > { %v10147_v62 = vpop.eup %10146  ;;  %6384 = vst [vmem:[%s12941_s22 + $0xa0] sm:$0xff] %v10145_v7  ;;  %10166 = vpow2.f32 %v6674_v20  ;;  %v13266_v8 = vadd.f32 %v7200_v43, %v5514_v24  ;;  %v13271_v22 = vpop.f32.mrb[149].mxu0  ;;  %v6688_v24 = vmul.f32 -1.442695, %v13257_v55  ;;  %v8359_v43 = vadd.f32 %v13268_v54, %v13196_v58 }
 0x5e2   : > { %v10149_v47 = vpop.eup %10148  ;;  %6389 = vst [vmem:[%s12941_s22 + $0xc8] sm:$0xff] %v10147_v62  ;;  %10168 = vrcp.f32 %v6060_v44  ;;  %v7202_v56 = vpop.f32.mrb[181].mxu1  ;;  %v6694_v9 = vmul.f32 -1.442695, %v8358_v13 }
 0x5e3   : > { %v10151_v11 = vpop.eup %10150  ;;  %v6061_v2 = vadd.f32 1.0, %v10149_v47  ;;  %10170 = vpow2.f32 %v6679_v39  ;;  %v7203_v0 = vadd.f32 %v7202_v56, %v7201_v30  ;;  %v13279_v6 = vpop.f32.mrb[150].mxu0  ;;  %v6693_v39 = vmul.f32 -1.442695, %v8357_v16 }
 0x5e4   : > { %v10153_v63 = vpop.eup %10152  ;;  %v6062_v35 = vadd.f32 1.0, %v10151_v11  ;;  %10172 = vpow2.f32 %v6680_v49  ;;  %v7204_v41 = vpop.f32.mrb[182].mxu1 }
 0x5e5   : > { %v10155_v32 = vpop.eup %10154  ;;  %6390 = vst [vmem:[%s12941_s22 + $0xd0] sm:$0xff] %v10153_v63  ;;  %10174 = vrcp.f32 %v6061_v2  ;;  %v13283_v61 = vadd.f32 %v7203_v0, %v5519_v37  ;;  %v13285_v1 = vpop.f32.mrb[151].mxu0  ;;  %v8360_v37 = vadd.f32 %v13271_v22, %v13198_v42 }
 0x5e6   : > { %v10157_v40 = vpop.eup %10156  ;;  %10176 = vrcp.f32 %v6062_v35  ;;  %v6067_v5 = vadd.f32 1.0, %v10155_v32  ;;  %v7205_v25 = vpop.f32.mrb[183].mxu1 }
 0x5e7   : > { %v10159_v21 = vpop.eup %10158  ;;  %v6068_v28 = vadd.f32 1.0, %v10157_v40  ;;  %10178 = vpow2.f32 %v6681_v27  ;;  %v7206_v36 = vadd.f32 %v7205_v25, %v7204_v41  ;;  %v5379_v14 = vpop.f32.mrb[152].mxu0  ;;  %v6700_v40 = vmul.f32 -1.442695, %v8359_v43 }
 0x5e8   : > { %v10161_v48 = vpop.eup %10160  ;;  %10180 = vrcp.f32 %v6067_v5  ;;  %v6069_v46 = vadd.f32 1.0, %v10159_v21  ;;  %v7207_v45 = vpop.f32.mrb[184].mxu1  ;;  %v13292_v57 = vadd.f32 %v5379_v14, %v13196_v58 }
 0x5e9   : > { %v10163_v52 = vpop.eup %10162  ;;  %6391 = vst [vmem:[%s12941_s22 + $0xd8] sm:$0xff] %v10161_v48  ;;  %10182 = vrcp.f32 %v6068_v28  ;;  %v13289_v53 = vadd.f32 %v7206_v36, %v5524_v23  ;;  %v5381_v17 = vpop.f32.mrb[153].mxu0  ;;  %v6701_v36 = vmul.f32 -1.442695, %v8360_v37  ;;  %v8362_v48 = vadd.f32 %v13285_v1, %v13198_v42 }
 0x5ea   : > { %v10165_v26 = vpop.eup %10164  ;;  %10184 = vrcp.f32 %v6069_v46  ;;  %v6074_v34 = vadd.f32 1.0, %v10163_v52  ;;  %v7208_v33 = vpop.f32.mrb[185].mxu1  ;;  %v13295_v20 = vadd.f32 %v5381_v17, %v13198_v42 }
 0x5eb   : > { %v10167_v15 = vpop.eup %10166  ;;  %v6075_v38 = vadd.f32 1.0, %v10165_v26  ;;  %10186 = vpow2.f32 %v6686_v51  ;;  %v7209_v4 = vadd.f32 %v7208_v33, %v7207_v45  ;;  %v5385_v7 = vpop.f32.mrb[154].mxu0  ;;  %v6702_v45 = vmul.f32 -1.442695, %v13283_v61 }
 0x5ec   : > { %v10169_v19 = vpop.eup %10168  ;;  %10188 = vrcp.f32 %v6074_v34  ;;  %v6076_v29 = vadd.f32 1.0, %v10167_v15  ;;  %v7210_v44 = vpop.f32.mrb[186].mxu1  ;;  %v13307_v60 = vadd.f32 %v5385_v7, %v13196_v58  ;;  %v6709_v13 = vmul.f32 -1.442695, %v13289_v53 }
 0x5ed   : > { %v10171_v31 = vpop.eup %10170  ;;  %6396 = vst [vmem:[%s12941_s22 + $0x100] sm:$0xff] %v10169_v19  ;;  %10190 = vrcp.f32 %v6075_v38  ;;  %v13304_v30 = vadd.f32 %v7209_v4, %v13184_v10  ;;  %v5387_v47 = vpop.f32.mrb[155].mxu0  ;;  %v6695_v10 = vmul.f32 -1.442695, %v13266_v8 }
 0x5ee   : > { %v10173_v49 = vpop.eup %10172  ;;  %10192 = vrcp.f32 %v6076_v29  ;;  %v6081_v62 = vadd.f32 1.0, %v10171_v31  ;;  %v7211_v56 = vpop.f32.mrb[187].mxu1  ;;  %v13310_v54 = vadd.f32 %v5387_v47, %v13198_v42  ;;  %v6715_v47 = vmul.f32 -1.442695, %v13295_v20 }
 0x5ef   : > { %v10175_v55 = vpop.eup %10174  ;;  %v6082_v11 = vadd.f32 1.0, %v10173_v49  ;;  %10194 = vpow2.f32 %v6687_v12  ;;  %v7212_v2 = vadd.f32 %v7211_v56, %v7210_v44  ;;  %v5391_v0 = vpop.f32.mrb[156].mxu0 }
 0x5f0   : > { %v10177_v27 = vpop.eup %10176  ;;  %6397 = vst [vmem:[%s12941_s22 + $0x108] sm:$0xff] %v10175_v55  ;;  %10196 = vrcp.f32 %v6081_v62  ;;  %v7213_v32 = vpop.f32.mrb[188].mxu1  ;;  %v13321_v5 = vadd.f32 %v5391_v0, %v13196_v58 }
 0x5f1   : > { %v10179_v63 = vpop.eup %10178  ;;  %6398 = vst [vmem:[%s12941_s22 + $0x110] sm:$0xff] %v10177_v27  ;;  %10198 = vrcp.f32 %v6082_v11  ;;  %v13318_v35 = vadd.f32 %v7212_v2, %v13189_v50  ;;  %v5393_v3 = vpop.f32.mrb[157].mxu0  ;;  %v8361_v50 = vadd.f32 %v13279_v6, %v13196_v58 }
 0x5f2   : > { %v10181_v23 = vpop.eup %10180  ;;  %v6083_v41 = vadd.f32 1.0, %v10179_v63  ;;  %10200 = vpow2.f32 %v6688_v24  ;;  %v7214_v25 = vpop.f32.mrb[189].mxu1  ;;  %v13327_v22 = vadd.f32 %v5393_v3, %v13198_v42  ;;  %v6716_v63 = vmul.f32 -1.442695, %v13304_v30 }
 0x5f3   : > { %v10183_v8 = vpop.eup %10182  ;;  %6403 = vst [vmem:[%s12941_s22 + $0x138] sm:$0xff] %v10181_v23  ;;  %10202 = vpow2.f32 %v6693_v39  ;;  %v7215_v21 = vadd.f32 %v7214_v25, %v7213_v32  ;;  %v5397_v52 = vpop.f32.mrb[158].mxu0  ;;  %v6707_v1 = vmul.f32 -1.442695, %v8361_v50  ;;  %v6714_v39 = vmul.f32 -1.442695, %v13292_v57 }
 0x5f4   : > { %v10185_v28 = vpop.eup %10184  ;;  %6404 = vst [vmem:[%s12941_s22 + $0x140] sm:$0xff] %v10183_v8  ;;  %10204 = vrcp.f32 %v6083_v41  ;;  %v7216_v6 = vpop.f32.mrb[190].mxu1  ;;  %v13338_v26 = vadd.f32 %v5397_v52, %v13196_v58  ;;  %v6708_v58 = vmul.f32 -1.442695, %v8362_v48  ;;  %v6721_v23 = vmul.f32 -1.442695, %v13307_v60 }
 0x5f5   : > { %v10187_v51 = vpop.eup %10186  ;;  %6405 = vst [vmem:[%s12941_s22 + $0x148] sm:$0xff] %v10185_v28  ;;  %10206 = vpow2.f32 %v6694_v9  ;;  %v13334_v46 = vadd.f32 %v7215_v21, %v13194_v59  ;;  %v5399_v34 = vpop.f32.mrb[159].mxu0  ;;  %v6722_v3 = vmul.f32 -1.442695, %v13310_v54  ;;  %v6723_v8 = vmul.f32 -1.442695, %v13318_v35 }
 0x5f6   : > { %v10189_v16 = vpop.eup %10188  ;;  %v6088_v14 = vadd.f32 1.0, %v10187_v51  ;;  %10208 = vpow2.f32 %v6695_v10  ;;  %v7217_v17 = vpop.f32.mrb[191].mxu1  ;;  %v13342_v59 = vadd.f32 %v5399_v34, %v13198_v42  ;;  %v6728_v60 = vmul.f32 -1.442695, %v13321_v5 }
 0x5f7   : > { %v10191_v33 = vpop.eup %10190  ;;  %6410 = vst [vmem:[%s12941_s22 + $0x170] sm:$0xff] %v10189_v16  ;;  %10210 = vpow2.f32 %v6700_v40  ;;  %v7218_v15 = vadd.f32 %v7217_v17, %v7216_v6  ;;  %v6729_v54 = vmul.f32 -1.442695, %v13327_v22  ;;  %v6730_v35 = vmul.f32 -1.442695, %v13334_v46 }
 0x5f8   : > { %v10193_v38 = vpop.eup %10192  ;;  %6411 = vst [vmem:[%s12941_s22 + $0x178] sm:$0xff] %v10191_v33  ;;  %10212 = vrcp.f32 %v6088_v14  ;;  %v6735_v5 = vmul.f32 -1.442695, %v13338_v26  ;;  %v6736_v22 = vmul.f32 -1.442695, %v13342_v59 }
 0x5f9   : > { %v10195_v12 = vpop.eup %10194  ;;  %6412 = vst [vmem:[%s12941_s22 + $0x180] sm:$0xff] %v10193_v38  ;;  %10214 = vpow2.f32 %v6701_v36  ;;  %v13347_v61 = vadd.f32 %v7218_v15, %v13201_v18 }
 0x5fa   : > { %v10197_v19 = vpop.eup %10196  ;;  %v6089_v29 = vadd.f32 1.0, %v10195_v12  ;;  %10216 = vpow2.f32 %v6702_v45 }
 0x5fb   : > { %v10199_v42 = vpop.eup %10198  ;;  %6417 = vst [vmem:[%s12941_s22 + $0x1a8] sm:$0xff] %v10197_v19  ;;  %10218 = vpow2.f32 %v6707_v1  ;;  %v6737_v46 = vmul.f32 -1.442695, %v13347_v61 }
 0x5fc   : > { %v10201_v4 = vpop.eup %10200  ;;  %6418 = vst [vmem:[%s12941_s22 + $0x1b0] sm:$0xff] %v10199_v42  ;;  %10220 = vrcp.f32 %v6089_v29 }
 0x5fd   : > { %v10203_v31 = vpop.eup %10202  ;;  %v6090_v24 = vadd.f32 1.0, %v10201_v4  ;;  %10222 = vpow2.f32 %v6708_v58 }
 0x5fe   : > { %v10205_v43 = vpop.eup %10204  ;;  %v6095_v18 = vadd.f32 1.0, %v10203_v31  ;;  %10224 = vpow2.f32 %v6709_v13 }
 0x5ff   : > { %v10207_v7 = vpop.eup %10206  ;;  %6419 = vst [vmem:[%s12941_s22 + $0x1b8] sm:$0xff] %v10205_v43  ;;  %10226 = vrcp.f32 %v6090_v24 }
 0x600   : > { %v10209_v44 = vpop.eup %10208  ;;  %10228 = vrcp.f32 %v6095_v18  ;;  %v6096_v53 = vadd.f32 1.0, %v10207_v7 }
 0x601   : > { %v10211_v49 = vpop.eup %10210  ;;  %v6097_v62 = vadd.f32 1.0, %v10209_v44  ;;  %10230 = vpow2.f32 %v6714_v39 }
 0x602   : > { %v10213_v56 = vpop.eup %10212  ;;  %10232 = vrcp.f32 %v6096_v53  ;;  %v6102_v55 = vadd.f32 1.0, %v10211_v49 }
 0x603   : > { %v10215_v57 = vpop.eup %10214  ;;  %6424 = vst [vmem:[%s12941_s22 + $0x1e0] sm:$0xff] %v10213_v56  ;;  %10234 = vrcp.f32 %v6097_v62 }
 0x604   : > { %v10217_v11 = vpop.eup %10216  ;;  %10236 = vrcp.f32 %v6102_v55  ;;  %v6103_v2 = vadd.f32 1.0, %v10215_v57 }
 0x605   : > { %v10219_v27 = vpop.eup %10218  ;;  %v6104_v9 = vadd.f32 1.0, %v10217_v11  ;;  %10238 = vpow2.f32 %v6715_v47 }
 0x606   : > { %v10221_v10 = vpop.eup %10220  ;;  %10240 = vrcp.f32 %v6103_v2  ;;  %v6109_v37 = vadd.f32 1.0, %v10219_v27 }
 0x607   : > { %v10223_v20 = vpop.eup %10222  ;;  %6425 = vst [vmem:[%s12941_s22 + $0x1e8] sm:$0xff] %v10221_v10  ;;  %10242 = vrcp.f32 %v6104_v9 }
 0x608   : > { %v10225_v0 = vpop.eup %10224  ;;  %10244 = vrcp.f32 %v6109_v37  ;;  %v6110_v32 = vadd.f32 1.0, %v10223_v20 }
 0x609   : > { %v10227_v41 = vpop.eup %10226  ;;  %v6111_v40 = vadd.f32 1.0, %v10225_v0  ;;  %10246 = vpow2.f32 %v6716_v63 }
 0x60a   : > { %v10229_v30 = vpop.eup %10228  ;;  %6426 = vst [vmem:[%s12941_s22 + $0x1f0] sm:$0xff] %v10227_v41  ;;  %10248 = vrcp.f32 %v6110_v32 }
 0x60b   : > { %v10231_v25 = vpop.eup %10230  ;;  %6431 = vst [vmem:[%s12941_s22 + $0x218] sm:$0xff] %v10229_v30  ;;  %10250 = vrcp.f32 %v6111_v40 }
 0x60c   : > { %v10233_v50 = vpop.eup %10232  ;;  %v6116_v21 = vadd.f32 1.0, %v10231_v25  ;;  %10252 = vpow2.f32 %v6721_v23 }
 0x60d   : > { %v10235_v28 = vpop.eup %10234  ;;  %6432 = vst [vmem:[%s12941_s22 + $0x220] sm:$0xff] %v10233_v50  ;;  %10254 = vpow2.f32 %v6722_v3 }
 0x60e   : > { %v10237_v51 = vpop.eup %10236  ;;  %6433 = vst [vmem:[%s12941_s22 + $0x228] sm:$0xff] %v10235_v28  ;;  %10256 = vrcp.f32 %v6116_v21 }
 0x60f   : > { %v10239_v36 = vpop.eup %10238  ;;  %6438 = vst [vmem:[%s12941_s22 + $0x250] sm:$0xff] %v10237_v51  ;;  %10258 = vpow2.f32 %v6723_v8 }
 0x610   : > { %v10241_v48 = vpop.eup %10240  ;;  %v6117_v52 = vadd.f32 1.0, %v10239_v36  ;;  %10260 = vpow2.f32 %v6728_v60 }
 0x611   : > { %v10243_v6 = vpop.eup %10242  ;;  %6439 = vst [vmem:[%s12941_s22 + $0x258] sm:$0xff] %v10241_v48  ;;  %10262 = vpow2.f32 %v6729_v54 }
 0x612   : > { %v10245_v16 = vpop.eup %10244  ;;  %6440 = vst [vmem:[%s12941_s22 + $0x260] sm:$0xff] %v10243_v6  ;;  %10264 = vrcp.f32 %v6117_v52 }
 0x613   : > { %v10247_v14 = vpop.eup %10246  ;;  %6445 = vst [vmem:[%s12941_s22 + $0x288] sm:$0xff] %v10245_v16  ;;  %10266 = vpow2.f32 %v6730_v35 }
 0x614   : > { %v10249_v45 = vpop.eup %10248  ;;  %v6118_v34 = vadd.f32 1.0, %v10247_v14  ;;  %10268 = vpow2.f32 %v6735_v5 }
 0x615   : > { %v10251_v26 = vpop.eup %10250  ;;  %6446 = vst [vmem:[%s12941_s22 + $0x290] sm:$0xff] %v10249_v45  ;;  %10270 = vpow2.f32 %v6736_v22 }
 0x616   : > { %v10253_v17 = vpop.eup %10252  ;;  %6447 = vst [vmem:[%s12941_s22 + $0x298] sm:$0xff] %v10251_v26  ;;  %10272 = vrcp.f32 %v6118_v34 }
 0x617   : > { %v10255_v33 = vpop.eup %10254  ;;  %v6123_v1 = vadd.f32 1.0, %v10253_v17  ;;  %10274 = vpow2.f32 %v6737_v46 }
 0x618   : > { %v10257_v59 = vpop.eup %10256  ;;  %v6124_v15 = vadd.f32 1.0, %v10255_v33 }
 0x619   : > { %v10259_v38 = vpop.eup %10258  ;;  %6452 = vst [vmem:[%s12941_s22 + $0x2c0] sm:$0xff] %v10257_v59  ;;  %10276 = vrcp.f32 %v6123_v1 }
 0x61a   : > { %v10261_v12 = vpop.eup %10260  ;;  %10278 = vrcp.f32 %v6124_v15  ;;  %v6125_v58 = vadd.f32 1.0, %v10259_v38 }
 0x61b   : > { %v10263_v61 = vpop.eup %10262  ;;  %v6130_v19 = vadd.f32 1.0, %v10261_v12 }
 0x61c   : > { %v10265_v29 = vpop.eup %10264  ;;  %10280 = vrcp.f32 %v6125_v58  ;;  %v6131_v13 = vadd.f32 1.0, %v10263_v61 }
 0x61d   : > { %v10267_v42 = vpop.eup %10266  ;;  %6453 = vst [vmem:[%s12941_s22 + $0x2c8] sm:$0xff] %v10265_v29  ;;  %10282 = vrcp.f32 %v6130_v19 }
 0x61e   : > { %v10269_v4 = vpop.eup %10268  ;;  %10284 = vrcp.f32 %v6131_v13  ;;  %v6132_v31 = vadd.f32 1.0, %v10267_v42 }
 0x61f   : > { %v10271_v24 = vpop.eup %10270  ;;  %v6137_v39 = vadd.f32 1.0, %v10269_v4 }
 0x620   : > { %v10273_v43 = vpop.eup %10272  ;;  %10286 = vrcp.f32 %v6132_v31  ;;  %v6138_v18 = vadd.f32 1.0, %v10271_v24 }
 0x621   : > { %v10275_v7 = vpop.eup %10274  ;;  %6454 = vst [vmem:[%s12941_s22 + $0x2d0] sm:$0xff] %v10273_v43  ;;  %10288 = vrcp.f32 %v6137_v39 }
 0x622   : > { %10290 = vrcp.f32 %v6138_v18  ;;  %v6139_v44 = vadd.f32 1.0, %v10275_v7 }
 0x623   : > { %v10277_v53 = vpop.eup %10276 }
 0x624   : > { %v10279_v49 = vpop.eup %10278  ;;  %6459 = vst [vmem:[%s12941_s22 + $0x2f8] sm:$0xff] %v10277_v53  ;;  %10292 = vrcp.f32 %v6139_v44 }
 0x625   : > { %6460 = vst [vmem:[%s12941_s22 + $0x300] sm:$0xff] %v10279_v49 }
 0x626   : > { %v10281_v62 = vpop.eup %10280 }
 0x627   : > { %v10283_v47 = vpop.eup %10282  ;;  %6461 = vst [vmem:[%s12941_s22 + $0x308] sm:$0xff] %v10281_v62 }
 0x628   : > { %v10285_v56 = vpop.eup %10284  ;;  %6466 = vst [vmem:[%s12941_s22 + $0x330] sm:$0xff] %v10283_v47 }
 0x629   : > { %6467 = vst [vmem:[%s12941_s22 + $0x338] sm:$0xff] %v10285_v56 }
 0x62a   : > { %v10287_v55 = vpop.eup %10286 }
 0x62b   : > { %v10289_v57 = vpop.eup %10288  ;;  %6468 = vst [vmem:[%s12941_s22 + $0x340] sm:$0xff] %v10287_v55 }
 0x62c   : > { %v10291_v11 = vpop.eup %10290  ;;  %6473 = vst [vmem:[%s12941_s22 + $0x368] sm:$0xff] %v10289_v57 }
 0x62d   : > { %6474 = vst [vmem:[%s12941_s22 + $0x370] sm:$0xff] %v10291_v11 }
 0x62e   : > { %v10293_v2 = vpop.eup %10292 }
 0x62f   : > { %6475 = vst [vmem:[%s12941_s22 + $0x378] sm:$0xff] %v10293_v2 }
 0x630 PF: > { %s22_s17 = sadd.s32 1, %s10301_s17  }
 0x631   : > { %p19_p4 = scmp.ge.s32.totalorder %s22_s17, 4  }
 0x633   :  { %21 = sbr.rel (!%p19_p4) target bundleno = 1 (0x1), region = 105 }

</bundles_post_ra>
